<compile_context>
chip_gen: v7x
topology: tpu7x:2x2x1
jax: 0.10.0
libtpu: 0.0.40
codegen_flags: <defaults>
</compile_context>

<pallas_src>
import functools

import jax
import jax.numpy as jnp
from jax.experimental import pallas as pl
from jax.experimental.pallas import tpu as pltpu


# ----------------------------- Pallas kernels ------------------------------ #

def _conv_stats_kernel(xph_ref, w_ref, y_ref, psum_ref, psq_ref, patch_ref,
                       *, cin, ho, wo, kh_size, kw_size):
    """Direct (HBM-im2col-free) conv for one sample + BN partial statistics.

    xph_ref : (4*Cin, Ho+1, Wo+1) bf16  -- stride-2 phase split of the padded
              input for this sample, phase-major channel blocks.
    w_ref   : (Cout, K=KH*KW*Cin) bf16  -- weights, K ordered (kh, kw, cin).
    y_ref   : (Cout, Ho*Wo) bf16        -- conv output (bias-free).
    psum/psq: (Cout, 1) f32             -- per-sample sum / sum-of-squares.
    patch_ref (scratch): (K, Ho*Wo) bf16 -- in-VMEM im2col patch matrix.
    """
    # ---- in-VMEM im2col: assemble the (K, HW) patch matrix for this sample.
    # Each (kh, kw) tap is a (dh, dw)-shifted window of one stride-2 phase; one
    # output row at a time is copied into its lane range of the patch matrix.
    for kh in range(kh_size):
        for kw in range(kw_size):
            t = kh * kw_size + kw
            p = (kh % 2) * 2 + (kw % 2)          # which stride-2 phase
            dh, dw = kh // 2, kw // 2            # shift inside the phase

            def copy_row(i, carry, t=t, p=p, dh=dh, dw=dw):
                patch_ref[pl.ds(t * cin, cin), pl.ds(i * wo, wo)] = (
                    xph_ref[pl.ds(p * cin, cin), i + dh, dw:dw + wo])
                return carry

            if ho <= 32:                          # small spatial: full unroll
                for i in range(ho):
                    copy_row(i, 0)
            else:                                 # large spatial: rolled loop
                jax.lax.fori_loop(0, ho, copy_row, 0)

    # ---- one lane-dense MXU matmul over the full K = KH*KW*Cin contraction.
    acc = jnp.dot(w_ref[...], patch_ref[...],
                  preferred_element_type=jnp.float32)        # (Cout, HW) f32

    # ---- BN partial stats from the f32 accumulator; y goes to HBM as bf16.
    psum_ref[...] = jnp.sum(acc, axis=1, keepdims=True)
    psq_ref[...] = jnp.sum(acc * acc, axis=1, keepdims=True)
    y_ref[...] = acc.astype(y_ref.dtype)


def _bn_lrelu_kernel(y_ref, scale_ref, shift_ref, o_ref, *, slope):
    """Fused BatchNorm apply (precomputed per-channel scale/shift) + LeakyReLU."""
    yhat = y_ref[...].astype(jnp.float32) * scale_ref[...] + shift_ref[...]
    o_ref[...] = jnp.where(yhat >= 0, yhat, slope * yhat)


# ------------------------------ Helpers ------------------------------------- #

def _round_up(x, m):
    return (x + m - 1) // m * m


def _vmem_budget():
    """Usable per-call VMEM budget with headroom (v7x: 64 MiB physical)."""
    try:
        cap = pltpu.get_tpu_info().vmem_capacity_bytes
    except Exception:
        cap = 64 * 1024 * 1024
    return int(min(cap - 8 * 1024 * 1024, 112 * 1024 * 1024))


def _pick_hw_tile(hw, max_cols):
    """Largest lane-dense block width: whole HW if it fits, else a /128 divisor."""
    if hw <= max_cols:
        return hw
    t = (min(max_cols, hw) // 128) * 128
    while t >= 128:
        if hw % t == 0:
            return t
        t -= 128
    return hw


# ------------------------------- Wrapper ------------------------------------ #

def encoder_block_forward(x_nchw, w_oihw, bias, gamma, beta,
                          *, stride=2, padding=1, eps=1e-5, slope=0.2):
    """Forward pass of _EncoderBlock.  Input/output are NCHW float32."""
    # Conv bias cancels exactly under training-mode BatchNorm:
    # (y + b) - mean(y + b) == y - mean(y).  Dropping it removes one stream.
    del bias

    N, Cin, H, W = x_nchw.shape
    Cout, Cin_w, KH, KW = w_oihw.shape
    assert Cin == Cin_w
    assert stride == 2 and padding == 1 and KH == 4 and KW == 4, \
        "kernel specialized to the pix2pix encoder conv (k=4, s=2, p=1)"
    assert H % 2 == 0 and W % 2 == 0
    Ho, Wo = H // 2, W // 2
    HW = Ho * Wo
    Hoe, Woe = Ho + 1, Wo + 1          # per-phase spatial extents
    K = KH * KW * Cin

    # ---- stride-2 phase split of the padded input (space-to-depth) -----------
    # ~1x the raw input bytes (vs the old 16x-duplicated im2col tensor); every
    # (kh, kw) tap is a contiguous shifted window of one of these 4 phases.
    xp = jnp.pad(x_nchw, ((0, 0), (0, 0), (padding, padding), (padding, padding)))
    xp = xp.astype(jnp.bfloat16)
    xph = jnp.concatenate(
        [xp[:, :, ph::2, pw::2] for ph in range(2) for pw in range(2)],
        axis=1)                                           # (N, 4*Cin, Hoe, Woe)

    # Weights -> (Cout, K) bf16 with K ordered (kh, kw, cin), matching the
    # patch-matrix row order assembled in-kernel.
    w2 = jnp.transpose(w_oihw, (0, 2, 3, 1)).reshape(Cout, K).astype(jnp.bfloat16)

    budget = _vmem_budget()
    coutp = _round_up(Cout, 8)

    # ---- kernel 1: conv (in-VMEM im2col + MXU matmul) + BN partial stats -----
    k1_est = (2 * (4 * Cin) * _round_up(Hoe, 8) * _round_up(Woe, 128) * 2   # xph
              + 2 * coutp * _round_up(K, 128) * 2                           # weights
              + 2 * coutp * _round_up(HW, 128) * 2                          # y out
              + 4 * coutp * 128 * 4                                         # stats
              + _round_up(K, 8) * _round_up(HW, 128) * 2                    # patch scratch
              + coutp * _round_up(HW, 128) * 4)                             # f32 acc
    vmem1 = int(min(max(2 * k1_est, 8 * 1024 * 1024), budget))

    conv_kernel = functools.partial(_conv_stats_kernel, cin=Cin, ho=Ho, wo=Wo,
                                    kh_size=KH, kw_size=KW)
    y, psum, psq = pl.pallas_call(
        conv_kernel,
        out_shape=(
            jax.ShapeDtypeStruct((N, Cout, HW), jnp.bfloat16),   # bf16 y
            jax.ShapeDtypeStruct((N, Cout, 1), jnp.float32),
            jax.ShapeDtypeStruct((N, Cout, 1), jnp.float32),
        ),
        grid_spec=pltpu.PrefetchScalarGridSpec(
            num_scalar_prefetch=0,
            grid=(N,),
            in_specs=[
                pl.BlockSpec((None, 4 * Cin, Hoe, Woe), lambda n: (n, 0, 0, 0)),
                pl.BlockSpec((Cout, K), lambda n: (0, 0)),       # resident weights
            ],
            out_specs=[
                pl.BlockSpec((None, Cout, HW), lambda n: (n, 0, 0)),
                pl.BlockSpec((None, Cout, 1), lambda n: (n, 0, 0)),
                pl.BlockSpec((None, Cout, 1), lambda n: (n, 0, 0)),
            ],
            scratch_shapes=[pltpu.VMEM((K, HW), jnp.bfloat16)],  # in-VMEM patches
        ),
        compiler_params=pltpu.CompilerParams(
            dimension_semantics=("parallel",),
            vmem_limit_bytes=vmem1),
    )(xph, w2)

    # ---- tiny per-channel reduction + scale/shift precompute (XLA side) ------
    # NOTE: E[y^2] - E[y]^2 in f32; fine at these magnitudes, a shifted/two-pass
    # variance would be more robust for very large activations.
    count = jnp.float32(N * HW)
    ch_sum = jnp.sum(psum, axis=0)                           # (Cout, 1)
    ch_sq = jnp.sum(psq, axis=0)                             # (Cout, 1)
    mean = ch_sum / count
    var = jnp.maximum(ch_sq / count - mean * mean, 0.0)      # biased, like torch BN
    inv_std = jax.lax.rsqrt(var + eps)
    scale = gamma.reshape(Cout, 1).astype(jnp.float32) * inv_std
    shift = beta.reshape(Cout, 1).astype(jnp.float32) - mean * scale

    # ---- kernel 2: BN apply + LeakyReLU (bf16 in, f32 NCHW out) ---------------
    max_cols = max(128, ((budget // 4) // (coutp * (2 + 4) * 2)) // 128 * 128)
    tm2 = _pick_hw_tile(HW, max_cols)
    n_m2 = HW // tm2
    k2_est = (2 * coutp * _round_up(tm2, 128) * (2 + 4)      # bf16 in + f32 out
              + 4 * coutp * 128 * 4)                         # scale/shift
    vmem2 = int(min(max(2 * k2_est, 8 * 1024 * 1024), budget))

    out = pl.pallas_call(
        functools.partial(_bn_lrelu_kernel, slope=slope),
        out_shape=jax.ShapeDtypeStruct((N, Cout, HW), jnp.float32),
        grid_spec=pltpu.PrefetchScalarGridSpec(
            num_scalar_prefetch=0,
            grid=(N, n_m2),
            in_specs=[
                pl.BlockSpec((None, Cout, tm2), lambda n, m: (n, 0, m)),
                pl.BlockSpec((Cout, 1), lambda n, m: (0, 0)),
                pl.BlockSpec((Cout, 1), lambda n, m: (0, 0)),
            ],
            out_specs=pl.BlockSpec((None, Cout, tm2), lambda n, m: (n, 0, m)),
        ),
        compiler_params=pltpu.CompilerParams(
            dimension_semantics=("parallel", "parallel"),
            vmem_limit_bytes=vmem2),
    )(y, scale, shift)

    # (N, Cout, Ho*Wo) is already NCHW-contiguous: free reshape, no transpose.
    return out.reshape(N, Cout, Ho, Wo)


# ------------------------------ Reference ------------------------------------ #

def _reference(x_nchw, w_oihw, bias, gamma, beta, *, eps=1e-5, slope=0.2):
    conv = jax.lax.conv_general_dilated(
        x_nchw, w_oihw, window_strides=(2, 2), padding=((1, 1), (1, 1)),
        dimension_numbers=("NCHW", "OIHW", "NCHW"),
        precision=jax.lax.Precision.HIGHEST)
    conv = conv + bias[None, :, None, None]
    mean = conv.mean(axis=(0, 2, 3), keepdims=True)
    var = conv.var(axis=(0, 2, 3), keepdims=True)            # biased, like torch BN fwd
    yhat = (conv - mean) / jnp.sqrt(var + eps)
    yhat = yhat * gamma[None, :, None, None] + beta[None, :, None, None]
    return jnp.where(yhat >= 0, yhat, slope * yhat)


# -------------------------------- Main ---------------------------------------- #

if __name__ == "__main__":
    key = jax.random.PRNGKey(0)
    k_x, k_w, k_b = jax.random.split(key, 3)

    N, Cin, H, W = 2, 4, 16, 16
    Cout, KH, KW = 8, 4, 4

    x = jax.random.normal(k_x, (N, Cin, H, W), dtype=jnp.float32)
    w = 0.02 * jax.random.normal(k_w, (Cout, Cin, KH, KW), dtype=jnp.float32)
    b = 0.01 * jax.random.normal(k_b, (Cout,), dtype=jnp.float32)
    gamma = jnp.ones((Cout,), dtype=jnp.float32)             # BatchNorm2d default init
    beta = jnp.zeros((Cout,), dtype=jnp.float32)

    out = encoder_block_forward(x, w, b, gamma, beta)
    out = jax.block_until_ready(out)

    ref = _reference(x, w, b, gamma, beta)
    assert out.shape == (N, Cout, H // 2, W // 2), out.shape
    # bf16 MXU feed + bf16 intermediate y -> slightly looser tolerance than f32.
    assert jnp.allclose(out, ref, atol=2e-2, rtol=2e-2), \
        float(jnp.max(jnp.abs(out - ref)))

    print("KERNEL_OK")
</pallas_src>

<mosaic_0001>
module attributes {stable_mosaic.version = 11 : i64} {
  func.func @_conv_stats_kernel(%arg0: i32, %arg1: memref<1x16x9x9xbf16, #tpu.memory_space<vmem>>, %arg2: memref<8x64xbf16, #tpu.memory_space<vmem>>, %arg3: memref<1x8x64xbf16, #tpu.memory_space<vmem>>, %arg4: memref<1x8x1xf32, #tpu.memory_space<vmem>>, %arg5: memref<1x8x1xf32, #tpu.memory_space<vmem>>, %arg6: memref<64x64xbf16, #tpu.memory_space<vmem>>) attributes {dimension_semantics = [#tpu.dimension_semantics<parallel>], iteration_bounds = array<i64: 2>, scalar_prefetch = 0 : i64, scratch_operands = 1 : i64, tpu.core_type = #tpu.core_type<tc>, window_params = [{transform_indices = @transform_0, window_bounds = array<i64: 1, 16, 9, 9>}, {pipeline_mode = #tpu.pipeline_mode<synchronous>, transform_indices = @transform_1, window_bounds = array<i64: 8, 64>}, {transform_indices = @transform_2, window_bounds = array<i64: 1, 8, 64>}, {transform_indices = @transform_3, window_bounds = array<i64: 1, 8, 1>}, {transform_indices = @transform_4, window_bounds = array<i64: 1, 8, 1>}]} {
    %c0 = arith.constant 0 : index
    %c0_0 = arith.constant 0 : index
    %c0_1 = arith.constant 0 : index
    %c0_2 = arith.constant 0 : index
    %0 = vector.load %arg1[%c0, %c0_0, %c0_1, %c0_2] : memref<1x16x9x9xbf16, #tpu.memory_space<vmem>>, vector<1x4x1x8xbf16>
    %1 = vector.shape_cast %0 : vector<1x4x1x8xbf16> to vector<4x8xbf16>
    %c0_3 = arith.constant 0 : index
    %c0_4 = arith.constant 0 : index
    %2 = vector.load %arg6[%c0_3, %c0_4] : memref<64x64xbf16, #tpu.memory_space<vmem>>, vector<4x8xbf16>
    tpu.vector_store %arg6[%c0_3, %c0_4], %1 {strides = array<i32>} : memref<64x64xbf16, #tpu.memory_space<vmem>>, vector<4x8xbf16>,
    %c0_5 = arith.constant 0 : index
    %c0_6 = arith.constant 0 : index
    %c1 = arith.constant 1 : index
    %c0_7 = arith.constant 0 : index
    %3 = vector.load %arg1[%c0_5, %c0_6, %c1, %c0_7] : memref<1x16x9x9xbf16, #tpu.memory_space<vmem>>, vector<1x4x1x8xbf16>
    %4 = vector.shape_cast %3 : vector<1x4x1x8xbf16> to vector<4x8xbf16>
    %c0_8 = arith.constant 0 : index
    %c8 = arith.constant 8 : index
    %5 = vector.load %arg6[%c0_8, %c8] : memref<64x64xbf16, #tpu.memory_space<vmem>>, vector<4x8xbf16>
    tpu.vector_store %arg6[%c0_8, %c8], %4 {strides = array<i32>} : memref<64x64xbf16, #tpu.memory_space<vmem>>, vector<4x8xbf16>,
    %c0_9 = arith.constant 0 : index
    %c0_10 = arith.constant 0 : index
    %c2 = arith.constant 2 : index
    %c0_11 = arith.constant 0 : index
    %6 = vector.load %arg1[%c0_9, %c0_10, %c2, %c0_11] : memref<1x16x9x9xbf16, #tpu.memory_space<vmem>>, vector<1x4x1x8xbf16>
    %7 = vector.shape_cast %6 : vector<1x4x1x8xbf16> to vector<4x8xbf16>
    %c0_12 = arith.constant 0 : index
    %c16 = arith.constant 16 : index
    %8 = vector.load %arg6[%c0_12, %c16] : memref<64x64xbf16, #tpu.memory_space<vmem>>, vector<4x8xbf16>
    tpu.vector_store %arg6[%c0_12, %c16], %7 {strides = array<i32>} : memref<64x64xbf16, #tpu.memory_space<vmem>>, vector<4x8xbf16>,
    %c0_13 = arith.constant 0 : index
    %c0_14 = arith.constant 0 : index
    %c3 = arith.constant 3 : index
    %c0_15 = arith.constant 0 : index
    %9 = vector.load %arg1[%c0_13, %c0_14, %c3, %c0_15] : memref<1x16x9x9xbf16, #tpu.memory_space<vmem>>, vector<1x4x1x8xbf16>
    %10 = vector.shape_cast %9 : vector<1x4x1x8xbf16> to vector<4x8xbf16>
    %c0_16 = arith.constant 0 : index
    %c24 = arith.constant 24 : index
    %11 = vector.load %arg6[%c0_16, %c24] : memref<64x64xbf16, #tpu.memory_space<vmem>>, vector<4x8xbf16>
    tpu.vector_store %arg6[%c0_16, %c24], %10 {strides = array<i32>} : memref<64x64xbf16, #tpu.memory_space<vmem>>, vector<4x8xbf16>,
    %c0_17 = arith.constant 0 : index
    %c0_18 = arith.constant 0 : index
    %c4 = arith.constant 4 : index
    %c0_19 = arith.constant 0 : index
    %12 = vector.load %arg1[%c0_17, %c0_18, %c4, %c0_19] : memref<1x16x9x9xbf16, #tpu.memory_space<vmem>>, vector<1x4x1x8xbf16>
    %13 = vector.shape_cast %12 : vector<1x4x1x8xbf16> to vector<4x8xbf16>
    %c0_20 = arith.constant 0 : index
    %c32 = arith.constant 32 : index
    %14 = vector.load %arg6[%c0_20, %c32] : memref<64x64xbf16, #tpu.memory_space<vmem>>, vector<4x8xbf16>
    tpu.vector_store %arg6[%c0_20, %c32], %13 {strides = array<i32>} : memref<64x64xbf16, #tpu.memory_space<vmem>>, vector<4x8xbf16>,
    %c0_21 = arith.constant 0 : index
    %c0_22 = arith.constant 0 : index
    %c5 = arith.constant 5 : index
    %c0_23 = arith.constant 0 : index
    %15 = vector.load %arg1[%c0_21, %c0_22, %c5, %c0_23] : memref<1x16x9x9xbf16, #tpu.memory_space<vmem>>, vector<1x4x1x8xbf16>
    %16 = vector.shape_cast %15 : vector<1x4x1x8xbf16> to vector<4x8xbf16>
    %c0_24 = arith.constant 0 : index
    %c40 = arith.constant 40 : index
    %17 = vector.load %arg6[%c0_24, %c40] : memref<64x64xbf16, #tpu.memory_space<vmem>>, vector<4x8xbf16>
    tpu.vector_store %arg6[%c0_24, %c40], %16 {strides = array<i32>} : memref<64x64xbf16, #tpu.memory_space<vmem>>, vector<4x8xbf16>,
    %c0_25 = arith.constant 0 : index
    %c0_26 = arith.constant 0 : index
    %c6 = arith.constant 6 : index
    %c0_27 = arith.constant 0 : index
    %18 = vector.load %arg1[%c0_25, %c0_26, %c6, %c0_27] : memref<1x16x9x9xbf16, #tpu.memory_space<vmem>>, vector<1x4x1x8xbf16>
    %19 = vector.shape_cast %18 : vector<1x4x1x8xbf16> to vector<4x8xbf16>
    %c0_28 = arith.constant 0 : index
    %c48 = arith.constant 48 : index
    %20 = vector.load %arg6[%c0_28, %c48] : memref<64x64xbf16, #tpu.memory_space<vmem>>, vector<4x8xbf16>
    tpu.vector_store %arg6[%c0_28, %c48], %19 {strides = array<i32>} : memref<64x64xbf16, #tpu.memory_space<vmem>>, vector<4x8xbf16>,
    %c0_29 = arith.constant 0 : index
    %c0_30 = arith.constant 0 : index
    %c7 = arith.constant 7 : index
    %c0_31 = arith.constant 0 : index
    %21 = vector.load %arg1[%c0_29, %c0_30, %c7, %c0_31] : memref<1x16x9x9xbf16, #tpu.memory_space<vmem>>, vector<1x4x1x8xbf16>
    %22 = vector.shape_cast %21 : vector<1x4x1x8xbf16> to vector<4x8xbf16>
    %c0_32 = arith.constant 0 : index
    %c56 = arith.constant 56 : index
    %23 = vector.load %arg6[%c0_32, %c56] : memref<64x64xbf16, #tpu.memory_space<vmem>>, vector<4x8xbf16>
    tpu.vector_store %arg6[%c0_32, %c56], %22 {strides = array<i32>} : memref<64x64xbf16, #tpu.memory_space<vmem>>, vector<4x8xbf16>,
    %c0_33 = arith.constant 0 : index
    %c4_34 = arith.constant 4 : index
    %c0_35 = arith.constant 0 : index
    %c0_36 = arith.constant 0 : index
    %24 = vector.load %arg1[%c0_33, %c4_34, %c0_35, %c0_36] : memref<1x16x9x9xbf16, #tpu.memory_space<vmem>>, vector<1x4x1x8xbf16>
    %25 = vector.shape_cast %24 : vector<1x4x1x8xbf16> to vector<4x8xbf16>
    %c4_37 = arith.constant 4 : index
    %c0_38 = arith.constant 0 : index
    %26 = vector.load %arg6[%c4_37, %c0_38] : memref<64x64xbf16, #tpu.memory_space<vmem>>, vector<4x8xbf16>
    tpu.vector_store %arg6[%c4_37, %c0_38], %25 {strides = array<i32>} : memref<64x64xbf16, #tpu.memory_space<vmem>>, vector<4x8xbf16>,
    %c0_39 = arith.constant 0 : index
    %c4_40 = arith.constant 4 : index
    %c1_41 = arith.constant 1 : index
    %c0_42 = arith.constant 0 : index
    %27 = vector.load %arg1[%c0_39, %c4_40, %c1_41, %c0_42] : memref<1x16x9x9xbf16, #tpu.memory_space<vmem>>, vector<1x4x1x8xbf16>
    %28 = vector.shape_cast %27 : vector<1x4x1x8xbf16> to vector<4x8xbf16>
    %c4_43 = arith.constant 4 : index
    %c8_44 = arith.constant 8 : index
    %29 = vector.load %arg6[%c4_43, %c8_44] : memref<64x64xbf16, #tpu.memory_space<vmem>>, vector<4x8xbf16>
    tpu.vector_store %arg6[%c4_43, %c8_44], %28 {strides = array<i32>} : memref<64x64xbf16, #tpu.memory_space<vmem>>, vector<4x8xbf16>,
    %c0_45 = arith.constant 0 : index
    %c4_46 = arith.constant 4 : index
    %c2_47 = arith.constant 2 : index
    %c0_48 = arith.constant 0 : index
    %30 = vector.load %arg1[%c0_45, %c4_46, %c2_47, %c0_48] : memref<1x16x9x9xbf16, #tpu.memory_space<vmem>>, vector<1x4x1x8xbf16>
    %31 = vector.shape_cast %30 : vector<1x4x1x8xbf16> to vector<4x8xbf16>
    %c4_49 = arith.constant 4 : index
    %c16_50 = arith.constant 16 : index
    %32 = vector.load %arg6[%c4_49, %c16_50] : memref<64x64xbf16, #tpu.memory_space<vmem>>, vector<4x8xbf16>
    tpu.vector_store %arg6[%c4_49, %c16_50], %31 {strides = array<i32>} : memref<64x64xbf16, #tpu.memory_space<vmem>>, vector<4x8xbf16>,
    %c0_51 = arith.constant 0 : index
    %c4_52 = arith.constant 4 : index
    %c3_53 = arith.constant 3 : index
    %c0_54 = arith.constant 0 : index
    %33 = vector.load %arg1[%c0_51, %c4_52, %c3_53, %c0_54] : memref<1x16x9x9xbf16, #tpu.memory_space<vmem>>, vector<1x4x1x8xbf16>
    %34 = vector.shape_cast %33 : vector<1x4x1x8xbf16> to vector<4x8xbf16>
    %c4_55 = arith.constant 4 : index
    %c24_56 = arith.constant 24 : index
    %35 = vector.load %arg6[%c4_55, %c24_56] : memref<64x64xbf16, #tpu.memory_space<vmem>>, vector<4x8xbf16>
    tpu.vector_store %arg6[%c4_55, %c24_56], %34 {strides = array<i32>} : memref<64x64xbf16, #tpu.memory_space<vmem>>, vector<4x8xbf16>,
    %c0_57 = arith.constant 0 : index
    %c4_58 = arith.constant 4 : index
    %c4_59 = arith.constant 4 : index
    %c0_60 = arith.constant 0 : index
    %36 = vector.load %arg1[%c0_57, %c4_58, %c4_59, %c0_60] : memref<1x16x9x9xbf16, #tpu.memory_space<vmem>>, vector<1x4x1x8xbf16>
    %37 = vector.shape_cast %36 : vector<1x4x1x8xbf16> to vector<4x8xbf16>
    %c4_61 = arith.constant 4 : index
    %c32_62 = arith.constant 32 : index
    %38 = vector.load %arg6[%c4_61, %c32_62] : memref<64x64xbf16, #tpu.memory_space<vmem>>, vector<4x8xbf16>
    tpu.vector_store %arg6[%c4_61, %c32_62], %37 {strides = array<i32>} : memref<64x64xbf16, #tpu.memory_space<vmem>>, vector<4x8xbf16>,
    %c0_63 = arith.constant 0 : index
    %c4_64 = arith.constant 4 : index
    %c5_65 = arith.constant 5 : index
    %c0_66 = arith.constant 0 : index
    %39 = vector.load %arg1[%c0_63, %c4_64, %c5_65, %c0_66] : memref<1x16x9x9xbf16, #tpu.memory_space<vmem>>, vector<1x4x1x8xbf16>
    %40 = vector.shape_cast %39 : vector<1x4x1x8xbf16> to vector<4x8xbf16>
    %c4_67 = arith.constant 4 : index
    %c40_68 = arith.constant 40 : index
    %41 = vector.load %arg6[%c4_67, %c40_68] : memref<64x64xbf16, #tpu.memory_space<vmem>>, vector<4x8xbf16>
    tpu.vector_store %arg6[%c4_67, %c40_68], %40 {strides = array<i32>} : memref<64x64xbf16, #tpu.memory_space<vmem>>, vector<4x8xbf16>,
    %c0_69 = arith.constant 0 : index
    %c4_70 = arith.constant 4 : index
    %c6_71 = arith.constant 6 : index
    %c0_72 = arith.constant 0 : index
    %42 = vector.load %arg1[%c0_69, %c4_70, %c6_71, %c0_72] : memref<1x16x9x9xbf16, #tpu.memory_space<vmem>>, vector<1x4x1x8xbf16>
    %43 = vector.shape_cast %42 : vector<1x4x1x8xbf16> to vector<4x8xbf16>
    %c4_73 = arith.constant 4 : index
    %c48_74 = arith.constant 48 : index
    %44 = vector.load %arg6[%c4_73, %c48_74] : memref<64x64xbf16, #tpu.memory_space<vmem>>, vector<4x8xbf16>
    tpu.vector_store %arg6[%c4_73, %c48_74], %43 {strides = array<i32>} : memref<64x64xbf16, #tpu.memory_space<vmem>>, vector<4x8xbf16>,
    %c0_75 = arith.constant 0 : index
    %c4_76 = arith.constant 4 : index
    %c7_77 = arith.constant 7 : index
    %c0_78 = arith.constant 0 : index
    %45 = vector.load %arg1[%c0_75, %c4_76, %c7_77, %c0_78] : memref<1x16x9x9xbf16, #tpu.memory_space<vmem>>, vector<1x4x1x8xbf16>
    %46 = vector.shape_cast %45 : vector<1x4x1x8xbf16> to vector<4x8xbf16>
    %c4_79 = arith.constant 4 : index
    %c56_80 = arith.constant 56 : index
    %47 = vector.load %arg6[%c4_79, %c56_80] : memref<64x64xbf16, #tpu.memory_space<vmem>>, vector<4x8xbf16>
    tpu.vector_store %arg6[%c4_79, %c56_80], %46 {strides = array<i32>} : memref<64x64xbf16, #tpu.memory_space<vmem>>, vector<4x8xbf16>,
    %c0_81 = arith.constant 0 : index
    %c0_82 = arith.constant 0 : index
    %c0_83 = arith.constant 0 : index
    %c1_84 = arith.constant 1 : index
    %48 = vector.load %arg1[%c0_81, %c0_82, %c0_83, %c1_84] : memref<1x16x9x9xbf16, #tpu.memory_space<vmem>>, vector<1x4x1x8xbf16>
    %49 = vector.shape_cast %48 : vector<1x4x1x8xbf16> to vector<4x8xbf16>
    %c8_85 = arith.constant 8 : index
    %c0_86 = arith.constant 0 : index
    %50 = vector.load %arg6[%c8_85, %c0_86] : memref<64x64xbf16, #tpu.memory_space<vmem>>, vector<4x8xbf16>
    tpu.vector_store %arg6[%c8_85, %c0_86], %49 {strides = array<i32>} : memref<64x64xbf16, #tpu.memory_space<vmem>>, vector<4x8xbf16>,
    %c0_87 = arith.constant 0 : index
    %c0_88 = arith.constant 0 : index
    %c1_89 = arith.constant 1 : index
    %c1_90 = arith.constant 1 : index
    %51 = vector.load %arg1[%c0_87, %c0_88, %c1_89, %c1_90] : memref<1x16x9x9xbf16, #tpu.memory_space<vmem>>, vector<1x4x1x8xbf16>
    %52 = vector.shape_cast %51 : vector<1x4x1x8xbf16> to vector<4x8xbf16>
    %c8_91 = arith.constant 8 : index
    %c8_92 = arith.constant 8 : index
    %53 = vector.load %arg6[%c8_91, %c8_92] : memref<64x64xbf16, #tpu.memory_space<vmem>>, vector<4x8xbf16>
    tpu.vector_store %arg6[%c8_91, %c8_92], %52 {strides = array<i32>} : memref<64x64xbf16, #tpu.memory_space<vmem>>, vector<4x8xbf16>,
    %c0_93 = arith.constant 0 : index
    %c0_94 = arith.constant 0 : index
    %c2_95 = arith.constant 2 : index
    %c1_96 = arith.constant 1 : index
    %54 = vector.load %arg1[%c0_93, %c0_94, %c2_95, %c1_96] : memref<1x16x9x9xbf16, #tpu.memory_space<vmem>>, vector<1x4x1x8xbf16>
    %55 = vector.shape_cast %54 : vector<1x4x1x8xbf16> to vector<4x8xbf16>
    %c8_97 = arith.constant 8 : index
    %c16_98 = arith.constant 16 : index
    %56 = vector.load %arg6[%c8_97, %c16_98] : memref<64x64xbf16, #tpu.memory_space<vmem>>, vector<4x8xbf16>
    tpu.vector_store %arg6[%c8_97, %c16_98], %55 {strides = array<i32>} : memref<64x64xbf16, #tpu.memory_space<vmem>>, vector<4x8xbf16>,
    %c0_99 = arith.constant 0 : index
    %c0_100 = arith.constant 0 : index
    %c3_101 = arith.constant 3 : index
    %c1_102 = arith.constant 1 : index
    %57 = vector.load %arg1[%c0_99, %c0_100, %c3_101, %c1_102] : memref<1x16x9x9xbf16, #tpu.memory_space<vmem>>, vector<1x4x1x8xbf16>
    %58 = vector.shape_cast %57 : vector<1x4x1x8xbf16> to vector<4x8xbf16>
    %c8_103 = arith.constant 8 : index
    %c24_104 = arith.constant 24 : index
    %59 = vector.load %arg6[%c8_103, %c24_104] : memref<64x64xbf16, #tpu.memory_space<vmem>>, vector<4x8xbf16>
    tpu.vector_store %arg6[%c8_103, %c24_104], %58 {strides = array<i32>} : memref<64x64xbf16, #tpu.memory_space<vmem>>, vector<4x8xbf16>,
    %c0_105 = arith.constant 0 : index
    %c0_106 = arith.constant 0 : index
    %c4_107 = arith.constant 4 : index
    %c1_108 = arith.constant 1 : index
    %60 = vector.load %arg1[%c0_105, %c0_106, %c4_107, %c1_108] : memref<1x16x9x9xbf16, #tpu.memory_space<vmem>>, vector<1x4x1x8xbf16>
    %61 = vector.shape_cast %60 : vector<1x4x1x8xbf16> to vector<4x8xbf16>
    %c8_109 = arith.constant 8 : index
    %c32_110 = arith.constant 32 : index
    %62 = vector.load %arg6[%c8_109, %c32_110] : memref<64x64xbf16, #tpu.memory_space<vmem>>, vector<4x8xbf16>
    tpu.vector_store %arg6[%c8_109, %c32_110], %61 {strides = array<i32>} : memref<64x64xbf16, #tpu.memory_space<vmem>>, vector<4x8xbf16>,
    %c0_111 = arith.constant 0 : index
    %c0_112 = arith.constant 0 : index
    %c5_113 = arith.constant 5 : index
    %c1_114 = arith.constant 1 : index
    %63 = vector.load %arg1[%c0_111, %c0_112, %c5_113, %c1_114] : memref<1x16x9x9xbf16, #tpu.memory_space<vmem>>, vector<1x4x1x8xbf16>
    %64 = vector.shape_cast %63 : vector<1x4x1x8xbf16> to vector<4x8xbf16>
    %c8_115 = arith.constant 8 : index
    %c40_116 = arith.constant 40 : index
    %65 = vector.load %arg6[%c8_115, %c40_116] : memref<64x64xbf16, #tpu.memory_space<vmem>>, vector<4x8xbf16>
    tpu.vector_store %arg6[%c8_115, %c40_116], %64 {strides = array<i32>} : memref<64x64xbf16, #tpu.memory_space<vmem>>, vector<4x8xbf16>,
    %c0_117 = arith.constant 0 : index
    %c0_118 = arith.constant 0 : index
    %c6_119 = arith.constant 6 : index
    %c1_120 = arith.constant 1 : index
    %66 = vector.load %arg1[%c0_117, %c0_118, %c6_119, %c1_120] : memref<1x16x9x9xbf16, #tpu.memory_space<vmem>>, vector<1x4x1x8xbf16>
    %67 = vector.shape_cast %66 : vector<1x4x1x8xbf16> to vector<4x8xbf16>
    %c8_121 = arith.constant 8 : index
    %c48_122 = arith.constant 48 : index
    %68 = vector.load %arg6[%c8_121, %c48_122] : memref<64x64xbf16, #tpu.memory_space<vmem>>, vector<4x8xbf16>
    tpu.vector_store %arg6[%c8_121, %c48_122], %67 {strides = array<i32>} : memref<64x64xbf16, #tpu.memory_space<vmem>>, vector<4x8xbf16>,
    %c0_123 = arith.constant 0 : index
    %c0_124 = arith.constant 0 : index
    %c7_125 = arith.constant 7 : index
    %c1_126 = arith.constant 1 : index
    %69 = vector.load %arg1[%c0_123, %c0_124, %c7_125, %c1_126] : memref<1x16x9x9xbf16, #tpu.memory_space<vmem>>, vector<1x4x1x8xbf16>
    %70 = vector.shape_cast %69 : vector<1x4x1x8xbf16> to vector<4x8xbf16>
    %c8_127 = arith.constant 8 : index
    %c56_128 = arith.constant 56 : index
    %71 = vector.load %arg6[%c8_127, %c56_128] : memref<64x64xbf16, #tpu.memory_space<vmem>>, vector<4x8xbf16>
    tpu.vector_store %arg6[%c8_127, %c56_128], %70 {strides = array<i32>} : memref<64x64xbf16, #tpu.memory_space<vmem>>, vector<4x8xbf16>,
    %c0_129 = arith.constant 0 : index
    %c4_130 = arith.constant 4 : index
    %c0_131 = arith.constant 0 : index
    %c1_132 = arith.constant 1 : index
    %72 = vector.load %arg1[%c0_129, %c4_130, %c0_131, %c1_132] : memref<1x16x9x9xbf16, #tpu.memory_space<vmem>>, vector<1x4x1x8xbf16>
    %73 = vector.shape_cast %72 : vector<1x4x1x8xbf16> to vector<4x8xbf16>
    %c12 = arith.constant 12 : index
    %c0_133 = arith.constant 0 : index
    %74 = vector.load %arg6[%c12, %c0_133] : memref<64x64xbf16, #tpu.memory_space<vmem>>, vector<4x8xbf16>
    tpu.vector_store %arg6[%c12, %c0_133], %73 {strides = array<i32>} : memref<64x64xbf16, #tpu.memory_space<vmem>>, vector<4x8xbf16>,
    %c0_134 = arith.constant 0 : index
    %c4_135 = arith.constant 4 : index
    %c1_136 = arith.constant 1 : index
    %c1_137 = arith.constant 1 : index
    %75 = vector.load %arg1[%c0_134, %c4_135, %c1_136, %c1_137] : memref<1x16x9x9xbf16, #tpu.memory_space<vmem>>, vector<1x4x1x8xbf16>
    %76 = vector.shape_cast %75 : vector<1x4x1x8xbf16> to vector<4x8xbf16>
    %c12_138 = arith.constant 12 : index
    %c8_139 = arith.constant 8 : index
    %77 = vector.load %arg6[%c12_138, %c8_139] : memref<64x64xbf16, #tpu.memory_space<vmem>>, vector<4x8xbf16>
    tpu.vector_store %arg6[%c12_138, %c8_139], %76 {strides = array<i32>} : memref<64x64xbf16, #tpu.memory_space<vmem>>, vector<4x8xbf16>,
    %c0_140 = arith.constant 0 : index
    %c4_141 = arith.constant 4 : index
    %c2_142 = arith.constant 2 : index
    %c1_143 = arith.constant 1 : index
    %78 = vector.load %arg1[%c0_140, %c4_141, %c2_142, %c1_143] : memref<1x16x9x9xbf16, #tpu.memory_space<vmem>>, vector<1x4x1x8xbf16>
    %79 = vector.shape_cast %78 : vector<1x4x1x8xbf16> to vector<4x8xbf16>
    %c12_144 = arith.constant 12 : index
    %c16_145 = arith.constant 16 : index
    %80 = vector.load %arg6[%c12_144, %c16_145] : memref<64x64xbf16, #tpu.memory_space<vmem>>, vector<4x8xbf16>
    tpu.vector_store %arg6[%c12_144, %c16_145], %79 {strides = array<i32>} : memref<64x64xbf16, #tpu.memory_space<vmem>>, vector<4x8xbf16>,
    %c0_146 = arith.constant 0 : index
    %c4_147 = arith.constant 4 : index
    %c3_148 = arith.constant 3 : index
    %c1_149 = arith.constant 1 : index
    %81 = vector.load %arg1[%c0_146, %c4_147, %c3_148, %c1_149] : memref<1x16x9x9xbf16, #tpu.memory_space<vmem>>, vector<1x4x1x8xbf16>
    %82 = vector.shape_cast %81 : vector<1x4x1x8xbf16> to vector<4x8xbf16>
    %c12_150 = arith.constant 12 : index
    %c24_151 = arith.constant 24 : index
    %83 = vector.load %arg6[%c12_150, %c24_151] : memref<64x64xbf16, #tpu.memory_space<vmem>>, vector<4x8xbf16>
    tpu.vector_store %arg6[%c12_150, %c24_151], %82 {strides = array<i32>} : memref<64x64xbf16, #tpu.memory_space<vmem>>, vector<4x8xbf16>,
    %c0_152 = arith.constant 0 : index
    %c4_153 = arith.constant 4 : index
    %c4_154 = arith.constant 4 : index
    %c1_155 = arith.constant 1 : index
    %84 = vector.load %arg1[%c0_152, %c4_153, %c4_154, %c1_155] : memref<1x16x9x9xbf16, #tpu.memory_space<vmem>>, vector<1x4x1x8xbf16>
    %85 = vector.shape_cast %84 : vector<1x4x1x8xbf16> to vector<4x8xbf16>
    %c12_156 = arith.constant 12 : index
    %c32_157 = arith.constant 32 : index
    %86 = vector.load %arg6[%c12_156, %c32_157] : memref<64x64xbf16, #tpu.memory_space<vmem>>, vector<4x8xbf16>
    tpu.vector_store %arg6[%c12_156, %c32_157], %85 {strides = array<i32>} : memref<64x64xbf16, #tpu.memory_space<vmem>>, vector<4x8xbf16>,
    %c0_158 = arith.constant 0 : index
    %c4_159 = arith.constant 4 : index
    %c5_160 = arith.constant 5 : index
    %c1_161 = arith.constant 1 : index
    %87 = vector.load %arg1[%c0_158, %c4_159, %c5_160, %c1_161] : memref<1x16x9x9xbf16, #tpu.memory_space<vmem>>, vector<1x4x1x8xbf16>
    %88 = vector.shape_cast %87 : vector<1x4x1x8xbf16> to vector<4x8xbf16>
    %c12_162 = arith.constant 12 : index
    %c40_163 = arith.constant 40 : index
    %89 = vector.load %arg6[%c12_162, %c40_163] : memref<64x64xbf16, #tpu.memory_space<vmem>>, vector<4x8xbf16>
    tpu.vector_store %arg6[%c12_162, %c40_163], %88 {strides = array<i32>} : memref<64x64xbf16, #tpu.memory_space<vmem>>, vector<4x8xbf16>,
    %c0_164 = arith.constant 0 : index
    %c4_165 = arith.constant 4 : index
    %c6_166 = arith.constant 6 : index
    %c1_167 = arith.constant 1 : index
    %90 = vector.load %arg1[%c0_164, %c4_165, %c6_166, %c1_167] : memref<1x16x9x9xbf16, #tpu.memory_space<vmem>>, vector<1x4x1x8xbf16>
    %91 = vector.shape_cast %90 : vector<1x4x1x8xbf16> to vector<4x8xbf16>
    %c12_168 = arith.constant 12 : index
    %c48_169 = arith.constant 48 : index
    %92 = vector.load %arg6[%c12_168, %c48_169] : memref<64x64xbf16, #tpu.memory_space<vmem>>, vector<4x8xbf16>
    tpu.vector_store %arg6[%c12_168, %c48_169], %91 {strides = array<i32>} : memref<64x64xbf16, #tpu.memory_space<vmem>>, vector<4x8xbf16>,
    %c0_170 = arith.constant 0 : index
    %c4_171 = arith.constant 4 : index
    %c7_172 = arith.constant 7 : index
    %c1_173 = arith.constant 1 : index
    %93 = vector.load %arg1[%c0_170, %c4_171, %c7_172, %c1_173] : memref<1x16x9x9xbf16, #tpu.memory_space<vmem>>, vector<1x4x1x8xbf16>
    %94 = vector.shape_cast %93 : vector<1x4x1x8xbf16> to vector<4x8xbf16>
    %c12_174 = arith.constant 12 : index
    %c56_175 = arith.constant 56 : index
    %95 = vector.load %arg6[%c12_174, %c56_175] : memref<64x64xbf16, #tpu.memory_space<vmem>>, vector<4x8xbf16>
    tpu.vector_store %arg6[%c12_174, %c56_175], %94 {strides = array<i32>} : memref<64x64xbf16, #tpu.memory_space<vmem>>, vector<4x8xbf16>,
    %c0_176 = arith.constant 0 : index
    %c8_177 = arith.constant 8 : index
    %c0_178 = arith.constant 0 : index
    %c0_179 = arith.constant 0 : index
    %96 = vector.load %arg1[%c0_176, %c8_177, %c0_178, %c0_179] : memref<1x16x9x9xbf16, #tpu.memory_space<vmem>>, vector<1x4x1x8xbf16>
    %97 = vector.shape_cast %96 : vector<1x4x1x8xbf16> to vector<4x8xbf16>
    %c16_180 = arith.constant 16 : index
    %c0_181 = arith.constant 0 : index
    %98 = vector.load %arg6[%c16_180, %c0_181] : memref<64x64xbf16, #tpu.memory_space<vmem>>, vector<4x8xbf16>
    tpu.vector_store %arg6[%c16_180, %c0_181], %97 {strides = array<i32>} : memref<64x64xbf16, #tpu.memory_space<vmem>>, vector<4x8xbf16>,
    %c0_182 = arith.constant 0 : index
    %c8_183 = arith.constant 8 : index
    %c1_184 = arith.constant 1 : index
    %c0_185 = arith.constant 0 : index
    %99 = vector.load %arg1[%c0_182, %c8_183, %c1_184, %c0_185] : memref<1x16x9x9xbf16, #tpu.memory_space<vmem>>, vector<1x4x1x8xbf16>
    %100 = vector.shape_cast %99 : vector<1x4x1x8xbf16> to vector<4x8xbf16>
    %c16_186 = arith.constant 16 : index
    %c8_187 = arith.constant 8 : index
    %101 = vector.load %arg6[%c16_186, %c8_187] : memref<64x64xbf16, #tpu.memory_space<vmem>>, vector<4x8xbf16>
    tpu.vector_store %arg6[%c16_186, %c8_187], %100 {strides = array<i32>} : memref<64x64xbf16, #tpu.memory_space<vmem>>, vector<4x8xbf16>,
    %c0_188 = arith.constant 0 : index
    %c8_189 = arith.constant 8 : index
    %c2_190 = arith.constant 2 : index
    %c0_191 = arith.constant 0 : index
    %102 = vector.load %arg1[%c0_188, %c8_189, %c2_190, %c0_191] : memref<1x16x9x9xbf16, #tpu.memory_space<vmem>>, vector<1x4x1x8xbf16>
    %103 = vector.shape_cast %102 : vector<1x4x1x8xbf16> to vector<4x8xbf16>
    %c16_192 = arith.constant 16 : index
    %c16_193 = arith.constant 16 : index
    %104 = vector.load %arg6[%c16_192, %c16_193] : memref<64x64xbf16, #tpu.memory_space<vmem>>, vector<4x8xbf16>
    tpu.vector_store %arg6[%c16_192, %c16_193], %103 {strides = array<i32>} : memref<64x64xbf16, #tpu.memory_space<vmem>>, vector<4x8xbf16>,
    %c0_194 = arith.constant 0 : index
    %c8_195 = arith.constant 8 : index
    %c3_196 = arith.constant 3 : index
    %c0_197 = arith.constant 0 : index
    %105 = vector.load %arg1[%c0_194, %c8_195, %c3_196, %c0_197] : memref<1x16x9x9xbf16, #tpu.memory_space<vmem>>, vector<1x4x1x8xbf16>
    %106 = vector.shape_cast %105 : vector<1x4x1x8xbf16> to vector<4x8xbf16>
    %c16_198 = arith.constant 16 : index
    %c24_199 = arith.constant 24 : index
    %107 = vector.load %arg6[%c16_198, %c24_199] : memref<64x64xbf16, #tpu.memory_space<vmem>>, vector<4x8xbf16>
    tpu.vector_store %arg6[%c16_198, %c24_199], %106 {strides = array<i32>} : memref<64x64xbf16, #tpu.memory_space<vmem>>, vector<4x8xbf16>,
    %c0_200 = arith.constant 0 : index
    %c8_201 = arith.constant 8 : index
    %c4_202 = arith.constant 4 : index
    %c0_203 = arith.constant 0 : index
    %108 = vector.load %arg1[%c0_200, %c8_201, %c4_202, %c0_203] : memref<1x16x9x9xbf16, #tpu.memory_space<vmem>>, vector<1x4x1x8xbf16>
    %109 = vector.shape_cast %108 : vector<1x4x1x8xbf16> to vector<4x8xbf16>
    %c16_204 = arith.constant 16 : index
    %c32_205 = arith.constant 32 : index
    %110 = vector.load %arg6[%c16_204, %c32_205] : memref<64x64xbf16, #tpu.memory_space<vmem>>, vector<4x8xbf16>
    tpu.vector_store %arg6[%c16_204, %c32_205], %109 {strides = array<i32>} : memref<64x64xbf16, #tpu.memory_space<vmem>>, vector<4x8xbf16>,
    %c0_206 = arith.constant 0 : index
    %c8_207 = arith.constant 8 : index
    %c5_208 = arith.constant 5 : index
    %c0_209 = arith.constant 0 : index
    %111 = vector.load %arg1[%c0_206, %c8_207, %c5_208, %c0_209] : memref<1x16x9x9xbf16, #tpu.memory_space<vmem>>, vector<1x4x1x8xbf16>
    %112 = vector.shape_cast %111 : vector<1x4x1x8xbf16> to vector<4x8xbf16>
    %c16_210 = arith.constant 16 : index
    %c40_211 = arith.constant 40 : index
    %113 = vector.load %arg6[%c16_210, %c40_211] : memref<64x64xbf16, #tpu.memory_space<vmem>>, vector<4x8xbf16>
    tpu.vector_store %arg6[%c16_210, %c40_211], %112 {strides = array<i32>} : memref<64x64xbf16, #tpu.memory_space<vmem>>, vector<4x8xbf16>,
    %c0_212 = arith.constant 0 : index
    %c8_213 = arith.constant 8 : index
    %c6_214 = arith.constant 6 : index
    %c0_215 = arith.constant 0 : index
    %114 = vector.load %arg1[%c0_212, %c8_213, %c6_214, %c0_215] : memref<1x16x9x9xbf16, #tpu.memory_space<vmem>>, vector<1x4x1x8xbf16>
    %115 = vector.shape_cast %114 : vector<1x4x1x8xbf16> to vector<4x8xbf16>
    %c16_216 = arith.constant 16 : index
    %c48_217 = arith.constant 48 : index
    %116 = vector.load %arg6[%c16_216, %c48_217] : memref<64x64xbf16, #tpu.memory_space<vmem>>, vector<4x8xbf16>
    tpu.vector_store %arg6[%c16_216, %c48_217], %115 {strides = array<i32>} : memref<64x64xbf16, #tpu.memory_space<vmem>>, vector<4x8xbf16>,
    %c0_218 = arith.constant 0 : index
    %c8_219 = arith.constant 8 : index
    %c7_220 = arith.constant 7 : index
    %c0_221 = arith.constant 0 : index
    %117 = vector.load %arg1[%c0_218, %c8_219, %c7_220, %c0_221] : memref<1x16x9x9xbf16, #tpu.memory_space<vmem>>, vector<1x4x1x8xbf16>
    %118 = vector.shape_cast %117 : vector<1x4x1x8xbf16> to vector<4x8xbf16>
    %c16_222 = arith.constant 16 : index
    %c56_223 = arith.constant 56 : index
    %119 = vector.load %arg6[%c16_222, %c56_223] : memref<64x64xbf16, #tpu.memory_space<vmem>>, vector<4x8xbf16>
    tpu.vector_store %arg6[%c16_222, %c56_223], %118 {strides = array<i32>} : memref<64x64xbf16, #tpu.memory_space<vmem>>, vector<4x8xbf16>,
    %c0_224 = arith.constant 0 : index
    %c12_225 = arith.constant 12 : index
    %c0_226 = arith.constant 0 : index
    %c0_227 = arith.constant 0 : index
    %120 = vector.load %arg1[%c0_224, %c12_225, %c0_226, %c0_227] : memref<1x16x9x9xbf16, #tpu.memory_space<vmem>>, vector<1x4x1x8xbf16>
    %121 = vector.shape_cast %120 : vector<1x4x1x8xbf16> to vector<4x8xbf16>
    %c20 = arith.constant 20 : index
    %c0_228 = arith.constant 0 : index
    %122 = vector.load %arg6[%c20, %c0_228] : memref<64x64xbf16, #tpu.memory_space<vmem>>, vector<4x8xbf16>
    tpu.vector_store %arg6[%c20, %c0_228], %121 {strides = array<i32>} : memref<64x64xbf16, #tpu.memory_space<vmem>>, vector<4x8xbf16>,
    %c0_229 = arith.constant 0 : index
    %c12_230 = arith.constant 12 : index
    %c1_231 = arith.constant 1 : index
    %c0_232 = arith.constant 0 : index
    %123 = vector.load %arg1[%c0_229, %c12_230, %c1_231, %c0_232] : memref<1x16x9x9xbf16, #tpu.memory_space<vmem>>, vector<1x4x1x8xbf16>
    %124 = vector.shape_cast %123 : vector<1x4x1x8xbf16> to vector<4x8xbf16>
    %c20_233 = arith.constant 20 : index
    %c8_234 = arith.constant 8 : index
    %125 = vector.load %arg6[%c20_233, %c8_234] : memref<64x64xbf16, #tpu.memory_space<vmem>>, vector<4x8xbf16>
    tpu.vector_store %arg6[%c20_233, %c8_234], %124 {strides = array<i32>} : memref<64x64xbf16, #tpu.memory_space<vmem>>, vector<4x8xbf16>,
    %c0_235 = arith.constant 0 : index
    %c12_236 = arith.constant 12 : index
    %c2_237 = arith.constant 2 : index
    %c0_238 = arith.constant 0 : index
    %126 = vector.load %arg1[%c0_235, %c12_236, %c2_237, %c0_238] : memref<1x16x9x9xbf16, #tpu.memory_space<vmem>>, vector<1x4x1x8xbf16>
    %127 = vector.shape_cast %126 : vector<1x4x1x8xbf16> to vector<4x8xbf16>
    %c20_239 = arith.constant 20 : index
    %c16_240 = arith.constant 16 : index
    %128 = vector.load %arg6[%c20_239, %c16_240] : memref<64x64xbf16, #tpu.memory_space<vmem>>, vector<4x8xbf16>
    tpu.vector_store %arg6[%c20_239, %c16_240], %127 {strides = array<i32>} : memref<64x64xbf16, #tpu.memory_space<vmem>>, vector<4x8xbf16>,
    %c0_241 = arith.constant 0 : index
    %c12_242 = arith.constant 12 : index
    %c3_243 = arith.constant 3 : index
    %c0_244 = arith.constant 0 : index
    %129 = vector.load %arg1[%c0_241, %c12_242, %c3_243, %c0_244] : memref<1x16x9x9xbf16, #tpu.memory_space<vmem>>, vector<1x4x1x8xbf16>
    %130 = vector.shape_cast %129 : vector<1x4x1x8xbf16> to vector<4x8xbf16>
    %c20_245 = arith.constant 20 : index
    %c24_246 = arith.constant 24 : index
    %131 = vector.load %arg6[%c20_245, %c24_246] : memref<64x64xbf16, #tpu.memory_space<vmem>>, vector<4x8xbf16>
    tpu.vector_store %arg6[%c20_245, %c24_246], %130 {strides = array<i32>} : memref<64x64xbf16, #tpu.memory_space<vmem>>, vector<4x8xbf16>,
    %c0_247 = arith.constant 0 : index
    %c12_248 = arith.constant 12 : index
    %c4_249 = arith.constant 4 : index
    %c0_250 = arith.constant 0 : index
    %132 = vector.load %arg1[%c0_247, %c12_248, %c4_249, %c0_250] : memref<1x16x9x9xbf16, #tpu.memory_space<vmem>>, vector<1x4x1x8xbf16>
    %133 = vector.shape_cast %132 : vector<1x4x1x8xbf16> to vector<4x8xbf16>
    %c20_251 = arith.constant 20 : index
    %c32_252 = arith.constant 32 : index
    %134 = vector.load %arg6[%c20_251, %c32_252] : memref<64x64xbf16, #tpu.memory_space<vmem>>, vector<4x8xbf16>
    tpu.vector_store %arg6[%c20_251, %c32_252], %133 {strides = array<i32>} : memref<64x64xbf16, #tpu.memory_space<vmem>>, vector<4x8xbf16>,
    %c0_253 = arith.constant 0 : index
    %c12_254 = arith.constant 12 : index
    %c5_255 = arith.constant 5 : index
    %c0_256 = arith.constant 0 : index
    %135 = vector.load %arg1[%c0_253, %c12_254, %c5_255, %c0_256] : memref<1x16x9x9xbf16, #tpu.memory_space<vmem>>, vector<1x4x1x8xbf16>
    %136 = vector.shape_cast %135 : vector<1x4x1x8xbf16> to vector<4x8xbf16>
    %c20_257 = arith.constant 20 : index
    %c40_258 = arith.constant 40 : index
    %137 = vector.load %arg6[%c20_257, %c40_258] : memref<64x64xbf16, #tpu.memory_space<vmem>>, vector<4x8xbf16>
    tpu.vector_store %arg6[%c20_257, %c40_258], %136 {strides = array<i32>} : memref<64x64xbf16, #tpu.memory_space<vmem>>, vector<4x8xbf16>,
    %c0_259 = arith.constant 0 : index
    %c12_260 = arith.constant 12 : index
    %c6_261 = arith.constant 6 : index
    %c0_262 = arith.constant 0 : index
    %138 = vector.load %arg1[%c0_259, %c12_260, %c6_261, %c0_262] : memref<1x16x9x9xbf16, #tpu.memory_space<vmem>>, vector<1x4x1x8xbf16>
    %139 = vector.shape_cast %138 : vector<1x4x1x8xbf16> to vector<4x8xbf16>
    %c20_263 = arith.constant 20 : index
    %c48_264 = arith.constant 48 : index
    %140 = vector.load %arg6[%c20_263, %c48_264] : memref<64x64xbf16, #tpu.memory_space<vmem>>, vector<4x8xbf16>
    tpu.vector_store %arg6[%c20_263, %c48_264], %139 {strides = array<i32>} : memref<64x64xbf16, #tpu.memory_space<vmem>>, vector<4x8xbf16>,
    %c0_265 = arith.constant 0 : index
    %c12_266 = arith.constant 12 : index
    %c7_267 = arith.constant 7 : index
    %c0_268 = arith.constant 0 : index
    %141 = vector.load %arg1[%c0_265, %c12_266, %c7_267, %c0_268] : memref<1x16x9x9xbf16, #tpu.memory_space<vmem>>, vector<1x4x1x8xbf16>
    %142 = vector.shape_cast %141 : vector<1x4x1x8xbf16> to vector<4x8xbf16>
    %c20_269 = arith.constant 20 : index
    %c56_270 = arith.constant 56 : index
    %143 = vector.load %arg6[%c20_269, %c56_270] : memref<64x64xbf16, #tpu.memory_space<vmem>>, vector<4x8xbf16>
    tpu.vector_store %arg6[%c20_269, %c56_270], %142 {strides = array<i32>} : memref<64x64xbf16, #tpu.memory_space<vmem>>, vector<4x8xbf16>,
    %c0_271 = arith.constant 0 : index
    %c8_272 = arith.constant 8 : index
    %c0_273 = arith.constant 0 : index
    %c1_274 = arith.constant 1 : index
    %144 = vector.load %arg1[%c0_271, %c8_272, %c0_273, %c1_274] : memref<1x16x9x9xbf16, #tpu.memory_space<vmem>>, vector<1x4x1x8xbf16>
    %145 = vector.shape_cast %144 : vector<1x4x1x8xbf16> to vector<4x8xbf16>
    %c24_275 = arith.constant 24 : index
    %c0_276 = arith.constant 0 : index
    %146 = vector.load %arg6[%c24_275, %c0_276] : memref<64x64xbf16, #tpu.memory_space<vmem>>, vector<4x8xbf16>
    tpu.vector_store %arg6[%c24_275, %c0_276], %145 {strides = array<i32>} : memref<64x64xbf16, #tpu.memory_space<vmem>>, vector<4x8xbf16>,
    %c0_277 = arith.constant 0 : index
    %c8_278 = arith.constant 8 : index
    %c1_279 = arith.constant 1 : index
    %c1_280 = arith.constant 1 : index
    %147 = vector.load %arg1[%c0_277, %c8_278, %c1_279, %c1_280] : memref<1x16x9x9xbf16, #tpu.memory_space<vmem>>, vector<1x4x1x8xbf16>
    %148 = vector.shape_cast %147 : vector<1x4x1x8xbf16> to vector<4x8xbf16>
    %c24_281 = arith.constant 24 : index
    %c8_282 = arith.constant 8 : index
    %149 = vector.load %arg6[%c24_281, %c8_282] : memref<64x64xbf16, #tpu.memory_space<vmem>>, vector<4x8xbf16>
    tpu.vector_store %arg6[%c24_281, %c8_282], %148 {strides = array<i32>} : memref<64x64xbf16, #tpu.memory_space<vmem>>, vector<4x8xbf16>,
    %c0_283 = arith.constant 0 : index
    %c8_284 = arith.constant 8 : index
    %c2_285 = arith.constant 2 : index
    %c1_286 = arith.constant 1 : index
    %150 = vector.load %arg1[%c0_283, %c8_284, %c2_285, %c1_286] : memref<1x16x9x9xbf16, #tpu.memory_space<vmem>>, vector<1x4x1x8xbf16>
    %151 = vector.shape_cast %150 : vector<1x4x1x8xbf16> to vector<4x8xbf16>
    %c24_287 = arith.constant 24 : index
    %c16_288 = arith.constant 16 : index
    %152 = vector.load %arg6[%c24_287, %c16_288] : memref<64x64xbf16, #tpu.memory_space<vmem>>, vector<4x8xbf16>
    tpu.vector_store %arg6[%c24_287, %c16_288], %151 {strides = array<i32>} : memref<64x64xbf16, #tpu.memory_space<vmem>>, vector<4x8xbf16>,
    %c0_289 = arith.constant 0 : index
    %c8_290 = arith.constant 8 : index
    %c3_291 = arith.constant 3 : index
    %c1_292 = arith.constant 1 : index
    %153 = vector.load %arg1[%c0_289, %c8_290, %c3_291, %c1_292] : memref<1x16x9x9xbf16, #tpu.memory_space<vmem>>, vector<1x4x1x8xbf16>
    %154 = vector.shape_cast %153 : vector<1x4x1x8xbf16> to vector<4x8xbf16>
    %c24_293 = arith.constant 24 : index
    %c24_294 = arith.constant 24 : index
    %155 = vector.load %arg6[%c24_293, %c24_294] : memref<64x64xbf16, #tpu.memory_space<vmem>>, vector<4x8xbf16>
    tpu.vector_store %arg6[%c24_293, %c24_294], %154 {strides = array<i32>} : memref<64x64xbf16, #tpu.memory_space<vmem>>, vector<4x8xbf16>,
    %c0_295 = arith.constant 0 : index
    %c8_296 = arith.constant 8 : index
    %c4_297 = arith.constant 4 : index
    %c1_298 = arith.constant 1 : index
    %156 = vector.load %arg1[%c0_295, %c8_296, %c4_297, %c1_298] : memref<1x16x9x9xbf16, #tpu.memory_space<vmem>>, vector<1x4x1x8xbf16>
    %157 = vector.shape_cast %156 : vector<1x4x1x8xbf16> to vector<4x8xbf16>
    %c24_299 = arith.constant 24 : index
    %c32_300 = arith.constant 32 : index
    %158 = vector.load %arg6[%c24_299, %c32_300] : memref<64x64xbf16, #tpu.memory_space<vmem>>, vector<4x8xbf16>
    tpu.vector_store %arg6[%c24_299, %c32_300], %157 {strides = array<i32>} : memref<64x64xbf16, #tpu.memory_space<vmem>>, vector<4x8xbf16>,
    %c0_301 = arith.constant 0 : index
    %c8_302 = arith.constant 8 : index
    %c5_303 = arith.constant 5 : index
    %c1_304 = arith.constant 1 : index
    %159 = vector.load %arg1[%c0_301, %c8_302, %c5_303, %c1_304] : memref<1x16x9x9xbf16, #tpu.memory_space<vmem>>, vector<1x4x1x8xbf16>
    %160 = vector.shape_cast %159 : vector<1x4x1x8xbf16> to vector<4x8xbf16>
    %c24_305 = arith.constant 24 : index
    %c40_306 = arith.constant 40 : index
    %161 = vector.load %arg6[%c24_305, %c40_306] : memref<64x64xbf16, #tpu.memory_space<vmem>>, vector<4x8xbf16>
    tpu.vector_store %arg6[%c24_305, %c40_306], %160 {strides = array<i32>} : memref<64x64xbf16, #tpu.memory_space<vmem>>, vector<4x8xbf16>,
    %c0_307 = arith.constant 0 : index
    %c8_308 = arith.constant 8 : index
    %c6_309 = arith.constant 6 : index
    %c1_310 = arith.constant 1 : index
    %162 = vector.load %arg1[%c0_307, %c8_308, %c6_309, %c1_310] : memref<1x16x9x9xbf16, #tpu.memory_space<vmem>>, vector<1x4x1x8xbf16>
    %163 = vector.shape_cast %162 : vector<1x4x1x8xbf16> to vector<4x8xbf16>
    %c24_311 = arith.constant 24 : index
    %c48_312 = arith.constant 48 : index
    %164 = vector.load %arg6[%c24_311, %c48_312] : memref<64x64xbf16, #tpu.memory_space<vmem>>, vector<4x8xbf16>
    tpu.vector_store %arg6[%c24_311, %c48_312], %163 {strides = array<i32>} : memref<64x64xbf16, #tpu.memory_space<vmem>>, vector<4x8xbf16>,
    %c0_313 = arith.constant 0 : index
    %c8_314 = arith.constant 8 : index
    %c7_315 = arith.constant 7 : index
    %c1_316 = arith.constant 1 : index
    %165 = vector.load %arg1[%c0_313, %c8_314, %c7_315, %c1_316] : memref<1x16x9x9xbf16, #tpu.memory_space<vmem>>, vector<1x4x1x8xbf16>
    %166 = vector.shape_cast %165 : vector<1x4x1x8xbf16> to vector<4x8xbf16>
    %c24_317 = arith.constant 24 : index
    %c56_318 = arith.constant 56 : index
    %167 = vector.load %arg6[%c24_317, %c56_318] : memref<64x64xbf16, #tpu.memory_space<vmem>>, vector<4x8xbf16>
    tpu.vector_store %arg6[%c24_317, %c56_318], %166 {strides = array<i32>} : memref<64x64xbf16, #tpu.memory_space<vmem>>, vector<4x8xbf16>,
    %c0_319 = arith.constant 0 : index
    %c12_320 = arith.constant 12 : index
    %c0_321 = arith.constant 0 : index
    %c1_322 = arith.constant 1 : index
    %168 = vector.load %arg1[%c0_319, %c12_320, %c0_321, %c1_322] : memref<1x16x9x9xbf16, #tpu.memory_space<vmem>>, vector<1x4x1x8xbf16>
    %169 = vector.shape_cast %168 : vector<1x4x1x8xbf16> to vector<4x8xbf16>
    %c28 = arith.constant 28 : index
    %c0_323 = arith.constant 0 : index
    %170 = vector.load %arg6[%c28, %c0_323] : memref<64x64xbf16, #tpu.memory_space<vmem>>, vector<4x8xbf16>
    tpu.vector_store %arg6[%c28, %c0_323], %169 {strides = array<i32>} : memref<64x64xbf16, #tpu.memory_space<vmem>>, vector<4x8xbf16>,
    %c0_324 = arith.constant 0 : index
    %c12_325 = arith.constant 12 : index
    %c1_326 = arith.constant 1 : index
    %c1_327 = arith.constant 1 : index
    %171 = vector.load %arg1[%c0_324, %c12_325, %c1_326, %c1_327] : memref<1x16x9x9xbf16, #tpu.memory_space<vmem>>, vector<1x4x1x8xbf16>
    %172 = vector.shape_cast %171 : vector<1x4x1x8xbf16> to vector<4x8xbf16>
    %c28_328 = arith.constant 28 : index
    %c8_329 = arith.constant 8 : index
    %173 = vector.load %arg6[%c28_328, %c8_329] : memref<64x64xbf16, #tpu.memory_space<vmem>>, vector<4x8xbf16>
    tpu.vector_store %arg6[%c28_328, %c8_329], %172 {strides = array<i32>} : memref<64x64xbf16, #tpu.memory_space<vmem>>, vector<4x8xbf16>,
    %c0_330 = arith.constant 0 : index
    %c12_331 = arith.constant 12 : index
    %c2_332 = arith.constant 2 : index
    %c1_333 = arith.constant 1 : index
    %174 = vector.load %arg1[%c0_330, %c12_331, %c2_332, %c1_333] : memref<1x16x9x9xbf16, #tpu.memory_space<vmem>>, vector<1x4x1x8xbf16>
    %175 = vector.shape_cast %174 : vector<1x4x1x8xbf16> to vector<4x8xbf16>
    %c28_334 = arith.constant 28 : index
    %c16_335 = arith.constant 16 : index
    %176 = vector.load %arg6[%c28_334, %c16_335] : memref<64x64xbf16, #tpu.memory_space<vmem>>, vector<4x8xbf16>
    tpu.vector_store %arg6[%c28_334, %c16_335], %175 {strides = array<i32>} : memref<64x64xbf16, #tpu.memory_space<vmem>>, vector<4x8xbf16>,
    %c0_336 = arith.constant 0 : index
    %c12_337 = arith.constant 12 : index
    %c3_338 = arith.constant 3 : index
    %c1_339 = arith.constant 1 : index
    %177 = vector.load %arg1[%c0_336, %c12_337, %c3_338, %c1_339] : memref<1x16x9x9xbf16, #tpu.memory_space<vmem>>, vector<1x4x1x8xbf16>
    %178 = vector.shape_cast %177 : vector<1x4x1x8xbf16> to vector<4x8xbf16>
    %c28_340 = arith.constant 28 : index
    %c24_341 = arith.constant 24 : index
    %179 = vector.load %arg6[%c28_340, %c24_341] : memref<64x64xbf16, #tpu.memory_space<vmem>>, vector<4x8xbf16>
    tpu.vector_store %arg6[%c28_340, %c24_341], %178 {strides = array<i32>} : memref<64x64xbf16, #tpu.memory_space<vmem>>, vector<4x8xbf16>,
    %c0_342 = arith.constant 0 : index
    %c12_343 = arith.constant 12 : index
    %c4_344 = arith.constant 4 : index
    %c1_345 = arith.constant 1 : index
    %180 = vector.load %arg1[%c0_342, %c12_343, %c4_344, %c1_345] : memref<1x16x9x9xbf16, #tpu.memory_space<vmem>>, vector<1x4x1x8xbf16>
    %181 = vector.shape_cast %180 : vector<1x4x1x8xbf16> to vector<4x8xbf16>
    %c28_346 = arith.constant 28 : index
    %c32_347 = arith.constant 32 : index
    %182 = vector.load %arg6[%c28_346, %c32_347] : memref<64x64xbf16, #tpu.memory_space<vmem>>, vector<4x8xbf16>
    tpu.vector_store %arg6[%c28_346, %c32_347], %181 {strides = array<i32>} : memref<64x64xbf16, #tpu.memory_space<vmem>>, vector<4x8xbf16>,
    %c0_348 = arith.constant 0 : index
    %c12_349 = arith.constant 12 : index
    %c5_350 = arith.constant 5 : index
    %c1_351 = arith.constant 1 : index
    %183 = vector.load %arg1[%c0_348, %c12_349, %c5_350, %c1_351] : memref<1x16x9x9xbf16, #tpu.memory_space<vmem>>, vector<1x4x1x8xbf16>
    %184 = vector.shape_cast %183 : vector<1x4x1x8xbf16> to vector<4x8xbf16>
    %c28_352 = arith.constant 28 : index
    %c40_353 = arith.constant 40 : index
    %185 = vector.load %arg6[%c28_352, %c40_353] : memref<64x64xbf16, #tpu.memory_space<vmem>>, vector<4x8xbf16>
    tpu.vector_store %arg6[%c28_352, %c40_353], %184 {strides = array<i32>} : memref<64x64xbf16, #tpu.memory_space<vmem>>, vector<4x8xbf16>,
    %c0_354 = arith.constant 0 : index
    %c12_355 = arith.constant 12 : index
    %c6_356 = arith.constant 6 : index
    %c1_357 = arith.constant 1 : index
    %186 = vector.load %arg1[%c0_354, %c12_355, %c6_356, %c1_357] : memref<1x16x9x9xbf16, #tpu.memory_space<vmem>>, vector<1x4x1x8xbf16>
    %187 = vector.shape_cast %186 : vector<1x4x1x8xbf16> to vector<4x8xbf16>
    %c28_358 = arith.constant 28 : index
    %c48_359 = arith.constant 48 : index
    %188 = vector.load %arg6[%c28_358, %c48_359] : memref<64x64xbf16, #tpu.memory_space<vmem>>, vector<4x8xbf16>
    tpu.vector_store %arg6[%c28_358, %c48_359], %187 {strides = array<i32>} : memref<64x64xbf16, #tpu.memory_space<vmem>>, vector<4x8xbf16>,
    %c0_360 = arith.constant 0 : index
    %c12_361 = arith.constant 12 : index
    %c7_362 = arith.constant 7 : index
    %c1_363 = arith.constant 1 : index
    %189 = vector.load %arg1[%c0_360, %c12_361, %c7_362, %c1_363] : memref<1x16x9x9xbf16, #tpu.memory_space<vmem>>, vector<1x4x1x8xbf16>
    %190 = vector.shape_cast %189 : vector<1x4x1x8xbf16> to vector<4x8xbf16>
    %c28_364 = arith.constant 28 : index
    %c56_365 = arith.constant 56 : index
    %191 = vector.load %arg6[%c28_364, %c56_365] : memref<64x64xbf16, #tpu.memory_space<vmem>>, vector<4x8xbf16>
    tpu.vector_store %arg6[%c28_364, %c56_365], %190 {strides = array<i32>} : memref<64x64xbf16, #tpu.memory_space<vmem>>, vector<4x8xbf16>,
    %c0_366 = arith.constant 0 : index
    %c0_367 = arith.constant 0 : index
    %c1_368 = arith.constant 1 : index
    %c0_369 = arith.constant 0 : index
    %192 = vector.load %arg1[%c0_366, %c0_367, %c1_368, %c0_369] : memref<1x16x9x9xbf16, #tpu.memory_space<vmem>>, vector<1x4x1x8xbf16>
    %193 = vector.shape_cast %192 : vector<1x4x1x8xbf16> to vector<4x8xbf16>
    %c32_370 = arith.constant 32 : index
    %c0_371 = arith.constant 0 : index
    %194 = vector.load %arg6[%c32_370, %c0_371] : memref<64x64xbf16, #tpu.memory_space<vmem>>, vector<4x8xbf16>
    tpu.vector_store %arg6[%c32_370, %c0_371], %193 {strides = array<i32>} : memref<64x64xbf16, #tpu.memory_space<vmem>>, vector<4x8xbf16>,
    %c0_372 = arith.constant 0 : index
    %c0_373 = arith.constant 0 : index
    %c2_374 = arith.constant 2 : index
    %c0_375 = arith.constant 0 : index
    %195 = vector.load %arg1[%c0_372, %c0_373, %c2_374, %c0_375] : memref<1x16x9x9xbf16, #tpu.memory_space<vmem>>, vector<1x4x1x8xbf16>
    %196 = vector.shape_cast %195 : vector<1x4x1x8xbf16> to vector<4x8xbf16>
    %c32_376 = arith.constant 32 : index
    %c8_377 = arith.constant 8 : index
    %197 = vector.load %arg6[%c32_376, %c8_377] : memref<64x64xbf16, #tpu.memory_space<vmem>>, vector<4x8xbf16>
    tpu.vector_store %arg6[%c32_376, %c8_377], %196 {strides = array<i32>} : memref<64x64xbf16, #tpu.memory_space<vmem>>, vector<4x8xbf16>,
    %c0_378 = arith.constant 0 : index
    %c0_379 = arith.constant 0 : index
    %c3_380 = arith.constant 3 : index
    %c0_381 = arith.constant 0 : index
    %198 = vector.load %arg1[%c0_378, %c0_379, %c3_380, %c0_381] : memref<1x16x9x9xbf16, #tpu.memory_space<vmem>>, vector<1x4x1x8xbf16>
    %199 = vector.shape_cast %198 : vector<1x4x1x8xbf16> to vector<4x8xbf16>
    %c32_382 = arith.constant 32 : index
    %c16_383 = arith.constant 16 : index
    %200 = vector.load %arg6[%c32_382, %c16_383] : memref<64x64xbf16, #tpu.memory_space<vmem>>, vector<4x8xbf16>
    tpu.vector_store %arg6[%c32_382, %c16_383], %199 {strides = array<i32>} : memref<64x64xbf16, #tpu.memory_space<vmem>>, vector<4x8xbf16>,
    %c0_384 = arith.constant 0 : index
    %c0_385 = arith.constant 0 : index
    %c4_386 = arith.constant 4 : index
    %c0_387 = arith.constant 0 : index
    %201 = vector.load %arg1[%c0_384, %c0_385, %c4_386, %c0_387] : memref<1x16x9x9xbf16, #tpu.memory_space<vmem>>, vector<1x4x1x8xbf16>
    %202 = vector.shape_cast %201 : vector<1x4x1x8xbf16> to vector<4x8xbf16>
    %c32_388 = arith.constant 32 : index
    %c24_389 = arith.constant 24 : index
    %203 = vector.load %arg6[%c32_388, %c24_389] : memref<64x64xbf16, #tpu.memory_space<vmem>>, vector<4x8xbf16>
    tpu.vector_store %arg6[%c32_388, %c24_389], %202 {strides = array<i32>} : memref<64x64xbf16, #tpu.memory_space<vmem>>, vector<4x8xbf16>,
    %c0_390 = arith.constant 0 : index
    %c0_391 = arith.constant 0 : index
    %c5_392 = arith.constant 5 : index
    %c0_393 = arith.constant 0 : index
    %204 = vector.load %arg1[%c0_390, %c0_391, %c5_392, %c0_393] : memref<1x16x9x9xbf16, #tpu.memory_space<vmem>>, vector<1x4x1x8xbf16>
    %205 = vector.shape_cast %204 : vector<1x4x1x8xbf16> to vector<4x8xbf16>
    %c32_394 = arith.constant 32 : index
    %c32_395 = arith.constant 32 : index
    %206 = vector.load %arg6[%c32_394, %c32_395] : memref<64x64xbf16, #tpu.memory_space<vmem>>, vector<4x8xbf16>
    tpu.vector_store %arg6[%c32_394, %c32_395], %205 {strides = array<i32>} : memref<64x64xbf16, #tpu.memory_space<vmem>>, vector<4x8xbf16>,
    %c0_396 = arith.constant 0 : index
    %c0_397 = arith.constant 0 : index
    %c6_398 = arith.constant 6 : index
    %c0_399 = arith.constant 0 : index
    %207 = vector.load %arg1[%c0_396, %c0_397, %c6_398, %c0_399] : memref<1x16x9x9xbf16, #tpu.memory_space<vmem>>, vector<1x4x1x8xbf16>
    %208 = vector.shape_cast %207 : vector<1x4x1x8xbf16> to vector<4x8xbf16>
    %c32_400 = arith.constant 32 : index
    %c40_401 = arith.constant 40 : index
    %209 = vector.load %arg6[%c32_400, %c40_401] : memref<64x64xbf16, #tpu.memory_space<vmem>>, vector<4x8xbf16>
    tpu.vector_store %arg6[%c32_400, %c40_401], %208 {strides = array<i32>} : memref<64x64xbf16, #tpu.memory_space<vmem>>, vector<4x8xbf16>,
    %c0_402 = arith.constant 0 : index
    %c0_403 = arith.constant 0 : index
    %c7_404 = arith.constant 7 : index
    %c0_405 = arith.constant 0 : index
    %210 = vector.load %arg1[%c0_402, %c0_403, %c7_404, %c0_405] : memref<1x16x9x9xbf16, #tpu.memory_space<vmem>>, vector<1x4x1x8xbf16>
    %211 = vector.shape_cast %210 : vector<1x4x1x8xbf16> to vector<4x8xbf16>
    %c32_406 = arith.constant 32 : index
    %c48_407 = arith.constant 48 : index
    %212 = vector.load %arg6[%c32_406, %c48_407] : memref<64x64xbf16, #tpu.memory_space<vmem>>, vector<4x8xbf16>
    tpu.vector_store %arg6[%c32_406, %c48_407], %211 {strides = array<i32>} : memref<64x64xbf16, #tpu.memory_space<vmem>>, vector<4x8xbf16>,
    %c0_408 = arith.constant 0 : index
    %c0_409 = arith.constant 0 : index
    %c8_410 = arith.constant 8 : index
    %c0_411 = arith.constant 0 : index
    %213 = vector.load %arg1[%c0_408, %c0_409, %c8_410, %c0_411] : memref<1x16x9x9xbf16, #tpu.memory_space<vmem>>, vector<1x4x1x8xbf16>
    %214 = vector.shape_cast %213 : vector<1x4x1x8xbf16> to vector<4x8xbf16>
    %c32_412 = arith.constant 32 : index
    %c56_413 = arith.constant 56 : index
    %215 = vector.load %arg6[%c32_412, %c56_413] : memref<64x64xbf16, #tpu.memory_space<vmem>>, vector<4x8xbf16>
    tpu.vector_store %arg6[%c32_412, %c56_413], %214 {strides = array<i32>} : memref<64x64xbf16, #tpu.memory_space<vmem>>, vector<4x8xbf16>,
    %c0_414 = arith.constant 0 : index
    %c4_415 = arith.constant 4 : index
    %c1_416 = arith.constant 1 : index
    %c0_417 = arith.constant 0 : index
    %216 = vector.load %arg1[%c0_414, %c4_415, %c1_416, %c0_417] : memref<1x16x9x9xbf16, #tpu.memory_space<vmem>>, vector<1x4x1x8xbf16>
    %217 = vector.shape_cast %216 : vector<1x4x1x8xbf16> to vector<4x8xbf16>
    %c36 = arith.constant 36 : index
    %c0_418 = arith.constant 0 : index
    %218 = vector.load %arg6[%c36, %c0_418] : memref<64x64xbf16, #tpu.memory_space<vmem>>, vector<4x8xbf16>
    tpu.vector_store %arg6[%c36, %c0_418], %217 {strides = array<i32>} : memref<64x64xbf16, #tpu.memory_space<vmem>>, vector<4x8xbf16>,
    %c0_419 = arith.constant 0 : index
    %c4_420 = arith.constant 4 : index
    %c2_421 = arith.constant 2 : index
    %c0_422 = arith.constant 0 : index
    %219 = vector.load %arg1[%c0_419, %c4_420, %c2_421, %c0_422] : memref<1x16x9x9xbf16, #tpu.memory_space<vmem>>, vector<1x4x1x8xbf16>
    %220 = vector.shape_cast %219 : vector<1x4x1x8xbf16> to vector<4x8xbf16>
    %c36_423 = arith.constant 36 : index
    %c8_424 = arith.constant 8 : index
    %221 = vector.load %arg6[%c36_423, %c8_424] : memref<64x64xbf16, #tpu.memory_space<vmem>>, vector<4x8xbf16>
    tpu.vector_store %arg6[%c36_423, %c8_424], %220 {strides = array<i32>} : memref<64x64xbf16, #tpu.memory_space<vmem>>, vector<4x8xbf16>,
    %c0_425 = arith.constant 0 : index
    %c4_426 = arith.constant 4 : index
    %c3_427 = arith.constant 3 : index
    %c0_428 = arith.constant 0 : index
    %222 = vector.load %arg1[%c0_425, %c4_426, %c3_427, %c0_428] : memref<1x16x9x9xbf16, #tpu.memory_space<vmem>>, vector<1x4x1x8xbf16>
    %223 = vector.shape_cast %222 : vector<1x4x1x8xbf16> to vector<4x8xbf16>
    %c36_429 = arith.constant 36 : index
    %c16_430 = arith.constant 16 : index
    %224 = vector.load %arg6[%c36_429, %c16_430] : memref<64x64xbf16, #tpu.memory_space<vmem>>, vector<4x8xbf16>
    tpu.vector_store %arg6[%c36_429, %c16_430], %223 {strides = array<i32>} : memref<64x64xbf16, #tpu.memory_space<vmem>>, vector<4x8xbf16>,
    %c0_431 = arith.constant 0 : index
    %c4_432 = arith.constant 4 : index
    %c4_433 = arith.constant 4 : index
    %c0_434 = arith.constant 0 : index
    %225 = vector.load %arg1[%c0_431, %c4_432, %c4_433, %c0_434] : memref<1x16x9x9xbf16, #tpu.memory_space<vmem>>, vector<1x4x1x8xbf16>
    %226 = vector.shape_cast %225 : vector<1x4x1x8xbf16> to vector<4x8xbf16>
    %c36_435 = arith.constant 36 : index
    %c24_436 = arith.constant 24 : index
    %227 = vector.load %arg6[%c36_435, %c24_436] : memref<64x64xbf16, #tpu.memory_space<vmem>>, vector<4x8xbf16>
    tpu.vector_store %arg6[%c36_435, %c24_436], %226 {strides = array<i32>} : memref<64x64xbf16, #tpu.memory_space<vmem>>, vector<4x8xbf16>,
    %c0_437 = arith.constant 0 : index
    %c4_438 = arith.constant 4 : index
    %c5_439 = arith.constant 5 : index
    %c0_440 = arith.constant 0 : index
    %228 = vector.load %arg1[%c0_437, %c4_438, %c5_439, %c0_440] : memref<1x16x9x9xbf16, #tpu.memory_space<vmem>>, vector<1x4x1x8xbf16>
    %229 = vector.shape_cast %228 : vector<1x4x1x8xbf16> to vector<4x8xbf16>
    %c36_441 = arith.constant 36 : index
    %c32_442 = arith.constant 32 : index
    %230 = vector.load %arg6[%c36_441, %c32_442] : memref<64x64xbf16, #tpu.memory_space<vmem>>, vector<4x8xbf16>
    tpu.vector_store %arg6[%c36_441, %c32_442], %229 {strides = array<i32>} : memref<64x64xbf16, #tpu.memory_space<vmem>>, vector<4x8xbf16>,
    %c0_443 = arith.constant 0 : index
    %c4_444 = arith.constant 4 : index
    %c6_445 = arith.constant 6 : index
    %c0_446 = arith.constant 0 : index
    %231 = vector.load %arg1[%c0_443, %c4_444, %c6_445, %c0_446] : memref<1x16x9x9xbf16, #tpu.memory_space<vmem>>, vector<1x4x1x8xbf16>
    %232 = vector.shape_cast %231 : vector<1x4x1x8xbf16> to vector<4x8xbf16>
    %c36_447 = arith.constant 36 : index
    %c40_448 = arith.constant 40 : index
    %233 = vector.load %arg6[%c36_447, %c40_448] : memref<64x64xbf16, #tpu.memory_space<vmem>>, vector<4x8xbf16>
    tpu.vector_store %arg6[%c36_447, %c40_448], %232 {strides = array<i32>} : memref<64x64xbf16, #tpu.memory_space<vmem>>, vector<4x8xbf16>,
    %c0_449 = arith.constant 0 : index
    %c4_450 = arith.constant 4 : index
    %c7_451 = arith.constant 7 : index
    %c0_452 = arith.constant 0 : index
    %234 = vector.load %arg1[%c0_449, %c4_450, %c7_451, %c0_452] : memref<1x16x9x9xbf16, #tpu.memory_space<vmem>>, vector<1x4x1x8xbf16>
    %235 = vector.shape_cast %234 : vector<1x4x1x8xbf16> to vector<4x8xbf16>
    %c36_453 = arith.constant 36 : index
    %c48_454 = arith.constant 48 : index
    %236 = vector.load %arg6[%c36_453, %c48_454] : memref<64x64xbf16, #tpu.memory_space<vmem>>, vector<4x8xbf16>
    tpu.vector_store %arg6[%c36_453, %c48_454], %235 {strides = array<i32>} : memref<64x64xbf16, #tpu.memory_space<vmem>>, vector<4x8xbf16>,
    %c0_455 = arith.constant 0 : index
    %c4_456 = arith.constant 4 : index
    %c8_457 = arith.constant 8 : index
    %c0_458 = arith.constant 0 : index
    %237 = vector.load %arg1[%c0_455, %c4_456, %c8_457, %c0_458] : memref<1x16x9x9xbf16, #tpu.memory_space<vmem>>, vector<1x4x1x8xbf16>
    %238 = vector.shape_cast %237 : vector<1x4x1x8xbf16> to vector<4x8xbf16>
    %c36_459 = arith.constant 36 : index
    %c56_460 = arith.constant 56 : index
    %239 = vector.load %arg6[%c36_459, %c56_460] : memref<64x64xbf16, #tpu.memory_space<vmem>>, vector<4x8xbf16>
    tpu.vector_store %arg6[%c36_459, %c56_460], %238 {strides = array<i32>} : memref<64x64xbf16, #tpu.memory_space<vmem>>, vector<4x8xbf16>,
    %c0_461 = arith.constant 0 : index
    %c0_462 = arith.constant 0 : index
    %c1_463 = arith.constant 1 : index
    %c1_464 = arith.constant 1 : index
    %240 = vector.load %arg1[%c0_461, %c0_462, %c1_463, %c1_464] : memref<1x16x9x9xbf16, #tpu.memory_space<vmem>>, vector<1x4x1x8xbf16>
    %241 = vector.shape_cast %240 : vector<1x4x1x8xbf16> to vector<4x8xbf16>
    %c40_465 = arith.constant 40 : index
    %c0_466 = arith.constant 0 : index
    %242 = vector.load %arg6[%c40_465, %c0_466] : memref<64x64xbf16, #tpu.memory_space<vmem>>, vector<4x8xbf16>
    tpu.vector_store %arg6[%c40_465, %c0_466], %241 {strides = array<i32>} : memref<64x64xbf16, #tpu.memory_space<vmem>>, vector<4x8xbf16>,
    %c0_467 = arith.constant 0 : index
    %c0_468 = arith.constant 0 : index
    %c2_469 = arith.constant 2 : index
    %c1_470 = arith.constant 1 : index
    %243 = vector.load %arg1[%c0_467, %c0_468, %c2_469, %c1_470] : memref<1x16x9x9xbf16, #tpu.memory_space<vmem>>, vector<1x4x1x8xbf16>
    %244 = vector.shape_cast %243 : vector<1x4x1x8xbf16> to vector<4x8xbf16>
    %c40_471 = arith.constant 40 : index
    %c8_472 = arith.constant 8 : index
    %245 = vector.load %arg6[%c40_471, %c8_472] : memref<64x64xbf16, #tpu.memory_space<vmem>>, vector<4x8xbf16>
    tpu.vector_store %arg6[%c40_471, %c8_472], %244 {strides = array<i32>} : memref<64x64xbf16, #tpu.memory_space<vmem>>, vector<4x8xbf16>,
    %c0_473 = arith.constant 0 : index
    %c0_474 = arith.constant 0 : index
    %c3_475 = arith.constant 3 : index
    %c1_476 = arith.constant 1 : index
    %246 = vector.load %arg1[%c0_473, %c0_474, %c3_475, %c1_476] : memref<1x16x9x9xbf16, #tpu.memory_space<vmem>>, vector<1x4x1x8xbf16>
    %247 = vector.shape_cast %246 : vector<1x4x1x8xbf16> to vector<4x8xbf16>
    %c40_477 = arith.constant 40 : index
    %c16_478 = arith.constant 16 : index
    %248 = vector.load %arg6[%c40_477, %c16_478] : memref<64x64xbf16, #tpu.memory_space<vmem>>, vector<4x8xbf16>
    tpu.vector_store %arg6[%c40_477, %c16_478], %247 {strides = array<i32>} : memref<64x64xbf16, #tpu.memory_space<vmem>>, vector<4x8xbf16>,
    %c0_479 = arith.constant 0 : index
    %c0_480 = arith.constant 0 : index
    %c4_481 = arith.constant 4 : index
    %c1_482 = arith.constant 1 : index
    %249 = vector.load %arg1[%c0_479, %c0_480, %c4_481, %c1_482] : memref<1x16x9x9xbf16, #tpu.memory_space<vmem>>, vector<1x4x1x8xbf16>
    %250 = vector.shape_cast %249 : vector<1x4x1x8xbf16> to vector<4x8xbf16>
    %c40_483 = arith.constant 40 : index
    %c24_484 = arith.constant 24 : index
    %251 = vector.load %arg6[%c40_483, %c24_484] : memref<64x64xbf16, #tpu.memory_space<vmem>>, vector<4x8xbf16>
    tpu.vector_store %arg6[%c40_483, %c24_484], %250 {strides = array<i32>} : memref<64x64xbf16, #tpu.memory_space<vmem>>, vector<4x8xbf16>,
    %c0_485 = arith.constant 0 : index
    %c0_486 = arith.constant 0 : index
    %c5_487 = arith.constant 5 : index
    %c1_488 = arith.constant 1 : index
    %252 = vector.load %arg1[%c0_485, %c0_486, %c5_487, %c1_488] : memref<1x16x9x9xbf16, #tpu.memory_space<vmem>>, vector<1x4x1x8xbf16>
    %253 = vector.shape_cast %252 : vector<1x4x1x8xbf16> to vector<4x8xbf16>
    %c40_489 = arith.constant 40 : index
    %c32_490 = arith.constant 32 : index
    %254 = vector.load %arg6[%c40_489, %c32_490] : memref<64x64xbf16, #tpu.memory_space<vmem>>, vector<4x8xbf16>
    tpu.vector_store %arg6[%c40_489, %c32_490], %253 {strides = array<i32>} : memref<64x64xbf16, #tpu.memory_space<vmem>>, vector<4x8xbf16>,
    %c0_491 = arith.constant 0 : index
    %c0_492 = arith.constant 0 : index
    %c6_493 = arith.constant 6 : index
    %c1_494 = arith.constant 1 : index
    %255 = vector.load %arg1[%c0_491, %c0_492, %c6_493, %c1_494] : memref<1x16x9x9xbf16, #tpu.memory_space<vmem>>, vector<1x4x1x8xbf16>
    %256 = vector.shape_cast %255 : vector<1x4x1x8xbf16> to vector<4x8xbf16>
    %c40_495 = arith.constant 40 : index
    %c40_496 = arith.constant 40 : index
    %257 = vector.load %arg6[%c40_495, %c40_496] : memref<64x64xbf16, #tpu.memory_space<vmem>>, vector<4x8xbf16>
    tpu.vector_store %arg6[%c40_495, %c40_496], %256 {strides = array<i32>} : memref<64x64xbf16, #tpu.memory_space<vmem>>, vector<4x8xbf16>,
    %c0_497 = arith.constant 0 : index
    %c0_498 = arith.constant 0 : index
    %c7_499 = arith.constant 7 : index
    %c1_500 = arith.constant 1 : index
    %258 = vector.load %arg1[%c0_497, %c0_498, %c7_499, %c1_500] : memref<1x16x9x9xbf16, #tpu.memory_space<vmem>>, vector<1x4x1x8xbf16>
    %259 = vector.shape_cast %258 : vector<1x4x1x8xbf16> to vector<4x8xbf16>
    %c40_501 = arith.constant 40 : index
    %c48_502 = arith.constant 48 : index
    %260 = vector.load %arg6[%c40_501, %c48_502] : memref<64x64xbf16, #tpu.memory_space<vmem>>, vector<4x8xbf16>
    tpu.vector_store %arg6[%c40_501, %c48_502], %259 {strides = array<i32>} : memref<64x64xbf16, #tpu.memory_space<vmem>>, vector<4x8xbf16>,
    %c0_503 = arith.constant 0 : index
    %c0_504 = arith.constant 0 : index
    %c8_505 = arith.constant 8 : index
    %c1_506 = arith.constant 1 : index
    %261 = vector.load %arg1[%c0_503, %c0_504, %c8_505, %c1_506] : memref<1x16x9x9xbf16, #tpu.memory_space<vmem>>, vector<1x4x1x8xbf16>
    %262 = vector.shape_cast %261 : vector<1x4x1x8xbf16> to vector<4x8xbf16>
    %c40_507 = arith.constant 40 : index
    %c56_508 = arith.constant 56 : index
    %263 = vector.load %arg6[%c40_507, %c56_508] : memref<64x64xbf16, #tpu.memory_space<vmem>>, vector<4x8xbf16>
    tpu.vector_store %arg6[%c40_507, %c56_508], %262 {strides = array<i32>} : memref<64x64xbf16, #tpu.memory_space<vmem>>, vector<4x8xbf16>,
    %c0_509 = arith.constant 0 : index
    %c4_510 = arith.constant 4 : index
    %c1_511 = arith.constant 1 : index
    %c1_512 = arith.constant 1 : index
    %264 = vector.load %arg1[%c0_509, %c4_510, %c1_511, %c1_512] : memref<1x16x9x9xbf16, #tpu.memory_space<vmem>>, vector<1x4x1x8xbf16>
    %265 = vector.shape_cast %264 : vector<1x4x1x8xbf16> to vector<4x8xbf16>
    %c44 = arith.constant 44 : index
    %c0_513 = arith.constant 0 : index
    %266 = vector.load %arg6[%c44, %c0_513] : memref<64x64xbf16, #tpu.memory_space<vmem>>, vector<4x8xbf16>
    tpu.vector_store %arg6[%c44, %c0_513], %265 {strides = array<i32>} : memref<64x64xbf16, #tpu.memory_space<vmem>>, vector<4x8xbf16>,
    %c0_514 = arith.constant 0 : index
    %c4_515 = arith.constant 4 : index
    %c2_516 = arith.constant 2 : index
    %c1_517 = arith.constant 1 : index
    %267 = vector.load %arg1[%c0_514, %c4_515, %c2_516, %c1_517] : memref<1x16x9x9xbf16, #tpu.memory_space<vmem>>, vector<1x4x1x8xbf16>
    %268 = vector.shape_cast %267 : vector<1x4x1x8xbf16> to vector<4x8xbf16>
    %c44_518 = arith.constant 44 : index
    %c8_519 = arith.constant 8 : index
    %269 = vector.load %arg6[%c44_518, %c8_519] : memref<64x64xbf16, #tpu.memory_space<vmem>>, vector<4x8xbf16>
    tpu.vector_store %arg6[%c44_518, %c8_519], %268 {strides = array<i32>} : memref<64x64xbf16, #tpu.memory_space<vmem>>, vector<4x8xbf16>,
    %c0_520 = arith.constant 0 : index
    %c4_521 = arith.constant 4 : index
    %c3_522 = arith.constant 3 : index
    %c1_523 = arith.constant 1 : index
    %270 = vector.load %arg1[%c0_520, %c4_521, %c3_522, %c1_523] : memref<1x16x9x9xbf16, #tpu.memory_space<vmem>>, vector<1x4x1x8xbf16>
    %271 = vector.shape_cast %270 : vector<1x4x1x8xbf16> to vector<4x8xbf16>
    %c44_524 = arith.constant 44 : index
    %c16_525 = arith.constant 16 : index
    %272 = vector.load %arg6[%c44_524, %c16_525] : memref<64x64xbf16, #tpu.memory_space<vmem>>, vector<4x8xbf16>
    tpu.vector_store %arg6[%c44_524, %c16_525], %271 {strides = array<i32>} : memref<64x64xbf16, #tpu.memory_space<vmem>>, vector<4x8xbf16>,
    %c0_526 = arith.constant 0 : index
    %c4_527 = arith.constant 4 : index
    %c4_528 = arith.constant 4 : index
    %c1_529 = arith.constant 1 : index
    %273 = vector.load %arg1[%c0_526, %c4_527, %c4_528, %c1_529] : memref<1x16x9x9xbf16, #tpu.memory_space<vmem>>, vector<1x4x1x8xbf16>
    %274 = vector.shape_cast %273 : vector<1x4x1x8xbf16> to vector<4x8xbf16>
    %c44_530 = arith.constant 44 : index
    %c24_531 = arith.constant 24 : index
    %275 = vector.load %arg6[%c44_530, %c24_531] : memref<64x64xbf16, #tpu.memory_space<vmem>>, vector<4x8xbf16>
    tpu.vector_store %arg6[%c44_530, %c24_531], %274 {strides = array<i32>} : memref<64x64xbf16, #tpu.memory_space<vmem>>, vector<4x8xbf16>,
    %c0_532 = arith.constant 0 : index
    %c4_533 = arith.constant 4 : index
    %c5_534 = arith.constant 5 : index
    %c1_535 = arith.constant 1 : index
    %276 = vector.load %arg1[%c0_532, %c4_533, %c5_534, %c1_535] : memref<1x16x9x9xbf16, #tpu.memory_space<vmem>>, vector<1x4x1x8xbf16>
    %277 = vector.shape_cast %276 : vector<1x4x1x8xbf16> to vector<4x8xbf16>
    %c44_536 = arith.constant 44 : index
    %c32_537 = arith.constant 32 : index
    %278 = vector.load %arg6[%c44_536, %c32_537] : memref<64x64xbf16, #tpu.memory_space<vmem>>, vector<4x8xbf16>
    tpu.vector_store %arg6[%c44_536, %c32_537], %277 {strides = array<i32>} : memref<64x64xbf16, #tpu.memory_space<vmem>>, vector<4x8xbf16>,
    %c0_538 = arith.constant 0 : index
    %c4_539 = arith.constant 4 : index
    %c6_540 = arith.constant 6 : index
    %c1_541 = arith.constant 1 : index
    %279 = vector.load %arg1[%c0_538, %c4_539, %c6_540, %c1_541] : memref<1x16x9x9xbf16, #tpu.memory_space<vmem>>, vector<1x4x1x8xbf16>
    %280 = vector.shape_cast %279 : vector<1x4x1x8xbf16> to vector<4x8xbf16>
    %c44_542 = arith.constant 44 : index
    %c40_543 = arith.constant 40 : index
    %281 = vector.load %arg6[%c44_542, %c40_543] : memref<64x64xbf16, #tpu.memory_space<vmem>>, vector<4x8xbf16>
    tpu.vector_store %arg6[%c44_542, %c40_543], %280 {strides = array<i32>} : memref<64x64xbf16, #tpu.memory_space<vmem>>, vector<4x8xbf16>,
    %c0_544 = arith.constant 0 : index
    %c4_545 = arith.constant 4 : index
    %c7_546 = arith.constant 7 : index
    %c1_547 = arith.constant 1 : index
    %282 = vector.load %arg1[%c0_544, %c4_545, %c7_546, %c1_547] : memref<1x16x9x9xbf16, #tpu.memory_space<vmem>>, vector<1x4x1x8xbf16>
    %283 = vector.shape_cast %282 : vector<1x4x1x8xbf16> to vector<4x8xbf16>
    %c44_548 = arith.constant 44 : index
    %c48_549 = arith.constant 48 : index
    %284 = vector.load %arg6[%c44_548, %c48_549] : memref<64x64xbf16, #tpu.memory_space<vmem>>, vector<4x8xbf16>
    tpu.vector_store %arg6[%c44_548, %c48_549], %283 {strides = array<i32>} : memref<64x64xbf16, #tpu.memory_space<vmem>>, vector<4x8xbf16>,
    %c0_550 = arith.constant 0 : index
    %c4_551 = arith.constant 4 : index
    %c8_552 = arith.constant 8 : index
    %c1_553 = arith.constant 1 : index
    %285 = vector.load %arg1[%c0_550, %c4_551, %c8_552, %c1_553] : memref<1x16x9x9xbf16, #tpu.memory_space<vmem>>, vector<1x4x1x8xbf16>
    %286 = vector.shape_cast %285 : vector<1x4x1x8xbf16> to vector<4x8xbf16>
    %c44_554 = arith.constant 44 : index
    %c56_555 = arith.constant 56 : index
    %287 = vector.load %arg6[%c44_554, %c56_555] : memref<64x64xbf16, #tpu.memory_space<vmem>>, vector<4x8xbf16>
    tpu.vector_store %arg6[%c44_554, %c56_555], %286 {strides = array<i32>} : memref<64x64xbf16, #tpu.memory_space<vmem>>, vector<4x8xbf16>,
    %c0_556 = arith.constant 0 : index
    %c8_557 = arith.constant 8 : index
    %c1_558 = arith.constant 1 : index
    %c0_559 = arith.constant 0 : index
    %288 = vector.load %arg1[%c0_556, %c8_557, %c1_558, %c0_559] : memref<1x16x9x9xbf16, #tpu.memory_space<vmem>>, vector<1x4x1x8xbf16>
    %289 = vector.shape_cast %288 : vector<1x4x1x8xbf16> to vector<4x8xbf16>
    %c48_560 = arith.constant 48 : index
    %c0_561 = arith.constant 0 : index
    %290 = vector.load %arg6[%c48_560, %c0_561] : memref<64x64xbf16, #tpu.memory_space<vmem>>, vector<4x8xbf16>
    tpu.vector_store %arg6[%c48_560, %c0_561], %289 {strides = array<i32>} : memref<64x64xbf16, #tpu.memory_space<vmem>>, vector<4x8xbf16>,
    %c0_562 = arith.constant 0 : index
    %c8_563 = arith.constant 8 : index
    %c2_564 = arith.constant 2 : index
    %c0_565 = arith.constant 0 : index
    %291 = vector.load %arg1[%c0_562, %c8_563, %c2_564, %c0_565] : memref<1x16x9x9xbf16, #tpu.memory_space<vmem>>, vector<1x4x1x8xbf16>
    %292 = vector.shape_cast %291 : vector<1x4x1x8xbf16> to vector<4x8xbf16>
    %c48_566 = arith.constant 48 : index
    %c8_567 = arith.constant 8 : index
    %293 = vector.load %arg6[%c48_566, %c8_567] : memref<64x64xbf16, #tpu.memory_space<vmem>>, vector<4x8xbf16>
    tpu.vector_store %arg6[%c48_566, %c8_567], %292 {strides = array<i32>} : memref<64x64xbf16, #tpu.memory_space<vmem>>, vector<4x8xbf16>,
    %c0_568 = arith.constant 0 : index
    %c8_569 = arith.constant 8 : index
    %c3_570 = arith.constant 3 : index
    %c0_571 = arith.constant 0 : index
    %294 = vector.load %arg1[%c0_568, %c8_569, %c3_570, %c0_571] : memref<1x16x9x9xbf16, #tpu.memory_space<vmem>>, vector<1x4x1x8xbf16>
    %295 = vector.shape_cast %294 : vector<1x4x1x8xbf16> to vector<4x8xbf16>
    %c48_572 = arith.constant 48 : index
    %c16_573 = arith.constant 16 : index
    %296 = vector.load %arg6[%c48_572, %c16_573] : memref<64x64xbf16, #tpu.memory_space<vmem>>, vector<4x8xbf16>
    tpu.vector_store %arg6[%c48_572, %c16_573], %295 {strides = array<i32>} : memref<64x64xbf16, #tpu.memory_space<vmem>>, vector<4x8xbf16>,
    %c0_574 = arith.constant 0 : index
    %c8_575 = arith.constant 8 : index
    %c4_576 = arith.constant 4 : index
    %c0_577 = arith.constant 0 : index
    %297 = vector.load %arg1[%c0_574, %c8_575, %c4_576, %c0_577] : memref<1x16x9x9xbf16, #tpu.memory_space<vmem>>, vector<1x4x1x8xbf16>
    %298 = vector.shape_cast %297 : vector<1x4x1x8xbf16> to vector<4x8xbf16>
    %c48_578 = arith.constant 48 : index
    %c24_579 = arith.constant 24 : index
    %299 = vector.load %arg6[%c48_578, %c24_579] : memref<64x64xbf16, #tpu.memory_space<vmem>>, vector<4x8xbf16>
    tpu.vector_store %arg6[%c48_578, %c24_579], %298 {strides = array<i32>} : memref<64x64xbf16, #tpu.memory_space<vmem>>, vector<4x8xbf16>,
    %c0_580 = arith.constant 0 : index
    %c8_581 = arith.constant 8 : index
    %c5_582 = arith.constant 5 : index
    %c0_583 = arith.constant 0 : index
    %300 = vector.load %arg1[%c0_580, %c8_581, %c5_582, %c0_583] : memref<1x16x9x9xbf16, #tpu.memory_space<vmem>>, vector<1x4x1x8xbf16>
    %301 = vector.shape_cast %300 : vector<1x4x1x8xbf16> to vector<4x8xbf16>
    %c48_584 = arith.constant 48 : index
    %c32_585 = arith.constant 32 : index
    %302 = vector.load %arg6[%c48_584, %c32_585] : memref<64x64xbf16, #tpu.memory_space<vmem>>, vector<4x8xbf16>
    tpu.vector_store %arg6[%c48_584, %c32_585], %301 {strides = array<i32>} : memref<64x64xbf16, #tpu.memory_space<vmem>>, vector<4x8xbf16>,
    %c0_586 = arith.constant 0 : index
    %c8_587 = arith.constant 8 : index
    %c6_588 = arith.constant 6 : index
    %c0_589 = arith.constant 0 : index
    %303 = vector.load %arg1[%c0_586, %c8_587, %c6_588, %c0_589] : memref<1x16x9x9xbf16, #tpu.memory_space<vmem>>, vector<1x4x1x8xbf16>
    %304 = vector.shape_cast %303 : vector<1x4x1x8xbf16> to vector<4x8xbf16>
    %c48_590 = arith.constant 48 : index
    %c40_591 = arith.constant 40 : index
    %305 = vector.load %arg6[%c48_590, %c40_591] : memref<64x64xbf16, #tpu.memory_space<vmem>>, vector<4x8xbf16>
    tpu.vector_store %arg6[%c48_590, %c40_591], %304 {strides = array<i32>} : memref<64x64xbf16, #tpu.memory_space<vmem>>, vector<4x8xbf16>,
    %c0_592 = arith.constant 0 : index
    %c8_593 = arith.constant 8 : index
    %c7_594 = arith.constant 7 : index
    %c0_595 = arith.constant 0 : index
    %306 = vector.load %arg1[%c0_592, %c8_593, %c7_594, %c0_595] : memref<1x16x9x9xbf16, #tpu.memory_space<vmem>>, vector<1x4x1x8xbf16>
    %307 = vector.shape_cast %306 : vector<1x4x1x8xbf16> to vector<4x8xbf16>
    %c48_596 = arith.constant 48 : index
    %c48_597 = arith.constant 48 : index
    %308 = vector.load %arg6[%c48_596, %c48_597] : memref<64x64xbf16, #tpu.memory_space<vmem>>, vector<4x8xbf16>
    tpu.vector_store %arg6[%c48_596, %c48_597], %307 {strides = array<i32>} : memref<64x64xbf16, #tpu.memory_space<vmem>>, vector<4x8xbf16>,
    %c0_598 = arith.constant 0 : index
    %c8_599 = arith.constant 8 : index
    %c8_600 = arith.constant 8 : index
    %c0_601 = arith.constant 0 : index
    %309 = vector.load %arg1[%c0_598, %c8_599, %c8_600, %c0_601] : memref<1x16x9x9xbf16, #tpu.memory_space<vmem>>, vector<1x4x1x8xbf16>
    %310 = vector.shape_cast %309 : vector<1x4x1x8xbf16> to vector<4x8xbf16>
    %c48_602 = arith.constant 48 : index
    %c56_603 = arith.constant 56 : index
    %311 = vector.load %arg6[%c48_602, %c56_603] : memref<64x64xbf16, #tpu.memory_space<vmem>>, vector<4x8xbf16>
    tpu.vector_store %arg6[%c48_602, %c56_603], %310 {strides = array<i32>} : memref<64x64xbf16, #tpu.memory_space<vmem>>, vector<4x8xbf16>,
    %c0_604 = arith.constant 0 : index
    %c12_605 = arith.constant 12 : index
    %c1_606 = arith.constant 1 : index
    %c0_607 = arith.constant 0 : index
    %312 = vector.load %arg1[%c0_604, %c12_605, %c1_606, %c0_607] : memref<1x16x9x9xbf16, #tpu.memory_space<vmem>>, vector<1x4x1x8xbf16>
    %313 = vector.shape_cast %312 : vector<1x4x1x8xbf16> to vector<4x8xbf16>
    %c52 = arith.constant 52 : index
    %c0_608 = arith.constant 0 : index
    %314 = vector.load %arg6[%c52, %c0_608] : memref<64x64xbf16, #tpu.memory_space<vmem>>, vector<4x8xbf16>
    tpu.vector_store %arg6[%c52, %c0_608], %313 {strides = array<i32>} : memref<64x64xbf16, #tpu.memory_space<vmem>>, vector<4x8xbf16>,
    %c0_609 = arith.constant 0 : index
    %c12_610 = arith.constant 12 : index
    %c2_611 = arith.constant 2 : index
    %c0_612 = arith.constant 0 : index
    %315 = vector.load %arg1[%c0_609, %c12_610, %c2_611, %c0_612] : memref<1x16x9x9xbf16, #tpu.memory_space<vmem>>, vector<1x4x1x8xbf16>
    %316 = vector.shape_cast %315 : vector<1x4x1x8xbf16> to vector<4x8xbf16>
    %c52_613 = arith.constant 52 : index
    %c8_614 = arith.constant 8 : index
    %317 = vector.load %arg6[%c52_613, %c8_614] : memref<64x64xbf16, #tpu.memory_space<vmem>>, vector<4x8xbf16>
    tpu.vector_store %arg6[%c52_613, %c8_614], %316 {strides = array<i32>} : memref<64x64xbf16, #tpu.memory_space<vmem>>, vector<4x8xbf16>,
    %c0_615 = arith.constant 0 : index
    %c12_616 = arith.constant 12 : index
    %c3_617 = arith.constant 3 : index
    %c0_618 = arith.constant 0 : index
    %318 = vector.load %arg1[%c0_615, %c12_616, %c3_617, %c0_618] : memref<1x16x9x9xbf16, #tpu.memory_space<vmem>>, vector<1x4x1x8xbf16>
    %319 = vector.shape_cast %318 : vector<1x4x1x8xbf16> to vector<4x8xbf16>
    %c52_619 = arith.constant 52 : index
    %c16_620 = arith.constant 16 : index
    %320 = vector.load %arg6[%c52_619, %c16_620] : memref<64x64xbf16, #tpu.memory_space<vmem>>, vector<4x8xbf16>
    tpu.vector_store %arg6[%c52_619, %c16_620], %319 {strides = array<i32>} : memref<64x64xbf16, #tpu.memory_space<vmem>>, vector<4x8xbf16>,
    %c0_621 = arith.constant 0 : index
    %c12_622 = arith.constant 12 : index
    %c4_623 = arith.constant 4 : index
    %c0_624 = arith.constant 0 : index
    %321 = vector.load %arg1[%c0_621, %c12_622, %c4_623, %c0_624] : memref<1x16x9x9xbf16, #tpu.memory_space<vmem>>, vector<1x4x1x8xbf16>
    %322 = vector.shape_cast %321 : vector<1x4x1x8xbf16> to vector<4x8xbf16>
    %c52_625 = arith.constant 52 : index
    %c24_626 = arith.constant 24 : index
    %323 = vector.load %arg6[%c52_625, %c24_626] : memref<64x64xbf16, #tpu.memory_space<vmem>>, vector<4x8xbf16>
    tpu.vector_store %arg6[%c52_625, %c24_626], %322 {strides = array<i32>} : memref<64x64xbf16, #tpu.memory_space<vmem>>, vector<4x8xbf16>,
    %c0_627 = arith.constant 0 : index
    %c12_628 = arith.constant 12 : index
    %c5_629 = arith.constant 5 : index
    %c0_630 = arith.constant 0 : index
    %324 = vector.load %arg1[%c0_627, %c12_628, %c5_629, %c0_630] : memref<1x16x9x9xbf16, #tpu.memory_space<vmem>>, vector<1x4x1x8xbf16>
    %325 = vector.shape_cast %324 : vector<1x4x1x8xbf16> to vector<4x8xbf16>
    %c52_631 = arith.constant 52 : index
    %c32_632 = arith.constant 32 : index
    %326 = vector.load %arg6[%c52_631, %c32_632] : memref<64x64xbf16, #tpu.memory_space<vmem>>, vector<4x8xbf16>
    tpu.vector_store %arg6[%c52_631, %c32_632], %325 {strides = array<i32>} : memref<64x64xbf16, #tpu.memory_space<vmem>>, vector<4x8xbf16>,
    %c0_633 = arith.constant 0 : index
    %c12_634 = arith.constant 12 : index
    %c6_635 = arith.constant 6 : index
    %c0_636 = arith.constant 0 : index
    %327 = vector.load %arg1[%c0_633, %c12_634, %c6_635, %c0_636] : memref<1x16x9x9xbf16, #tpu.memory_space<vmem>>, vector<1x4x1x8xbf16>
    %328 = vector.shape_cast %327 : vector<1x4x1x8xbf16> to vector<4x8xbf16>
    %c52_637 = arith.constant 52 : index
    %c40_638 = arith.constant 40 : index
    %329 = vector.load %arg6[%c52_637, %c40_638] : memref<64x64xbf16, #tpu.memory_space<vmem>>, vector<4x8xbf16>
    tpu.vector_store %arg6[%c52_637, %c40_638], %328 {strides = array<i32>} : memref<64x64xbf16, #tpu.memory_space<vmem>>, vector<4x8xbf16>,
    %c0_639 = arith.constant 0 : index
    %c12_640 = arith.constant 12 : index
    %c7_641 = arith.constant 7 : index
    %c0_642 = arith.constant 0 : index
    %330 = vector.load %arg1[%c0_639, %c12_640, %c7_641, %c0_642] : memref<1x16x9x9xbf16, #tpu.memory_space<vmem>>, vector<1x4x1x8xbf16>
    %331 = vector.shape_cast %330 : vector<1x4x1x8xbf16> to vector<4x8xbf16>
    %c52_643 = arith.constant 52 : index
    %c48_644 = arith.constant 48 : index
    %332 = vector.load %arg6[%c52_643, %c48_644] : memref<64x64xbf16, #tpu.memory_space<vmem>>, vector<4x8xbf16>
    tpu.vector_store %arg6[%c52_643, %c48_644], %331 {strides = array<i32>} : memref<64x64xbf16, #tpu.memory_space<vmem>>, vector<4x8xbf16>,
    %c0_645 = arith.constant 0 : index
    %c12_646 = arith.constant 12 : index
    %c8_647 = arith.constant 8 : index
    %c0_648 = arith.constant 0 : index
    %333 = vector.load %arg1[%c0_645, %c12_646, %c8_647, %c0_648] : memref<1x16x9x9xbf16, #tpu.memory_space<vmem>>, vector<1x4x1x8xbf16>
    %334 = vector.shape_cast %333 : vector<1x4x1x8xbf16> to vector<4x8xbf16>
    %c52_649 = arith.constant 52 : index
    %c56_650 = arith.constant 56 : index
    %335 = vector.load %arg6[%c52_649, %c56_650] : memref<64x64xbf16, #tpu.memory_space<vmem>>, vector<4x8xbf16>
    tpu.vector_store %arg6[%c52_649, %c56_650], %334 {strides = array<i32>} : memref<64x64xbf16, #tpu.memory_space<vmem>>, vector<4x8xbf16>,
    %c0_651 = arith.constant 0 : index
    %c8_652 = arith.constant 8 : index
    %c1_653 = arith.constant 1 : index
    %c1_654 = arith.constant 1 : index
    %336 = vector.load %arg1[%c0_651, %c8_652, %c1_653, %c1_654] : memref<1x16x9x9xbf16, #tpu.memory_space<vmem>>, vector<1x4x1x8xbf16>
    %337 = vector.shape_cast %336 : vector<1x4x1x8xbf16> to vector<4x8xbf16>
    %c56_655 = arith.constant 56 : index
    %c0_656 = arith.constant 0 : index
    %338 = vector.load %arg6[%c56_655, %c0_656] : memref<64x64xbf16, #tpu.memory_space<vmem>>, vector<4x8xbf16>
    tpu.vector_store %arg6[%c56_655, %c0_656], %337 {strides = array<i32>} : memref<64x64xbf16, #tpu.memory_space<vmem>>, vector<4x8xbf16>,
    %c0_657 = arith.constant 0 : index
    %c8_658 = arith.constant 8 : index
    %c2_659 = arith.constant 2 : index
    %c1_660 = arith.constant 1 : index
    %339 = vector.load %arg1[%c0_657, %c8_658, %c2_659, %c1_660] : memref<1x16x9x9xbf16, #tpu.memory_space<vmem>>, vector<1x4x1x8xbf16>
    %340 = vector.shape_cast %339 : vector<1x4x1x8xbf16> to vector<4x8xbf16>
    %c56_661 = arith.constant 56 : index
    %c8_662 = arith.constant 8 : index
    %341 = vector.load %arg6[%c56_661, %c8_662] : memref<64x64xbf16, #tpu.memory_space<vmem>>, vector<4x8xbf16>
    tpu.vector_store %arg6[%c56_661, %c8_662], %340 {strides = array<i32>} : memref<64x64xbf16, #tpu.memory_space<vmem>>, vector<4x8xbf16>,
    %c0_663 = arith.constant 0 : index
    %c8_664 = arith.constant 8 : index
    %c3_665 = arith.constant 3 : index
    %c1_666 = arith.constant 1 : index
    %342 = vector.load %arg1[%c0_663, %c8_664, %c3_665, %c1_666] : memref<1x16x9x9xbf16, #tpu.memory_space<vmem>>, vector<1x4x1x8xbf16>
    %343 = vector.shape_cast %342 : vector<1x4x1x8xbf16> to vector<4x8xbf16>
    %c56_667 = arith.constant 56 : index
    %c16_668 = arith.constant 16 : index
    %344 = vector.load %arg6[%c56_667, %c16_668] : memref<64x64xbf16, #tpu.memory_space<vmem>>, vector<4x8xbf16>
    tpu.vector_store %arg6[%c56_667, %c16_668], %343 {strides = array<i32>} : memref<64x64xbf16, #tpu.memory_space<vmem>>, vector<4x8xbf16>,
    %c0_669 = arith.constant 0 : index
    %c8_670 = arith.constant 8 : index
    %c4_671 = arith.constant 4 : index
    %c1_672 = arith.constant 1 : index
    %345 = vector.load %arg1[%c0_669, %c8_670, %c4_671, %c1_672] : memref<1x16x9x9xbf16, #tpu.memory_space<vmem>>, vector<1x4x1x8xbf16>
    %346 = vector.shape_cast %345 : vector<1x4x1x8xbf16> to vector<4x8xbf16>
    %c56_673 = arith.constant 56 : index
    %c24_674 = arith.constant 24 : index
    %347 = vector.load %arg6[%c56_673, %c24_674] : memref<64x64xbf16, #tpu.memory_space<vmem>>, vector<4x8xbf16>
    tpu.vector_store %arg6[%c56_673, %c24_674], %346 {strides = array<i32>} : memref<64x64xbf16, #tpu.memory_space<vmem>>, vector<4x8xbf16>,
    %c0_675 = arith.constant 0 : index
    %c8_676 = arith.constant 8 : index
    %c5_677 = arith.constant 5 : index
    %c1_678 = arith.constant 1 : index
    %348 = vector.load %arg1[%c0_675, %c8_676, %c5_677, %c1_678] : memref<1x16x9x9xbf16, #tpu.memory_space<vmem>>, vector<1x4x1x8xbf16>
    %349 = vector.shape_cast %348 : vector<1x4x1x8xbf16> to vector<4x8xbf16>
    %c56_679 = arith.constant 56 : index
    %c32_680 = arith.constant 32 : index
    %350 = vector.load %arg6[%c56_679, %c32_680] : memref<64x64xbf16, #tpu.memory_space<vmem>>, vector<4x8xbf16>
    tpu.vector_store %arg6[%c56_679, %c32_680], %349 {strides = array<i32>} : memref<64x64xbf16, #tpu.memory_space<vmem>>, vector<4x8xbf16>,
    %c0_681 = arith.constant 0 : index
    %c8_682 = arith.constant 8 : index
    %c6_683 = arith.constant 6 : index
    %c1_684 = arith.constant 1 : index
    %351 = vector.load %arg1[%c0_681, %c8_682, %c6_683, %c1_684] : memref<1x16x9x9xbf16, #tpu.memory_space<vmem>>, vector<1x4x1x8xbf16>
    %352 = vector.shape_cast %351 : vector<1x4x1x8xbf16> to vector<4x8xbf16>
    %c56_685 = arith.constant 56 : index
    %c40_686 = arith.constant 40 : index
    %353 = vector.load %arg6[%c56_685, %c40_686] : memref<64x64xbf16, #tpu.memory_space<vmem>>, vector<4x8xbf16>
    tpu.vector_store %arg6[%c56_685, %c40_686], %352 {strides = array<i32>} : memref<64x64xbf16, #tpu.memory_space<vmem>>, vector<4x8xbf16>,
    %c0_687 = arith.constant 0 : index
    %c8_688 = arith.constant 8 : index
    %c7_689 = arith.constant 7 : index
    %c1_690 = arith.constant 1 : index
    %354 = vector.load %arg1[%c0_687, %c8_688, %c7_689, %c1_690] : memref<1x16x9x9xbf16, #tpu.memory_space<vmem>>, vector<1x4x1x8xbf16>
    %355 = vector.shape_cast %354 : vector<1x4x1x8xbf16> to vector<4x8xbf16>
    %c56_691 = arith.constant 56 : index
    %c48_692 = arith.constant 48 : index
    %356 = vector.load %arg6[%c56_691, %c48_692] : memref<64x64xbf16, #tpu.memory_space<vmem>>, vector<4x8xbf16>
    tpu.vector_store %arg6[%c56_691, %c48_692], %355 {strides = array<i32>} : memref<64x64xbf16, #tpu.memory_space<vmem>>, vector<4x8xbf16>,
    %c0_693 = arith.constant 0 : index
    %c8_694 = arith.constant 8 : index
    %c8_695 = arith.constant 8 : index
    %c1_696 = arith.constant 1 : index
    %357 = vector.load %arg1[%c0_693, %c8_694, %c8_695, %c1_696] : memref<1x16x9x9xbf16, #tpu.memory_space<vmem>>, vector<1x4x1x8xbf16>
    %358 = vector.shape_cast %357 : vector<1x4x1x8xbf16> to vector<4x8xbf16>
    %c56_697 = arith.constant 56 : index
    %c56_698 = arith.constant 56 : index
    %359 = vector.load %arg6[%c56_697, %c56_698] : memref<64x64xbf16, #tpu.memory_space<vmem>>, vector<4x8xbf16>
    tpu.vector_store %arg6[%c56_697, %c56_698], %358 {strides = array<i32>} : memref<64x64xbf16, #tpu.memory_space<vmem>>, vector<4x8xbf16>,
    %c0_699 = arith.constant 0 : index
    %c12_700 = arith.constant 12 : index
    %c1_701 = arith.constant 1 : index
    %c1_702 = arith.constant 1 : index
    %360 = vector.load %arg1[%c0_699, %c12_700, %c1_701, %c1_702] : memref<1x16x9x9xbf16, #tpu.memory_space<vmem>>, vector<1x4x1x8xbf16>
    %361 = vector.shape_cast %360 : vector<1x4x1x8xbf16> to vector<4x8xbf16>
    %c60 = arith.constant 60 : index
    %c0_703 = arith.constant 0 : index
    %362 = vector.load %arg6[%c60, %c0_703] : memref<64x64xbf16, #tpu.memory_space<vmem>>, vector<4x8xbf16>
    tpu.vector_store %arg6[%c60, %c0_703], %361 {strides = array<i32>} : memref<64x64xbf16, #tpu.memory_space<vmem>>, vector<4x8xbf16>,
    %c0_704 = arith.constant 0 : index
    %c12_705 = arith.constant 12 : index
    %c2_706 = arith.constant 2 : index
    %c1_707 = arith.constant 1 : index
    %363 = vector.load %arg1[%c0_704, %c12_705, %c2_706, %c1_707] : memref<1x16x9x9xbf16, #tpu.memory_space<vmem>>, vector<1x4x1x8xbf16>
    %364 = vector.shape_cast %363 : vector<1x4x1x8xbf16> to vector<4x8xbf16>
    %c60_708 = arith.constant 60 : index
    %c8_709 = arith.constant 8 : index
    %365 = vector.load %arg6[%c60_708, %c8_709] : memref<64x64xbf16, #tpu.memory_space<vmem>>, vector<4x8xbf16>
    tpu.vector_store %arg6[%c60_708, %c8_709], %364 {strides = array<i32>} : memref<64x64xbf16, #tpu.memory_space<vmem>>, vector<4x8xbf16>,
    %c0_710 = arith.constant 0 : index
    %c12_711 = arith.constant 12 : index
    %c3_712 = arith.constant 3 : index
    %c1_713 = arith.constant 1 : index
    %366 = vector.load %arg1[%c0_710, %c12_711, %c3_712, %c1_713] : memref<1x16x9x9xbf16, #tpu.memory_space<vmem>>, vector<1x4x1x8xbf16>
    %367 = vector.shape_cast %366 : vector<1x4x1x8xbf16> to vector<4x8xbf16>
    %c60_714 = arith.constant 60 : index
    %c16_715 = arith.constant 16 : index
    %368 = vector.load %arg6[%c60_714, %c16_715] : memref<64x64xbf16, #tpu.memory_space<vmem>>, vector<4x8xbf16>
    tpu.vector_store %arg6[%c60_714, %c16_715], %367 {strides = array<i32>} : memref<64x64xbf16, #tpu.memory_space<vmem>>, vector<4x8xbf16>,
    %c0_716 = arith.constant 0 : index
    %c12_717 = arith.constant 12 : index
    %c4_718 = arith.constant 4 : index
    %c1_719 = arith.constant 1 : index
    %369 = vector.load %arg1[%c0_716, %c12_717, %c4_718, %c1_719] : memref<1x16x9x9xbf16, #tpu.memory_space<vmem>>, vector<1x4x1x8xbf16>
    %370 = vector.shape_cast %369 : vector<1x4x1x8xbf16> to vector<4x8xbf16>
    %c60_720 = arith.constant 60 : index
    %c24_721 = arith.constant 24 : index
    %371 = vector.load %arg6[%c60_720, %c24_721] : memref<64x64xbf16, #tpu.memory_space<vmem>>, vector<4x8xbf16>
    tpu.vector_store %arg6[%c60_720, %c24_721], %370 {strides = array<i32>} : memref<64x64xbf16, #tpu.memory_space<vmem>>, vector<4x8xbf16>,
    %c0_722 = arith.constant 0 : index
    %c12_723 = arith.constant 12 : index
    %c5_724 = arith.constant 5 : index
    %c1_725 = arith.constant 1 : index
    %372 = vector.load %arg1[%c0_722, %c12_723, %c5_724, %c1_725] : memref<1x16x9x9xbf16, #tpu.memory_space<vmem>>, vector<1x4x1x8xbf16>
    %373 = vector.shape_cast %372 : vector<1x4x1x8xbf16> to vector<4x8xbf16>
    %c60_726 = arith.constant 60 : index
    %c32_727 = arith.constant 32 : index
    %374 = vector.load %arg6[%c60_726, %c32_727] : memref<64x64xbf16, #tpu.memory_space<vmem>>, vector<4x8xbf16>
    tpu.vector_store %arg6[%c60_726, %c32_727], %373 {strides = array<i32>} : memref<64x64xbf16, #tpu.memory_space<vmem>>, vector<4x8xbf16>,
    %c0_728 = arith.constant 0 : index
    %c12_729 = arith.constant 12 : index
    %c6_730 = arith.constant 6 : index
    %c1_731 = arith.constant 1 : index
    %375 = vector.load %arg1[%c0_728, %c12_729, %c6_730, %c1_731] : memref<1x16x9x9xbf16, #tpu.memory_space<vmem>>, vector<1x4x1x8xbf16>
    %376 = vector.shape_cast %375 : vector<1x4x1x8xbf16> to vector<4x8xbf16>
    %c60_732 = arith.constant 60 : index
    %c40_733 = arith.constant 40 : index
    %377 = vector.load %arg6[%c60_732, %c40_733] : memref<64x64xbf16, #tpu.memory_space<vmem>>, vector<4x8xbf16>
    tpu.vector_store %arg6[%c60_732, %c40_733], %376 {strides = array<i32>} : memref<64x64xbf16, #tpu.memory_space<vmem>>, vector<4x8xbf16>,
    %c0_734 = arith.constant 0 : index
    %c12_735 = arith.constant 12 : index
    %c7_736 = arith.constant 7 : index
    %c1_737 = arith.constant 1 : index
    %378 = vector.load %arg1[%c0_734, %c12_735, %c7_736, %c1_737] : memref<1x16x9x9xbf16, #tpu.memory_space<vmem>>, vector<1x4x1x8xbf16>
    %379 = vector.shape_cast %378 : vector<1x4x1x8xbf16> to vector<4x8xbf16>
    %c60_738 = arith.constant 60 : index
    %c48_739 = arith.constant 48 : index
    %380 = vector.load %arg6[%c60_738, %c48_739] : memref<64x64xbf16, #tpu.memory_space<vmem>>, vector<4x8xbf16>
    tpu.vector_store %arg6[%c60_738, %c48_739], %379 {strides = array<i32>} : memref<64x64xbf16, #tpu.memory_space<vmem>>, vector<4x8xbf16>,
    %c0_740 = arith.constant 0 : index
    %c12_741 = arith.constant 12 : index
    %c8_742 = arith.constant 8 : index
    %c1_743 = arith.constant 1 : index
    %381 = vector.load %arg1[%c0_740, %c12_741, %c8_742, %c1_743] : memref<1x16x9x9xbf16, #tpu.memory_space<vmem>>, vector<1x4x1x8xbf16>
    %382 = vector.shape_cast %381 : vector<1x4x1x8xbf16> to vector<4x8xbf16>
    %c60_744 = arith.constant 60 : index
    %c56_745 = arith.constant 56 : index
    %383 = vector.load %arg6[%c60_744, %c56_745] : memref<64x64xbf16, #tpu.memory_space<vmem>>, vector<4x8xbf16>
    tpu.vector_store %arg6[%c60_744, %c56_745], %382 {strides = array<i32>} : memref<64x64xbf16, #tpu.memory_space<vmem>>, vector<4x8xbf16>,
    %c0_746 = arith.constant 0 : index
    %c0_747 = arith.constant 0 : index
    %384 = vector.load %arg2[%c0_746, %c0_747] : memref<8x64xbf16, #tpu.memory_space<vmem>>, vector<8x64xbf16>
    %c0_748 = arith.constant 0 : index
    %c0_749 = arith.constant 0 : index
    %385 = vector.load %arg6[%c0_748, %c0_749] : memref<64x64xbf16, #tpu.memory_space<vmem>>, vector<64x64xbf16>
    %cst = arith.constant dense<0.000000e+00> : vector<8x64xf32>
    %386 = tpu.matmul %384, %385, %cst {dimension_numbers = #tpu.dot_dimension_numbers<[1], [0], [0], [1], [0, 0, 1, 1], [], []>} : vector<8x64xbf16>, vector<64x64xbf16>, vector<8x64xf32> -> vector<8x64xf32>
    %cst_750 = arith.constant dense<0.000000e+00> : vector<8xf32>
    %387 = vector.multi_reduction <add>, %386, %cst_750 [1] : vector<8x64xf32> to vector<8xf32>
    %388 = vector.shape_cast %387 : vector<8xf32> to vector<8x1xf32>
    %c0_751 = arith.constant 0 : index
    %c0_752 = arith.constant 0 : index
    %c0_753 = arith.constant 0 : index
    %389 = vector.load %arg4[%c0_751, %c0_752, %c0_753] : memref<1x8x1xf32, #tpu.memory_space<vmem>>, vector<1x8x1xf32>
    %390 = vector.shape_cast %389 : vector<1x8x1xf32> to vector<8x1xf32>
    %391 = vector.shape_cast %388 : vector<8x1xf32> to vector<1x8x1xf32>
    tpu.vector_store %arg4[%c0_751, %c0_752, %c0_753], %391 {strides = array<i32>} : memref<1x8x1xf32, #tpu.memory_space<vmem>>, vector<1x8x1xf32>,
    %392 = arith.mulf %386, %386 : vector<8x64xf32>
    %cst_754 = arith.constant dense<0.000000e+00> : vector<8xf32>
    %393 = vector.multi_reduction <add>, %392, %cst_754 [1] : vector<8x64xf32> to vector<8xf32>
    %394 = vector.shape_cast %393 : vector<8xf32> to vector<8x1xf32>
    %c0_755 = arith.constant 0 : index
    %c0_756 = arith.constant 0 : index
    %c0_757 = arith.constant 0 : index
    %395 = vector.load %arg5[%c0_755, %c0_756, %c0_757] : memref<1x8x1xf32, #tpu.memory_space<vmem>>, vector<1x8x1xf32>
    %396 = vector.shape_cast %395 : vector<1x8x1xf32> to vector<8x1xf32>
    %397 = vector.shape_cast %394 : vector<8x1xf32> to vector<1x8x1xf32>
    tpu.vector_store %arg5[%c0_755, %c0_756, %c0_757], %397 {strides = array<i32>} : memref<1x8x1xf32, #tpu.memory_space<vmem>>, vector<1x8x1xf32>,
    %398 = arith.truncf %386 : vector<8x64xf32> to vector<8x64xbf16>
    %c0_758 = arith.constant 0 : index
    %c0_759 = arith.constant 0 : index
    %c0_760 = arith.constant 0 : index
    %399 = vector.load %arg3[%c0_758, %c0_759, %c0_760] : memref<1x8x64xbf16, #tpu.memory_space<vmem>>, vector<1x8x64xbf16>
    %400 = vector.shape_cast %399 : vector<1x8x64xbf16> to vector<8x64xbf16>
    %401 = vector.shape_cast %398 : vector<8x64xbf16> to vector<1x8x64xbf16>
    tpu.vector_store %arg3[%c0_758, %c0_759, %c0_760], %401 {strides = array<i32>} : memref<1x8x64xbf16, #tpu.memory_space<vmem>>, vector<1x8x64xbf16>,
    return
  }
  func.func @transform_0(%arg0: i32) -> (i32, i32, i32, i32) {
    %c0_i32 = arith.constant 0 : i32
    %c0_i32_0 = arith.constant 0 : i32
    %c0_i32_1 = arith.constant 0 : i32
    %c0_i32_2 = arith.constant 0 : i32
    return %arg0, %c0_i32, %c0_i32_0, %c0_i32_1 : i32, i32, i32, i32
  }
  func.func @transform_1(%arg0: i32) -> (i32, i32) {
    %c0_i32 = arith.constant 0 : i32
    %c0_i32_0 = arith.constant 0 : i32
    %c0_i32_1 = arith.constant 0 : i32
    return %c0_i32, %c0_i32_0 : i32, i32
  }
  func.func @transform_2(%arg0: i32) -> (i32, i32, i32) {
    %c0_i32 = arith.constant 0 : i32
    %c0_i32_0 = arith.constant 0 : i32
    %c0_i32_1 = arith.constant 0 : i32
    return %arg0, %c0_i32, %c0_i32_0 : i32, i32, i32
  }
  func.func @transform_3(%arg0: i32) -> (i32, i32, i32) {
    %c0_i32 = arith.constant 0 : i32
    %c0_i32_0 = arith.constant 0 : i32
    %c0_i32_1 = arith.constant 0 : i32
    return %arg0, %c0_i32, %c0_i32_0 : i32, i32, i32
  }
  func.func @transform_4(%arg0: i32) -> (i32, i32, i32) {
    %c0_i32 = arith.constant 0 : i32
    %c0_i32_0 = arith.constant 0 : i32
    %c0_i32_1 = arith.constant 0 : i32
    return %arg0, %c0_i32, %c0_i32_0 : i32, i32, i32
  }
}

</mosaic_0001>

<bundles_post_ra>
// kernel: tpu_custom_call.1
= control target key start
LH: loop header
LB: loop body
LE: loop exit
PB: predicated region body
PF: predicated region fallthrough
CT: control target
= control target key end

     0   :  { %10 = vsyncpa [#allocation4], 0  ;;  %s7438_s0 = inlined_call_operand.vmem [shape: bf16[2,16,9,9], index: 0, kind: input, shape index: {}]   ;;  %s7439_s1 = inlined_call_operand.vmem [shape: bf16[8,64], index: 1, kind: input, shape index: {}]   ;;  %s7440_s2 = inlined_call_operand.hbm [shape: bf16[2,8,64], index: 2, kind: output, shape index: {0}]   ;;  %s7441_s3 = inlined_call_operand.vmem [shape: f32[2,8,1], index: 3, kind: output, shape index: {1}]   ;;  %s7442_s4 = inlined_call_operand.vmem [shape: f32[2,8,1], index: 4, kind: output, shape index: {2}]  }
   0x1   :  { %12 = vsyncpa [#allocation4 + $0x1], 0  ;;  %s6075_s15 = smov 0   ;;  %s6077_s16 = smov 0  }
   0x2   :  { %s6079_s17 = smov 0   ;;  %s6081_s18 = smov 0  }
   0x3 LB: > { %s6096_s19 = sadd.s32 4294967295, %s6030_s18   ;;  %s4472_s20 = sadd.s32 4294967294, %s6030_s18   ;;  %s6030_s18 = sphi %s6081_s18, %s7541_s18   ;;  %s6026_s17 = sphi %s6079_s17, %s7540_s17   ;;  %s6022_s16 = sphi %s6077_s16, %s7539_s16   ;;  %s6018_s15 = sphi %s6075_s15, %s7538_s15  }
   0x4   : > { %s6100_s21 = sadd.s32 1, %s6030_s18   ;;  %s72_s22 = sadd.s32 1, %s6026_s17 }
   0x5   : > { %s69_s23 = ssub.s32 %s6030_s18, %s6100_s21  ;;  %p82_p0 = scmp.ne.s32.totalorder %s6026_s17, %s6022_s16 }
   0x6   : > { %p70_p1 = scmp.eq.s32.totalorder %s69_s23, 0  ;;  %p83_p2 = scmp.eq.s32.totalorder %s6096_s19, 1 }
   0x7   : > { %p88_p3 = scmp.ne.s32.totalorder %s6022_s16, %s6018_s15  ;;  %p89_p4 = scmp.eq.s32.totalorder %s4472_s20, 1 }
   0x8   : > { %s6111_s24 = scalar_select %p70_p1, %s6026_s17, %s72_s22  }
   0x9   : > { %p6113_p5 = por %p83_p2, %p82_p0  ;;  %p6117_p6 = por %p89_p4, %p88_p3 }
   0xa   : > { %p4475_p7 = scmp.ge.s32.totalorder %s6030_s18, 1  ;;  %p170_p8 = scmp.lt.s32.totalorder %s6030_s18, 3 }
   0xc   : > { %p171_p9 = pnand %p4475_p7, %p170_p8 }
   0xd   : > { %p204_p10 = scmp.lt.s32.totalorder (!%p171_p9), %s6096_s19, 1  ;;  %vm239_vm0 = vcmask (!%p171_p9), 1041409   ;;  %vm242_vm1 = vcmask (!%p171_p9), 1042434   ;;  %vm245_vm2 = vcmask (!%p171_p9), 1043459   ;;  %vm502_vm3 = vcmask (!%p171_p9), 1045509   ;;  %s6032_s6 = smov (!%p171_p9), 127  }
   0xe   : > { %174 = sbr.rel (%p171_p9) target bundleno = 977 (0x3d1), region = 28  ;;  %vm505_vm4 = vcmask (!%p171_p9), 1046534   ;;  %vm508_vm5 = vcmask (!%p171_p9), 1047559   ;;  %s6033_s7 = smov (!%p171_p9), 8   ;;  %vm7444_vm6 = vcmask (!%p171_p9), 62468   ;;  %vm7443_vm7 = vcmask (!%p171_p9), 64518  }
   0xf   : > { %s6034_s8 = smov (!%p171_p9), 7   ;;  %s6035_s9 = smov (!%p171_p9), 16   ;;  %vm7450_vm8 = vcmask (!%p171_p9), 128068   ;;  %vm7449_vm9 = vcmask (!%p171_p9), 130118   ;;  %vm7464_vm10 = vcmask (!%p171_p9), 193668   ;;  %vm7461_vm11 = vcmask (!%p171_p9), 195718  }
  0x10   : > { %s6036_s10 = smov (!%p171_p9), 15   ;;  %s6037_s11 = smov (!%p171_p9), 24   ;;  %vm7457_vm12 = vcmask (!%p171_p9), 259268   ;;  %vm7453_vm13 = vcmask (!%p171_p9), 261318   ;;  %vm7448_vm14 = vcmask (!%p171_p9), 324868   ;;  %vm7447_vm15 = vcmask (!%p171_p9), 326918  }
  0x11   : > { %s6038_s12 = smov (!%p171_p9), 23   ;;  %s6039_s13 = smov (!%p171_p9), 32  }
  0x12   : > { %s6040_s14 = smov (!%p171_p9), 31   ;;  %s6041_s20 = smov (!%p171_p9), 40  }
  0x13   : > { %s6042_s22 = smov (!%p171_p9), 39   ;;  %s6043_s23 = smov (!%p171_p9), 48  }
  0x14   : > { %s6045_s29 = smov (!%p171_p9), 56   ;;  %s6046_s30 = smov (!%p171_p9), 55  }
  0x15   : > { %s6125_s27 = scalar_select %p204_p10, %s6096_s19, 1 }
  0x17   : > { %s5382_s28 = sshll.u32 %s6125_s27, 7 }
  0x18   : > { %s6131_s5 = scalar_lea.vmem %s7438_s0, %s5382_s28  ;;  %s6044_s28 = smov 47  }
  0x19   : > { %v5456_v0 = vld [vmem:[%s6131_s5] ss:$0 sps:$4 sm:$0x11]   ;;  %v5457_v1 = vld [vmem:[%s6131_s5 + $0x8] ss:$0 sps:$4 sm:$0x11]  }
  0x1a   : > { %v5458_v2 = vld [vmem:[%s6131_s5 + $0x10] ss:$0 sps:$4 sm:$0x11]   ;;  %v5459_v3 = vld [vmem:[%s6131_s5 + $0x18] ss:$0 sps:$4 sm:$0x11]   ;;  %v757_v4 = vunpack.c.h.b16 %v5456_v0  ;;  %v758_v5 = vunpack.c.h.b16 %v5457_v1 }
  0x1b   : > { %v759_v6 = vunpack.c.h.b16 %v5458_v2  ;;  %v760_v7 = vunpack.c.h.b16 %v5459_v3  ;;  %v5460_v8 = vld [vmem:[%s6131_s5] ss:$0 sps:$4 sm:$0x11]   ;;  %v5461_v9 = vld [vmem:[%s6131_s5 + $0x8] ss:$0 sps:$4 sm:$0x11]  }
  0x1c   : > { %v761_v10 = vrot.slane %v758_v5, 7  ;;  %v5462_v12 = vld [vmem:[%s6131_s5 + $0x10] ss:$0 sps:$4 sm:$0x11]   ;;  %v267_v15 = vunpack.c.l.b16 %v5460_v8  ;;  %v268_v16 = vunpack.c.l.b16 %v5461_v9 }
  0x1d   : > { %v763_v11 = vrot.slane %v759_v6, 6  ;;  %v765_v13 = vrot.slane %v760_v7, 5  ;;  %v5463_v14 = vld [vmem:[%s6131_s5 + $0x18] ss:$0 sps:$4 sm:$0x11]   ;;  %v269_v18 = vunpack.c.l.b16 %v5462_v12 }
  0x1e   : > { %v762_v17 = vsel %vm239_vm0, %v761_v10, %v757_v4  ;;  %v270_v20 = vunpack.c.l.b16 %v5463_v14  ;;  %v271_v21 = vrot.slane %v267_v15, 1  ;;  %v5464_v22 = vld [vmem:[%s6131_s5 + $0x20] ss:$0 sps:$4 sm:$0x11]  }
  0x1f   : > { %v764_v19 = vsel %vm242_vm1, %v763_v11, %v762_v17  ;;  %v273_v24 = vrot.slane %v269_v18, 7  ;;  %v5465_v25 = vld [vmem:[%s6131_s5 + $0x28] ss:$0 sps:$4 sm:$0x11]   ;;  %v1017_v30 = vunpack.c.l.b16 %v5464_v22 }
  0x20   : > { %v766_v23 = vsel %vm245_vm2, %v765_v13, %v764_v19  ;;  %v272_v27 = vsel %vm239_vm0, %v268_v16, %v271_v21  ;;  %v275_v28 = vrot.slane %v270_v20, 6  ;;  %v5466_v29 = vld [vmem:[%s6131_s5 + $0x30] ss:$0 sps:$4 sm:$0x11]   ;;  %v1018_v33 = vunpack.c.l.b16 %v5465_v25 }
  0x21   : > { %v767_v26 = vpack.c.b16 %v766_v23, %v766_v23  ;;  %v274_v31 = vsel %vm242_vm1, %v273_v24, %v272_v27  ;;  %v5467_v32 = vld [vmem:[%s6131_s5 + $0x38] ss:$0 sps:$4 sm:$0x11]   ;;  %v1019_v35 = vunpack.c.l.b16 %v5466_v29  ;;  %v1021_v36 = vrot.slane %v1017_v30, 4 }
  0x22   : > { %v276_v34 = vsel %vm245_vm2, %v275_v28, %v274_v31  ;;  %v5468_v37 = vld [vmem:[%s6131_s5 + $0x20] ss:$0 sps:$4 sm:$0x11]   ;;  %v1020_v39 = vunpack.c.l.b16 %v5467_v32  ;;  %v1022_v40 = vrot.slane %v1018_v33, 3 }
  0x23   : > { %768 = vrot.lane.b32.xlu0 %v767_v26, %s6032_s6  ;;  %v277_v38 = vpack.c.b16 %v276_v34, %v276_v34  ;;  %v5469_v41 = vld [vmem:[%s6131_s5 + $0x28] ss:$0 sps:$4 sm:$0x11]   ;;  %v1024_v42 = vrot.slane %v1019_v35, 2  ;;  %v530_v44 = vunpack.c.l.b16 %v5468_v37 }
  0x24   : > { %v5470_v43 = vld [vmem:[%s6131_s5 + $0x30] ss:$0 sps:$4 sm:$0x11]   ;;  %v1023_v45 = vsel %vm502_vm3, %v1022_v40, %v1021_v36  ;;  %v1026_v46 = vrot.slane %v1020_v39, 1  ;;  %v531_v48 = vunpack.c.l.b16 %v5469_v41 }
  0x25   : > { %278 = vrot.lane.b32.xlu1 %v277_v38, %s6033_s7  ;;  %v5471_v47 = vld [vmem:[%s6131_s5 + $0x38] ss:$0 sps:$4 sm:$0x11]   ;;  %v1025_v49 = vsel %vm505_vm4, %v1024_v42, %v1023_v45  ;;  %v532_v50 = vunpack.c.l.b16 %v5470_v43  ;;  %v534_v51 = vrot.slane %v530_v44, 5 }
  0x26   : > { %v5472_v52 = vld [vmem:[%s6131_s5] ss:$0 sps:$4 sm:$0x11]   ;;  %v1027_v53 = vsel %vm508_vm5, %v1026_v46, %v1025_v49  ;;  %v533_v54 = vunpack.c.l.b16 %v5471_v47  ;;  %v535_v55 = vrot.slane %v531_v48, 4 }
  0x27   : > { %v5473_v56 = vld [vmem:[%s6131_s5 + $0x8] ss:$0 sps:$4 sm:$0x11]   ;;  %v1028_v57 = vpack.c.b16 %v1027_v53, %v1027_v53  ;;  %v537_v58 = vrot.slane %v532_v50, 3  ;;  %v789_v60 = vunpack.c.l.b16 %v5472_v52 }
  0x28   : > { %v5474_v59 = vld [vmem:[%s6131_s5 + $0x10] ss:$0 sps:$4 sm:$0x11]   ;;  %v536_v61 = vsel %vm502_vm3, %v535_v55, %v534_v51  ;;  %v539_v62 = vrot.slane %v533_v54, 2  ;;  %v790_v0 = vunpack.c.l.b16 %v5473_v56 }
  0x29   : > { %v5475_v63 = vld [vmem:[%s6131_s5 + $0x18] ss:$0 sps:$4 sm:$0x11]   ;;  %1029 = vrot.lane.b32.xlu0 %v1028_v57, %s6032_s6  ;;  %v538_v1 = vsel %vm505_vm4, %v537_v58, %v536_v61  ;;  %v791_v2 = vunpack.c.l.b16 %v5474_v59  ;;  %v793_v3 = vrot.slane %v789_v60, 1 }
  0x2a   : > { %v5476_v4 = vld [vmem:[%s6131_s5 + $0x20] ss:$0 sps:$4 sm:$0x11]   ;;  %v540_v5 = vsel %vm508_vm5, %v539_v62, %v538_v1  ;;  %v792_v6 = vunpack.c.l.b16 %v5475_v63  ;;  %v5477_v7 = vld [vmem:[%s6131_s5 + $0x28] ss:$0 sps:$4 sm:$0x11]  }
  0x2b   : > { %v5478_v8 = vld [vmem:[%s6131_s5 + $0x30] ss:$0 sps:$4 sm:$0x11]   ;;  %v541_v9 = vpack.c.b16 %v540_v5, %v540_v5  ;;  %v794_v10 = vsel %vm239_vm0, %v790_v0, %v793_v3  ;;  %v795_v11 = vrot.slane %v791_v2, 7  ;;  %v1050_v13 = vunpack.c.l.b16 %v5476_v4 }
  0x2c   : > { %v5479_v12 = vld [vmem:[%s6131_s5 + $0x38] ss:$0 sps:$4 sm:$0x11]   ;;  %v797_v14 = vrot.slane %v792_v6, 6  ;;  %v1051_v15 = vunpack.c.l.b16 %v5477_v7  ;;  %v1052_v16 = vunpack.c.l.b16 %v5478_v8 }
  0x2d   : > { %542 = vrot.lane.b32.xlu1 %v541_v9, %s6033_s7  ;;  %v796_v17 = vsel %vm242_vm1, %v795_v11, %v794_v10  ;;  %v1053_v18 = vunpack.c.l.b16 %v5479_v12  ;;  %v1054_v19 = vrot.slane %v1050_v13, 5  ;;  %v5480_v20 = vld [vmem:[%s6131_s5] ss:$0 sps:$4 sm:$0x22]  }
  0x2e   : > { %v798_v21 = vsel %vm245_vm2, %v797_v14, %v796_v17  ;;  %v1055_v22 = vrot.slane %v1051_v15, 4  ;;  %v1057_v23 = vrot.slane %v1052_v16, 3  ;;  %v5481_v24 = vld [vmem:[%s6131_s5 + $0x8] ss:$0 sps:$4 sm:$0x22]   ;;  %v299_v28 = vunpack.c.l.b16 %v5480_v20 }
  0x2f   : > { %v799_v25 = vpack.c.b16 %v798_v21, %v798_v21  ;;  %v1059_v26 = vrot.slane %v1053_v18, 2  ;;  %v5482_v27 = vld [vmem:[%s6131_s5 + $0x10] ss:$0 sps:$4 sm:$0x22]   ;;  %v300_v31 = vunpack.c.l.b16 %v5481_v24 }
  0x30   : > { %v1056_v29 = vsel %vm502_vm3, %v1055_v22, %v1054_v19  ;;  %v5483_v30 = vld [vmem:[%s6131_s5 + $0x18] ss:$0 sps:$4 sm:$0x22]   ;;  %v301_v33 = vunpack.c.l.b16 %v5482_v27  ;;  %v303_v34 = vrot.slane %v299_v28, 2 }
  0x31   : > { %800 = vrot.lane.b32.xlu0 %v799_v25, %s6034_s8  ;;  %v1058_v32 = vsel %vm505_vm4, %v1057_v23, %v1056_v29  ;;  %v5484_v35 = vld [vmem:[%s6131_s5 + $0x20] ss:$0 sps:$4 sm:$0x22]   ;;  %v302_v37 = vunpack.c.l.b16 %v5483_v30  ;;  %v304_v38 = vrot.slane %v300_v31, 1 }
  0x32   : > { %v1060_v36 = vsel %vm508_vm5, %v1059_v26, %v1058_v32  ;;  %v5485_v39 = vld [vmem:[%s6131_s5 + $0x28] ss:$0 sps:$4 sm:$0x22]   ;;  %v5486_v41 = vld [vmem:[%s6131_s5 + $0x30] ss:$0 sps:$4 sm:$0x22]   ;;  %v563_v43 = vunpack.c.l.b16 %v5484_v35 }
  0x33   : > { %v1061_v40 = vpack.c.b16 %v1060_v36, %v1060_v36  ;;  %v5487_v42 = vld [vmem:[%s6131_s5 + $0x38] ss:$0 sps:$4 sm:$0x22]   ;;  %v305_v44 = vsel %vm239_vm0, %v304_v38, %v303_v34  ;;  %v307_v45 = vrot.slane %v302_v37, 7  ;;  %v564_v46 = vunpack.c.l.b16 %v5485_v39 }
  0x34   : > { %v306_v47 = vsel %vm242_vm1, %v301_v33, %v305_v44  ;;  %v565_v48 = vunpack.c.l.b16 %v5486_v41  ;;  %v566_v49 = vunpack.c.l.b16 %v5487_v42  ;;  %v567_v50 = vrot.slane %v563_v43, 6  ;;  %v5488_v51 = vld [vmem:[%s6131_s5] ss:$0 sps:$4 sm:$0x22]  }
  0x35   : > { %1062 = vrot.lane.b32.xlu1 %v1061_v40, %s6034_s8  ;;  %v308_v52 = vsel %vm245_vm2, %v307_v45, %v306_v47  ;;  %v568_v53 = vrot.slane %v564_v46, 5  ;;  %v5489_v54 = vld [vmem:[%s6131_s5 + $0x8] ss:$0 sps:$4 sm:$0x22]   ;;  %v821_v59 = vunpack.c.l.b16 %v5488_v51 }
  0x36   : > { %v309_v55 = vpack.c.b16 %v308_v52, %v308_v52  ;;  %v570_v56 = vrot.slane %v565_v48, 4  ;;  %v572_v57 = vrot.slane %v566_v49, 3  ;;  %v5490_v58 = vld [vmem:[%s6131_s5 + $0x10] ss:$0 sps:$4 sm:$0x22]   ;;  %v822_v62 = vunpack.c.l.b16 %v5489_v54 }
  0x37   : > { %v569_v60 = vsel %vm502_vm3, %v568_v53, %v567_v50  ;;  %v5491_v61 = vld [vmem:[%s6131_s5 + $0x18] ss:$0 sps:$4 sm:$0x22]   ;;  %v823_v0 = vunpack.c.l.b16 %v5490_v58  ;;  %v825_v1 = vrot.slane %v821_v59, 2 }
  0x38   : > { %310 = vrot.lane.b32.xlu0 %v309_v55, %s6035_s9  ;;  %v571_v63 = vsel %vm505_vm4, %v570_v56, %v569_v60  ;;  %v824_v3 = vunpack.c.l.b16 %v5491_v61  ;;  %v826_v4 = vrot.slane %v822_v62, 1  ;;  %v5492_v5 = vld [vmem:[%s6131_s5 + $0x20] ss:$0 sps:$4 sm:$0x22]  }
  0x39   : > { %v573_v2 = vsel %vm508_vm5, %v572_v57, %v571_v63  ;;  %v5493_v7 = vld [vmem:[%s6131_s5 + $0x28] ss:$0 sps:$4 sm:$0x22]   ;;  %v5494_v8 = vld [vmem:[%s6131_s5 + $0x30] ss:$0 sps:$4 sm:$0x22]   ;;  %v1083_v12 = vunpack.c.l.b16 %v5492_v5 }
  0x3a   : > { %v574_v6 = vpack.c.b16 %v573_v2, %v573_v2  ;;  %v827_v9 = vsel %vm239_vm0, %v826_v4, %v825_v1  ;;  %v829_v10 = vrot.slane %v824_v3, 7  ;;  %v5495_v11 = vld [vmem:[%s6131_s5 + $0x38] ss:$0 sps:$4 sm:$0x22]   ;;  %v1084_v14 = vunpack.c.l.b16 %v5493_v7 }
  0x3b   : > { %v828_v13 = vsel %vm242_vm1, %v823_v0, %v827_v9  ;;  %v1085_v15 = vunpack.c.l.b16 %v5494_v8  ;;  %v1086_v17 = vunpack.c.l.b16 %v5495_v11  ;;  %v1087_v18 = vrot.slane %v1083_v12, 6  ;;  %v5496_v19 = vld [vmem:[%s6131_s5] ss:$0 sps:$4 sm:$0x22]  }
  0x3c   : > { %575 = vrot.lane.b32.xlu1 %v574_v6, %s6035_s9  ;;  %v830_v16 = vsel %vm245_vm2, %v829_v10, %v828_v13  ;;  %v1088_v21 = vrot.slane %v1084_v14, 5  ;;  %v5497_v23 = vld [vmem:[%s6131_s5 + $0x8] ss:$0 sps:$4 sm:$0x22]   ;;  %v331_v26 = vunpack.c.l.b16 %v5496_v19 }
  0x3d   : > { %v831_v20 = vpack.c.b16 %v830_v16, %v830_v16  ;;  %v1090_v22 = vrot.slane %v1085_v15, 4  ;;  %v1092_v24 = vrot.slane %v1086_v17, 3  ;;  %v5498_v25 = vld [vmem:[%s6131_s5 + $0x10] ss:$0 sps:$4 sm:$0x22]   ;;  %v332_v29 = vunpack.c.l.b16 %v5497_v23 }
  0x3e   : > { %v1089_v27 = vsel %vm502_vm3, %v1088_v21, %v1087_v18  ;;  %v5499_v28 = vld [vmem:[%s6131_s5 + $0x18] ss:$0 sps:$4 sm:$0x22]   ;;  %v333_v31 = vunpack.c.l.b16 %v5498_v25  ;;  %v335_v32 = vrot.slane %v331_v26, 3 }
  0x3f   : > { %832 = vrot.lane.b32.xlu0 %v831_v20, %s6036_s10  ;;  %v1091_v30 = vsel %vm505_vm4, %v1090_v22, %v1089_v27  ;;  %v5500_v33 = vld [vmem:[%s6131_s5 + $0x20] ss:$0 sps:$4 sm:$0x22]   ;;  %v334_v35 = vunpack.c.l.b16 %v5499_v28  ;;  %v336_v36 = vrot.slane %v332_v29, 2 }
  0x40   : > { %v1093_v34 = vsel %vm508_vm5, %v1092_v24, %v1091_v30  ;;  %v5501_v37 = vld [vmem:[%s6131_s5 + $0x28] ss:$0 sps:$4 sm:$0x22]   ;;  %v338_v39 = vrot.slane %v333_v31, 1  ;;  %v596_v41 = vunpack.c.l.b16 %v5500_v33 }
  0x41   : > { %v1094_v38 = vpack.c.b16 %v1093_v34, %v1093_v34  ;;  %v5502_v40 = vld [vmem:[%s6131_s5 + $0x30] ss:$0 sps:$4 sm:$0x22]   ;;  %v337_v42 = vsel %vm239_vm0, %v336_v36, %v335_v32  ;;  %v5503_v43 = vld [vmem:[%s6131_s5 + $0x38] ss:$0 sps:$4 sm:$0x22]   ;;  %v597_v44 = vunpack.c.l.b16 %v5501_v37 }
  0x42   : > { %v339_v45 = vsel %vm242_vm1, %v338_v39, %v337_v42  ;;  %v598_v46 = vunpack.c.l.b16 %v5502_v40  ;;  %v600_v47 = vrot.slane %v596_v41, 7  ;;  %v5504_v48 = vld [vmem:[%s6131_s5] ss:$0 sps:$4 sm:$0x22]   ;;  %v599_v50 = vunpack.c.l.b16 %v5503_v43 }
  0x43   : > { %1095 = vrot.lane.b32.xlu1 %v1094_v38, %s6036_s10  ;;  %v340_v49 = vsel %vm245_vm2, %v334_v35, %v339_v45  ;;  %v601_v51 = vrot.slane %v597_v44, 6  ;;  %v5505_v52 = vld [vmem:[%s6131_s5 + $0x8] ss:$0 sps:$4 sm:$0x22]   ;;  %v853_v56 = vunpack.c.l.b16 %v5504_v48 }
  0x44   : > { %v341_v53 = vpack.c.b16 %v340_v49, %v340_v49  ;;  %v603_v54 = vrot.slane %v598_v46, 5  ;;  %v5506_v55 = vld [vmem:[%s6131_s5 + $0x10] ss:$0 sps:$4 sm:$0x22]   ;;  %v605_v58 = vrot.slane %v599_v50, 4  ;;  %v854_v60 = vunpack.c.l.b16 %v5505_v52 }
  0x45   : > { %v602_v57 = vsel %vm502_vm3, %v601_v51, %v600_v47  ;;  %v5507_v59 = vld [vmem:[%s6131_s5 + $0x18] ss:$0 sps:$4 sm:$0x22]   ;;  %v855_v62 = vunpack.c.l.b16 %v5506_v55  ;;  %v857_v63 = vrot.slane %v853_v56, 3 }
  0x46   : > { %342 = vrot.lane.b32.xlu0 %v341_v53, %s6037_s11  ;;  %v604_v61 = vsel %vm505_vm4, %v603_v54, %v602_v57  ;;  %v5508_v0 = vld [vmem:[%s6131_s5 + $0x20] ss:$0 sps:$4 sm:$0x22]   ;;  %v856_v2 = vunpack.c.l.b16 %v5507_v59  ;;  %v858_v3 = vrot.slane %v854_v60, 2 }
  0x47   : > { %v606_v1 = vsel %vm508_vm5, %v605_v58, %v604_v61  ;;  %v5509_v4 = vld [vmem:[%s6131_s5 + $0x28] ss:$0 sps:$4 sm:$0x22]   ;;  %v860_v6 = vrot.slane %v855_v62, 1  ;;  %v1116_v8 = vunpack.c.l.b16 %v5508_v0 }
  0x48   : > { %v607_v5 = vpack.c.b16 %v606_v1, %v606_v1  ;;  %v5510_v7 = vld [vmem:[%s6131_s5 + $0x30] ss:$0 sps:$4 sm:$0x22]   ;;  %v859_v9 = vsel %vm239_vm0, %v858_v3, %v857_v63  ;;  %v5511_v10 = vld [vmem:[%s6131_s5 + $0x38] ss:$0 sps:$4 sm:$0x22]   ;;  %v1117_v11 = vunpack.c.l.b16 %v5509_v4 }
  0x49   : > { %v861_v12 = vsel %vm242_vm1, %v860_v6, %v859_v9  ;;  %v1118_v13 = vunpack.c.l.b16 %v5510_v7  ;;  %v1120_v14 = vrot.slane %v1116_v8, 7  ;;  %v5512_v15 = vld [vmem:[%s6131_s5] ss:$0 sps:$4 sm:$0x44]   ;;  %v1119_v17 = vunpack.c.l.b16 %v5511_v10 }
  0x4a   : > { %608 = vrot.lane.b32.xlu1 %v607_v5, %s6037_s11  ;;  %v862_v16 = vsel %vm245_vm2, %v856_v2, %v861_v12  ;;  %v1121_v18 = vrot.slane %v1117_v11, 6  ;;  %v5513_v19 = vld [vmem:[%s6131_s5 + $0x8] ss:$0 sps:$4 sm:$0x44]   ;;  %v363_v23 = vunpack.c.l.b16 %v5512_v15 }
  0x4b   : > { %v863_v20 = vpack.c.b16 %v862_v16, %v862_v16  ;;  %v1123_v21 = vrot.slane %v1118_v13, 5  ;;  %v5514_v22 = vld [vmem:[%s6131_s5 + $0x10] ss:$0 sps:$4 sm:$0x44]   ;;  %v1125_v25 = vrot.slane %v1119_v17, 4  ;;  %v364_v27 = vunpack.c.l.b16 %v5513_v19 }
  0x4c   : > { %v1122_v24 = vsel %vm502_vm3, %v1121_v18, %v1120_v14  ;;  %v5515_v26 = vld [vmem:[%s6131_s5 + $0x18] ss:$0 sps:$4 sm:$0x44]   ;;  %v365_v29 = vunpack.c.l.b16 %v5514_v22  ;;  %v367_v30 = vrot.slane %v363_v23, 4 }
  0x4d   : > { %864 = vrot.lane.b32.xlu0 %v863_v20, %s6038_s12  ;;  %v1124_v28 = vsel %vm505_vm4, %v1123_v21, %v1122_v24  ;;  %v5516_v31 = vld [vmem:[%s6131_s5 + $0x20] ss:$0 sps:$4 sm:$0x44]   ;;  %v366_v33 = vunpack.c.l.b16 %v5515_v26  ;;  %v368_v34 = vrot.slane %v364_v27, 3 }
  0x4e   : > { %v1126_v32 = vsel %vm508_vm5, %v1125_v25, %v1124_v28  ;;  %v5517_v35 = vld [vmem:[%s6131_s5 + $0x28] ss:$0 sps:$4 sm:$0x44]   ;;  %v370_v37 = vrot.slane %v365_v29, 2  ;;  %v629_v42 = vunpack.c.l.b16 %v5516_v31 }
  0x4f   : > { %v1127_v36 = vpack.c.b16 %v1126_v32, %v1126_v32  ;;  %v5518_v38 = vld [vmem:[%s6131_s5 + $0x30] ss:$0 sps:$4 sm:$0x44]   ;;  %v369_v39 = vsel %vm239_vm0, %v368_v34, %v367_v30  ;;  %v372_v40 = vrot.slane %v366_v33, 1  ;;  %v630_v43 = vunpack.c.l.b16 %v5517_v35 }
  0x50   : > { %v5519_v41 = vld [vmem:[%s6131_s5 + $0x38] ss:$0 sps:$4 sm:$0x44]   ;;  %v371_v44 = vsel %vm242_vm1, %v370_v37, %v369_v39  ;;  %v631_v45 = vunpack.c.l.b16 %v5518_v38  ;;  %v5520_v46 = vld [vmem:[%s6131_s5] ss:$0 sps:$4 sm:$0x44]  }
  0x51   : > { %1128 = vrot.lane.b32.xlu1 %v1127_v36, %s6038_s12  ;;  %v5521_v47 = vld [vmem:[%s6131_s5 + $0x8] ss:$0 sps:$4 sm:$0x44]   ;;  %v373_v48 = vsel %vm245_vm2, %v372_v40, %v371_v44  ;;  %v632_v49 = vunpack.c.l.b16 %v5519_v41  ;;  %v633_v50 = vrot.slane %v630_v43, 7  ;;  %v885_v55 = vunpack.c.l.b16 %v5520_v46 }
  0x52   : > { %v5522_v51 = vld [vmem:[%s6131_s5 + $0x10] ss:$0 sps:$4 sm:$0x44]   ;;  %v374_v52 = vpack.c.b16 %v373_v48, %v373_v48  ;;  %v635_v53 = vrot.slane %v631_v45, 6  ;;  %v886_v56 = vunpack.c.l.b16 %v5521_v47 }
  0x53   : > { %v5523_v54 = vld [vmem:[%s6131_s5 + $0x18] ss:$0 sps:$4 sm:$0x44]   ;;  %v634_v57 = vsel %vm502_vm3, %v633_v50, %v629_v42  ;;  %v637_v58 = vrot.slane %v632_v49, 5  ;;  %v887_v59 = vunpack.c.l.b16 %v5522_v51  ;;  %v889_v62 = vrot.slane %v885_v55, 4 }
  0x54   : > { %375 = vrot.lane.b32.xlu0 %v374_v52, %s6039_s13  ;;  %v636_v60 = vsel %vm505_vm4, %v635_v53, %v634_v57  ;;  %v888_v61 = vunpack.c.l.b16 %v5523_v54  ;;  %v890_v63 = vrot.slane %v886_v56, 3  ;;  %v5524_v0 = vld [vmem:[%s6131_s5 + $0x20] ss:$0 sps:$4 sm:$0x44]  }
  0x55   : > { %v638_v1 = vsel %vm508_vm5, %v637_v58, %v636_v60  ;;  %v892_v2 = vrot.slane %v887_v59, 2  ;;  %v5525_v3 = vld [vmem:[%s6131_s5 + $0x28] ss:$0 sps:$4 sm:$0x44]   ;;  %v1149_v10 = vunpack.c.h.b16 %v5524_v0 }
  0x56   : > { %v639_v4 = vpack.c.b16 %v638_v1, %v638_v1  ;;  %v891_v5 = vsel %vm239_vm0, %v890_v63, %v889_v62  ;;  %v894_v6 = vrot.slane %v888_v61, 1  ;;  %v5526_v7 = vld [vmem:[%s6131_s5 + $0x30] ss:$0 sps:$4 sm:$0x44]   ;;  %v1150_v11 = vunpack.c.h.b16 %v5525_v3 }
  0x57   : > { %v893_v8 = vsel %vm242_vm1, %v892_v2, %v891_v5  ;;  %v5527_v9 = vld [vmem:[%s6131_s5 + $0x38] ss:$0 sps:$4 sm:$0x44]   ;;  %v1151_v13 = vunpack.c.h.b16 %v5526_v7  ;;  %v5528_v14 = vld [vmem:[%s6131_s5 + $0x40] ss:$0 sps:$4 sm:$0x11]  }
  0x58   : > { %640 = vrot.lane.b32.xlu1 %v639_v4, %s6039_s13  ;;  %v895_v12 = vsel %vm245_vm2, %v894_v6, %v893_v8  ;;  %v1152_v16 = vunpack.c.h.b16 %v5527_v9  ;;  %v1153_v17 = vrot.slane %v1150_v11, 7  ;;  %v5529_v18 = vld [vmem:[%s6131_s5 + $0x48] ss:$0 sps:$4 sm:$0x11]   ;;  %v1779_v24 = vunpack.c.h.b16 %v5528_v14 }
  0x59   : > { %v896_v15 = vpack.c.b16 %v895_v12, %v895_v12  ;;  %v1155_v19 = vrot.slane %v1151_v13, 6  ;;  %v5530_v20 = vld [vmem:[%s6131_s5 + $0x50] ss:$0 sps:$4 sm:$0x11]   ;;  %v1780_v25 = vunpack.c.h.b16 %v5529_v18 }
  0x5a   : > { %v1154_v21 = vsel %vm502_vm3, %v1153_v17, %v1149_v10  ;;  %v1157_v22 = vrot.slane %v1152_v16, 5  ;;  %v5531_v23 = vld [vmem:[%s6131_s5 + $0x58] ss:$0 sps:$4 sm:$0x11]   ;;  %v1781_v27 = vunpack.c.h.b16 %v5530_v20 }
  0x5b   : > { %897 = vrot.lane.b32.xlu0 %v896_v15, %s6040_s14  ;;  %v1156_v26 = vsel %vm505_vm4, %v1155_v19, %v1154_v21  ;;  %v5532_v28 = vld [vmem:[%s6131_s5 + $0x60] ss:$0 sps:$4 sm:$0x11]   ;;  %v1782_v30 = vunpack.c.h.b16 %v5531_v23  ;;  %v1783_v31 = vrot.slane %v1780_v25, 7 }
  0x5c   : > { %v1158_v29 = vsel %vm508_vm5, %v1157_v22, %v1156_v26  ;;  %v5533_v32 = vld [vmem:[%s6131_s5 + $0x68] ss:$0 sps:$4 sm:$0x11]   ;;  %v1785_v34 = vrot.slane %v1781_v27, 6  ;;  %v2031_v36 = vunpack.c.l.b16 %v5532_v28 }
  0x5d   : > { %v1159_v33 = vpack.c.b16 %v1158_v29, %v1158_v29  ;;  %v5534_v35 = vld [vmem:[%s6131_s5 + $0x70] ss:$0 sps:$4 sm:$0x11]   ;;  %v1784_v37 = vsel %vm239_vm0, %v1783_v31, %v1779_v24  ;;  %v1787_v38 = vrot.slane %v1782_v30, 5  ;;  %v2032_v40 = vunpack.c.l.b16 %v5533_v32 }
  0x5e   : > { %v5535_v39 = vld [vmem:[%s6131_s5 + $0x78] ss:$0 sps:$4 sm:$0x11]   ;;  %v1786_v41 = vsel %vm242_vm1, %v1785_v34, %v1784_v37  ;;  %v2033_v42 = vunpack.c.l.b16 %v5534_v35  ;;  %v2035_v43 = vrot.slane %v2031_v36, 4 }
  0x5f   : > { %1160 = vrot.lane.b32.xlu1 %v1159_v33, %s6040_s14  ;;  %v5536_v44 = vld [vmem:[%s6131_s5] ss:$0 sps:$4 sm:$0x44]   ;;  %v1788_v45 = vsel %vm245_vm2, %v1787_v38, %v1786_v41  ;;  %v2034_v46 = vunpack.c.l.b16 %v5535_v39  ;;  %v2036_v47 = vrot.slane %v2032_v40, 3 }
  0x60   : > { %v5537_v48 = vld [vmem:[%s6131_s5 + $0x8] ss:$0 sps:$4 sm:$0x44]   ;;  %v1789_v49 = vpack.c.b16 %v1788_v45, %v1788_v45  ;;  %v2038_v50 = vrot.slane %v2033_v42, 2  ;;  %v396_v52 = vunpack.c.l.b16 %v5536_v44 }
  0x61   : > { %v5538_v51 = vld [vmem:[%s6131_s5 + $0x10] ss:$0 sps:$4 sm:$0x44]   ;;  %v2037_v53 = vsel %vm502_vm3, %v2036_v47, %v2035_v43  ;;  %v2040_v54 = vrot.slane %v2034_v46, 1  ;;  %v397_v56 = vunpack.c.l.b16 %v5537_v48 }
  0x62   : > { %v5539_v55 = vld [vmem:[%s6131_s5 + $0x18] ss:$0 sps:$4 sm:$0x44]   ;;  %1790 = vrot.lane.b32.xlu0 %v1789_v49, %s6032_s6  ;;  %v2039_v57 = vsel %vm505_vm4, %v2038_v50, %v2037_v53  ;;  %v398_v58 = vunpack.c.l.b16 %v5538_v51  ;;  %v400_v59 = vrot.slane %v396_v52, 5 }
  0x63   : > { %v5540_v60 = vld [vmem:[%s6131_s5 + $0x20] ss:$0 sps:$4 sm:$0x44]   ;;  %v2041_v61 = vsel %vm508_vm5, %v2040_v54, %v2039_v57  ;;  %v399_v62 = vunpack.c.l.b16 %v5539_v55  ;;  %v401_v63 = vrot.slane %v397_v56, 4 }
  0x64   : > { %v5541_v0 = vld [vmem:[%s6131_s5 + $0x28] ss:$0 sps:$4 sm:$0x44]   ;;  %v2042_v1 = vpack.c.b16 %v2041_v61, %v2041_v61  ;;  %v403_v2 = vrot.slane %v398_v58, 3  ;;  %v661_v4 = vunpack.c.l.b16 %v5540_v60 }
  0x65   : > { %v5542_v3 = vld [vmem:[%s6131_s5 + $0x30] ss:$0 sps:$4 sm:$0x44]   ;;  %v402_v5 = vsel %vm239_vm0, %v401_v63, %v400_v59  ;;  %v405_v6 = vrot.slane %v399_v62, 2  ;;  %v662_v8 = vunpack.c.l.b16 %v5541_v0 }
  0x66   : > { %v5543_v7 = vld [vmem:[%s6131_s5 + $0x38] ss:$0 sps:$4 sm:$0x44]   ;;  %2043 = vrot.lane.b32.xlu1 %v2042_v1, %s6032_s6  ;;  %v404_v9 = vsel %vm242_vm1, %v403_v2, %v402_v5  ;;  %v663_v10 = vunpack.c.l.b16 %v5542_v3  ;;  %v665_v11 = vrot.slane %v661_v4, 1 }
  0x67   : > { %v5544_v12 = vld [vmem:[%s6131_s5] ss:$0 sps:$4 sm:$0x44]   ;;  %v406_v13 = vsel %vm245_vm2, %v405_v6, %v404_v9  ;;  %v664_v14 = vunpack.c.l.b16 %v5543_v7  ;;  %v5545_v15 = vld [vmem:[%s6131_s5 + $0x8] ss:$0 sps:$4 sm:$0x44]  }
  0x68   : > { %v5546_v16 = vld [vmem:[%s6131_s5 + $0x10] ss:$0 sps:$4 sm:$0x44]   ;;  %v407_v17 = vpack.c.b16 %v406_v13, %v406_v13  ;;  %v666_v18 = vsel %vm502_vm3, %v662_v8, %v665_v11  ;;  %v667_v19 = vrot.slane %v663_v10, 7  ;;  %v918_v21 = vunpack.c.l.b16 %v5544_v12 }
  0x69   : > { %v5547_v20 = vld [vmem:[%s6131_s5 + $0x18] ss:$0 sps:$4 sm:$0x44]   ;;  %v669_v22 = vrot.slane %v664_v14, 6  ;;  %v919_v23 = vunpack.c.l.b16 %v5545_v15  ;;  %v920_v24 = vunpack.c.l.b16 %v5546_v16 }
  0x6a   : > { %408 = vrot.lane.b32.xlu0 %v407_v17, %s6041_s20  ;;  %v668_v25 = vsel %vm505_vm4, %v667_v19, %v666_v18  ;;  %v921_v26 = vunpack.c.l.b16 %v5547_v20  ;;  %v922_v27 = vrot.slane %v918_v21, 5  ;;  %v5548_v28 = vld [vmem:[%s6131_s5 + $0x20] ss:$0 sps:$4 sm:$0x44]  }
  0x6b   : > { %v670_v29 = vsel %vm508_vm5, %v669_v22, %v668_v25  ;;  %v923_v30 = vrot.slane %v919_v23, 4  ;;  %v925_v31 = vrot.slane %v920_v24, 3  ;;  %v5549_v32 = vld [vmem:[%s6131_s5 + $0x28] ss:$0 sps:$4 sm:$0x44]   ;;  %v1181_v36 = vunpack.c.l.b16 %v5548_v28 }
  0x6c   : > { %v671_v33 = vpack.c.b16 %v670_v29, %v670_v29  ;;  %v927_v34 = vrot.slane %v921_v26, 2  ;;  %v5550_v35 = vld [vmem:[%s6131_s5 + $0x30] ss:$0 sps:$4 sm:$0x44]   ;;  %v1182_v39 = vunpack.c.l.b16 %v5549_v32 }
  0x6d   : > { %v924_v37 = vsel %vm239_vm0, %v923_v30, %v922_v27  ;;  %v5551_v38 = vld [vmem:[%s6131_s5 + $0x38] ss:$0 sps:$4 sm:$0x44]   ;;  %v1183_v41 = vunpack.c.l.b16 %v5550_v35  ;;  %v1185_v42 = vrot.slane %v1181_v36, 1 }
  0x6e   : > { %672 = vrot.lane.b32.xlu1 %v671_v33, %s6041_s20  ;;  %v926_v40 = vsel %vm242_vm1, %v925_v31, %v924_v37  ;;  %v1184_v44 = vunpack.c.l.b16 %v5551_v38  ;;  %v5552_v45 = vld [vmem:[%s6131_s5 + $0x40] ss:$0 sps:$4 sm:$0x11]   ;;  %v5553_v46 = vld [vmem:[%s6131_s5 + $0x48] ss:$0 sps:$4 sm:$0x11]  }
  0x6f   : > { %v928_v43 = vsel %vm245_vm2, %v927_v34, %v926_v40  ;;  %v1186_v48 = vsel %vm502_vm3, %v1182_v39, %v1185_v42  ;;  %v1187_v49 = vrot.slane %v1183_v41, 7  ;;  %v5554_v50 = vld [vmem:[%s6131_s5 + $0x50] ss:$0 sps:$4 sm:$0x11]   ;;  %v1307_v53 = vunpack.c.l.b16 %v5552_v45 }
  0x70   : > { %v929_v47 = vpack.c.b16 %v928_v43, %v928_v43  ;;  %v1189_v51 = vrot.slane %v1184_v44, 6  ;;  %v5555_v52 = vld [vmem:[%s6131_s5 + $0x58] ss:$0 sps:$4 sm:$0x11]   ;;  %v1308_v54 = vunpack.c.l.b16 %v5553_v46  ;;  %v1309_v56 = vunpack.c.l.b16 %v5554_v50 }
  0x71   : > { %v1188_v55 = vsel %vm505_vm4, %v1187_v49, %v1186_v48  ;;  %v1310_v58 = vunpack.c.l.b16 %v5555_v52  ;;  %v1311_v59 = vrot.slane %v1307_v53, 1  ;;  %v5556_v60 = vld [vmem:[%s6131_s5 + $0x60] ss:$0 sps:$4 sm:$0x11]  }
  0x72   : > { %930 = vrot.lane.b32.xlu0 %v929_v47, %s6042_s22  ;;  %v1190_v57 = vsel %vm508_vm5, %v1189_v51, %v1188_v55  ;;  %v1313_v62 = vrot.slane %v1309_v56, 7  ;;  %v5557_v63 = vld [vmem:[%s6131_s5 + $0x68] ss:$0 sps:$4 sm:$0x11]   ;;  %v1559_v3 = vunpack.c.l.b16 %v5556_v60 }
  0x73   : > { %v1191_v61 = vpack.c.b16 %v1190_v57, %v1190_v57  ;;  %v1312_v0 = vsel %vm239_vm0, %v1308_v54, %v1311_v59  ;;  %v1315_v1 = vrot.slane %v1310_v58, 6  ;;  %v5558_v2 = vld [vmem:[%s6131_s5 + $0x70] ss:$0 sps:$4 sm:$0x11]   ;;  %v1560_v6 = vunpack.c.l.b16 %v5557_v63 }
  0x74   : > { %v1314_v4 = vsel %vm242_vm1, %v1313_v62, %v1312_v0  ;;  %v5559_v5 = vld [vmem:[%s6131_s5 + $0x78] ss:$0 sps:$4 sm:$0x11]   ;;  %v5560_v7 = vld [vmem:[%s6131_s5 + $0x40] ss:$0 sps:$4 sm:$0x11]   ;;  %v1561_v9 = vunpack.c.l.b16 %v5558_v2 }
  0x75   : > { %1192 = vrot.lane.b32.xlu1 %v1191_v61, %s6042_s22  ;;  %v1316_v8 = vsel %vm245_vm2, %v1315_v1, %v1314_v4  ;;  %v1563_v10 = vrot.slane %v1559_v3, 5  ;;  %v5561_v11 = vld [vmem:[%s6131_s5 + $0x48] ss:$0 sps:$4 sm:$0x11]   ;;  %v1562_v13 = vunpack.c.l.b16 %v5559_v5  ;;  %v1564_v14 = vrot.slane %v1560_v6, 4 }
  0x76   : > { %v1317_v12 = vpack.c.b16 %v1316_v8, %v1316_v8  ;;  %v5562_v15 = vld [vmem:[%s6131_s5 + $0x50] ss:$0 sps:$4 sm:$0x11]   ;;  %v1810_v16 = vunpack.c.l.b16 %v5560_v7  ;;  %v1566_v17 = vrot.slane %v1561_v9, 3  ;;  %v1811_v19 = vunpack.c.l.b16 %v5561_v11 }
  0x77   : > { %v5563_v18 = vld [vmem:[%s6131_s5 + $0x58] ss:$0 sps:$4 sm:$0x11]   ;;  %v1565_v20 = vsel %vm502_vm3, %v1564_v14, %v1563_v10  ;;  %v1568_v21 = vrot.slane %v1562_v13, 2  ;;  %v1812_v22 = vunpack.c.l.b16 %v5562_v15 }
  0x78   : > { %1318 = vrot.lane.b32.xlu0 %v1317_v12, %s6033_s7  ;;  %v1814_v23 = vrot.slane %v1810_v16, 1  ;;  %v1567_v24 = vsel %vm505_vm4, %v1566_v17, %v1565_v20  ;;  %v1813_v25 = vunpack.c.l.b16 %v5563_v18  ;;  %v5564_v26 = vld [vmem:[%s6131_s5 + $0x60] ss:$0 sps:$4 sm:$0x11]  }
  0x79   : > { %v5565_v27 = vld [vmem:[%s6131_s5 + $0x68] ss:$0 sps:$4 sm:$0x11]   ;;  %v1569_v28 = vsel %vm508_vm5, %v1568_v21, %v1567_v24  ;;  %v1816_v30 = vrot.slane %v1812_v22, 7  ;;  %v2063_v35 = vunpack.c.l.b16 %v5564_v26 }
  0x7a   : > { %v1815_v29 = vsel %vm239_vm0, %v1811_v19, %v1814_v23  ;;  %v5566_v31 = vld [vmem:[%s6131_s5 + $0x70] ss:$0 sps:$4 sm:$0x11]   ;;  %v1570_v32 = vpack.c.b16 %v1569_v28, %v1569_v28  ;;  %v1818_v33 = vrot.slane %v1813_v25, 6  ;;  %v2064_v36 = vunpack.c.l.b16 %v5565_v27 }
  0x7b   : > { %v5567_v34 = vld [vmem:[%s6131_s5 + $0x78] ss:$0 sps:$4 sm:$0x11]   ;;  %v1817_v37 = vsel %vm242_vm1, %v1816_v30, %v1815_v29  ;;  %v2065_v38 = vunpack.c.l.b16 %v5566_v31  ;;  %v5568_v39 = vld [vmem:[%s6131_s5] ss:$0 sps:$4 sm:$0x88]  }
  0x7c   : > { %1571 = vrot.lane.b32.xlu1 %v1570_v32, %s6033_s7  ;;  %v1819_v40 = vsel %vm245_vm2, %v1818_v33, %v1817_v37  ;;  %v2066_v41 = vunpack.c.l.b16 %v5567_v34  ;;  %v2067_v42 = vrot.slane %v2063_v35, 5  ;;  %v2068_v43 = vrot.slane %v2064_v36, 4  ;;  %v5569_v44 = vld [vmem:[%s6131_s5 + $0x8] ss:$0 sps:$4 sm:$0x88]  }
  0x7d   : > { %v1820_v45 = vpack.c.b16 %v1819_v40, %v1819_v40  ;;  %v2070_v46 = vrot.slane %v2065_v38, 3  ;;  %v5570_v47 = vld [vmem:[%s6131_s5 + $0x10] ss:$0 sps:$4 sm:$0x88]   ;;  %v429_v48 = vunpack.c.l.b16 %v5568_v39  ;;  %v430_v52 = vunpack.c.l.b16 %v5569_v44 }
  0x7e   : > { %v2069_v49 = vsel %vm502_vm3, %v2068_v43, %v2067_v42  ;;  %v2072_v50 = vrot.slane %v2066_v41, 2  ;;  %v5571_v51 = vld [vmem:[%s6131_s5 + $0x18] ss:$0 sps:$4 sm:$0x88]   ;;  %v431_v54 = vunpack.c.l.b16 %v5570_v47 }
  0x7f   : > { %1821 = vrot.lane.b32.xlu0 %v1820_v45, %s6034_s8  ;;  %v2071_v53 = vsel %vm505_vm4, %v2070_v46, %v2069_v49  ;;  %v433_v55 = vrot.slane %v429_v48, 6  ;;  %v432_v57 = vunpack.c.l.b16 %v5571_v51  ;;  %v434_v58 = vrot.slane %v430_v52, 5  ;;  %v5572_v59 = vld [vmem:[%s6131_s5 + $0x20] ss:$0 sps:$4 sm:$0x88]  }
  0x80   : > { %v2073_v56 = vsel %vm508_vm5, %v2072_v50, %v2071_v53  ;;  %v436_v61 = vrot.slane %v431_v54, 4  ;;  %v5573_v62 = vld [vmem:[%s6131_s5 + $0x28] ss:$0 sps:$4 sm:$0x88]   ;;  %v693_v2 = vunpack.c.l.b16 %v5572_v59 }
  0x81   : > { %v2074_v60 = vpack.c.b16 %v2073_v56, %v2073_v56  ;;  %v435_v63 = vsel %vm239_vm0, %v434_v58, %v433_v55  ;;  %v438_v0 = vrot.slane %v432_v57, 3  ;;  %v5574_v1 = vld [vmem:[%s6131_s5 + $0x30] ss:$0 sps:$4 sm:$0x88]   ;;  %v694_v5 = vunpack.c.l.b16 %v5573_v62 }
  0x82   : > { %v437_v3 = vsel %vm242_vm1, %v436_v61, %v435_v63  ;;  %v5575_v4 = vld [vmem:[%s6131_s5 + $0x38] ss:$0 sps:$4 sm:$0x88]   ;;  %v695_v7 = vunpack.c.l.b16 %v5574_v1  ;;  %v697_v8 = vrot.slane %v693_v2, 2 }
  0x83   : > { %2075 = vrot.lane.b32.xlu1 %v2074_v60, %s6034_s8  ;;  %v439_v6 = vsel %vm245_vm2, %v438_v0, %v437_v3  ;;  %v5576_v9 = vld [vmem:[%s6131_s5] ss:$0 sps:$4 sm:$0x88]   ;;  %v696_v11 = vunpack.c.l.b16 %v5575_v4  ;;  %v698_v12 = vrot.slane %v694_v5, 1 }
  0x84   : > { %v440_v10 = vpack.c.b16 %v439_v6, %v439_v6  ;;  %v5577_v13 = vld [vmem:[%s6131_s5 + $0x8] ss:$0 sps:$4 sm:$0x88]   ;;  %v5578_v14 = vld [vmem:[%s6131_s5 + $0x10] ss:$0 sps:$4 sm:$0x88]   ;;  %v951_v16 = vunpack.c.l.b16 %v5576_v9 }
  0x85   : > { %v5579_v15 = vld [vmem:[%s6131_s5 + $0x18] ss:$0 sps:$4 sm:$0x88]   ;;  %v699_v17 = vsel %vm502_vm3, %v698_v12, %v697_v8  ;;  %v701_v18 = vrot.slane %v696_v11, 7  ;;  %v952_v19 = vunpack.c.l.b16 %v5577_v13  ;;  %v953_v21 = vunpack.c.l.b16 %v5578_v14 }
  0x86   : > { %441 = vrot.lane.b32.xlu0 %v440_v10, %s6043_s23  ;;  %v700_v20 = vsel %vm505_vm4, %v695_v7, %v699_v17  ;;  %v954_v22 = vunpack.c.l.b16 %v5579_v15  ;;  %v955_v23 = vrot.slane %v951_v16, 6  ;;  %v5580_v24 = vld [vmem:[%s6131_s5 + $0x20] ss:$0 sps:$4 sm:$0x88]  }
  0x87   : > { %v702_v26 = vsel %vm508_vm5, %v701_v18, %v700_v20  ;;  %v956_v27 = vrot.slane %v952_v19, 5  ;;  %v5581_v28 = vld [vmem:[%s6131_s5 + $0x28] ss:$0 sps:$4 sm:$0x88]   ;;  %v958_v30 = vrot.slane %v953_v21, 4  ;;  %v1213_v33 = vunpack.c.l.b16 %v5580_v24 }
  0x88   : > { %v703_v29 = vpack.c.b16 %v702_v26, %v702_v26  ;;  %v960_v31 = vrot.slane %v954_v22, 3  ;;  %v5582_v32 = vld [vmem:[%s6131_s5 + $0x30] ss:$0 sps:$4 sm:$0x88]   ;;  %v1214_v36 = vunpack.c.l.b16 %v5581_v28 }
  0x89   : > { %v957_v34 = vsel %vm239_vm0, %v956_v27, %v955_v23  ;;  %v5583_v35 = vld [vmem:[%s6131_s5 + $0x38] ss:$0 sps:$4 sm:$0x88]   ;;  %v1215_v38 = vunpack.c.l.b16 %v5582_v32  ;;  %v1217_v39 = vrot.slane %v1213_v33, 2 }
  0x8a   : > { %704 = vrot.lane.b32.xlu1 %v703_v29, %s6043_s23  ;;  %v959_v37 = vsel %vm242_vm1, %v958_v30, %v957_v34  ;;  %v5584_v40 = vld [vmem:[%s6131_s5 + $0x40] ss:$0 sps:$4 sm:$0x22]   ;;  %v1216_v42 = vunpack.c.l.b16 %v5583_v35  ;;  %v1218_v43 = vrot.slane %v1214_v36, 1 }
  0x8b   : > { %v961_v41 = vsel %vm245_vm2, %v960_v31, %v959_v37  ;;  %v5585_v44 = vld [vmem:[%s6131_s5 + $0x48] ss:$0 sps:$4 sm:$0x22]   ;;  %v5586_v46 = vld [vmem:[%s6131_s5 + $0x50] ss:$0 sps:$4 sm:$0x22]   ;;  %v1338_v48 = vunpack.c.l.b16 %v5584_v40 }
  0x8c   : > { %v962_v45 = vpack.c.b16 %v961_v41, %v961_v41  ;;  %v5587_v47 = vld [vmem:[%s6131_s5 + $0x58] ss:$0 sps:$4 sm:$0x22]   ;;  %v1219_v49 = vsel %vm502_vm3, %v1218_v43, %v1217_v39  ;;  %v1221_v50 = vrot.slane %v1216_v42, 7  ;;  %v1339_v51 = vunpack.c.l.b16 %v5585_v44 }
  0x8d   : > { %v1220_v52 = vsel %vm505_vm4, %v1215_v38, %v1219_v49  ;;  %v1340_v53 = vunpack.c.l.b16 %v5586_v46  ;;  %v1341_v54 = vunpack.c.l.b16 %v5587_v47  ;;  %v1342_v55 = vrot.slane %v1338_v48, 2  ;;  %v5588_v56 = vld [vmem:[%s6131_s5 + $0x60] ss:$0 sps:$4 sm:$0x22]  }
  0x8e   : > { %963 = vrot.lane.b32.xlu0 %v962_v45, %s6044_s28  ;;  %v1222_v58 = vsel %vm508_vm5, %v1221_v50, %v1220_v52  ;;  %v1343_v59 = vrot.slane %v1339_v51, 1  ;;  %v5589_v60 = vld [vmem:[%s6131_s5 + $0x68] ss:$0 sps:$4 sm:$0x22]   ;;  %v1591_v1 = vunpack.c.l.b16 %v5588_v56 }
  0x8f   : > { %v1223_v62 = vpack.c.b16 %v1222_v58, %v1222_v58  ;;  %v1346_v63 = vrot.slane %v1341_v54, 7  ;;  %v5590_v0 = vld [vmem:[%s6131_s5 + $0x70] ss:$0 sps:$4 sm:$0x22]   ;;  %v1592_v4 = vunpack.c.l.b16 %v5589_v60 }
  0x90   : > { %v1344_v2 = vsel %vm239_vm0, %v1343_v59, %v1342_v55  ;;  %v5591_v3 = vld [vmem:[%s6131_s5 + $0x78] ss:$0 sps:$4 sm:$0x22]   ;;  %v1593_v6 = vunpack.c.l.b16 %v5590_v0  ;;  %v1595_v7 = vrot.slane %v1591_v1, 6 }
  0x91   : > { %1224 = vrot.lane.b32.xlu1 %v1223_v62, %s6044_s28  ;;  %v1345_v5 = vsel %vm242_vm1, %v1340_v53, %v1344_v2  ;;  %v5592_v8 = vld [vmem:[%s6131_s5 + $0x40] ss:$0 sps:$4 sm:$0x22]   ;;  %v1594_v10 = vunpack.c.l.b16 %v5591_v3  ;;  %v1596_v11 = vrot.slane %v1592_v4, 5 }
  0x92   : > { %v1347_v9 = vsel %vm245_vm2, %v1346_v63, %v1345_v5  ;;  %v5593_v12 = vld [vmem:[%s6131_s5 + $0x48] ss:$0 sps:$4 sm:$0x22]   ;;  %v1598_v14 = vrot.slane %v1593_v6, 4  ;;  %v1841_v16 = vunpack.c.l.b16 %v5592_v8 }
  0x93   : > { %v1348_v13 = vpack.c.b16 %v1347_v9, %v1347_v9  ;;  %v5594_v15 = vld [vmem:[%s6131_s5 + $0x50] ss:$0 sps:$4 sm:$0x22]   ;;  %v1597_v17 = vsel %vm502_vm3, %v1596_v11, %v1595_v7  ;;  %v1600_v18 = vrot.slane %v1594_v10, 3  ;;  %v1842_v20 = vunpack.c.l.b16 %v5593_v12 }
  0x94   : > { %v5595_v19 = vld [vmem:[%s6131_s5 + $0x58] ss:$0 sps:$4 sm:$0x22]   ;;  %v1599_v22 = vsel %vm505_vm4, %v1598_v14, %v1597_v17  ;;  %v1843_v23 = vunpack.c.l.b16 %v5594_v15  ;;  %v1845_v24 = vrot.slane %v1841_v16, 2 }
  0x95   : > { %v769_v25 = vpop.permute.xlu0 %768  ;;  %1349 = vrot.lane.b32.xlu0 %v1348_v13, %s6035_s9  ;;  %v1601_v26 = vsel %vm508_vm5, %v1600_v18, %v1599_v22  ;;  %v1844_v27 = vunpack.c.l.b16 %v5595_v19  ;;  %v1846_v28 = vrot.slane %v1842_v20, 1  ;;  %v5597_v29 = vld [vmem:[%s6131_s5 + $0x68] ss:$0 sps:$4 sm:$0x22]  }
  0x96   : > { %772 = vst.msk [vmem:[#allocation2] sm:$0x30] %vm7444_vm6, %v769_v25  ;;  %v5596_v25 = vld [vmem:[%s6131_s5 + $0x60] ss:$0 sps:$4 sm:$0x22]   ;;  %v1602_v31 = vpack.c.b16 %v1601_v26, %v1601_v26  ;;  %v2096_v37 = vunpack.c.l.b16 %v5597_v29 }
  0x97   : > { %v6395_v61 = vpop.permute.xlu1 %278  ;;  %v5598_v32 = vld [vmem:[%s6131_s5 + $0x70] ss:$0 sps:$4 sm:$0x22]   ;;  %v5599_v33 = vld [vmem:[%s6131_s5 + $0x78] ss:$0 sps:$4 sm:$0x22]   ;;  %v2095_v34 = vunpack.c.l.b16 %v5596_v25  ;;  %v1847_v35 = vsel %vm239_vm0, %v1846_v28, %v1845_v24 }
  0x98   : > { %v1849_v36 = vrot.slane %v1844_v27, 7  ;;  %1603 = vrot.lane.b32.xlu1 %v1602_v31, %s6035_s9  ;;  %v1848_v38 = vsel %vm242_vm1, %v1843_v23, %v1847_v35  ;;  %v2097_v39 = vunpack.c.l.b16 %v5598_v32  ;;  %v2098_v40 = vunpack.c.l.b16 %v5599_v33  ;;  %v5600_v42 = vld [vmem:[%s6131_s5] ss:$0 sps:$4 sm:$0x88]  }
  0x99   : > { %v2099_v41 = vrot.slane %v2095_v34, 6  ;;  %v2100_v44 = vrot.slane %v2096_v37, 5  ;;  %v5601_v45 = vld [vmem:[%s6131_s5 + $0x8] ss:$0 sps:$4 sm:$0x88]   ;;  %v462_v51 = vunpack.c.l.b16 %v5600_v42 }
  0x9a   : > { %v1850_v43 = vsel %vm245_vm2, %v1849_v36, %v1848_v38  ;;  %v2102_v48 = vrot.slane %v2097_v39, 4  ;;  %v2104_v49 = vrot.slane %v2098_v40, 3  ;;  %v5602_v50 = vld [vmem:[%s6131_s5 + $0x10] ss:$0 sps:$4 sm:$0x88]   ;;  %v463_v54 = vunpack.c.l.b16 %v5601_v45 }
  0x9b   : > { %v1030_v57 = vpop.permute.xlu0 %1029  ;;  %v1851_v47 = vpack.c.b16 %v1850_v43, %v1850_v43  ;;  %v2101_v52 = vsel %vm502_vm3, %v2100_v44, %v2099_v41  ;;  %v5603_v53 = vld [vmem:[%s6131_s5 + $0x18] ss:$0 sps:$4 sm:$0x88]   ;;  %v464_v56 = vunpack.c.l.b16 %v5602_v50  ;;  %v5604_v62 = vld [vmem:[%s6131_s5 + $0x20] ss:$0 sps:$4 sm:$0x88]  }
  0x9c   : > { %1033 = vst.msk [vmem:[#allocation2] sm:$0xc0] %vm7443_vm7, %v1030_v57  ;;  %v2103_v55 = vsel %vm505_vm4, %v2102_v48, %v2101_v52  ;;  %v466_v57 = vrot.slane %v462_v51, 7  ;;  %v465_v59 = vunpack.c.l.b16 %v5603_v53  ;;  %v467_v60 = vrot.slane %v463_v54, 6 }
  0x9d   : > { %1852 = vrot.lane.b32.xlu0 %v1851_v47, %s6036_s10  ;;  %v2105_v58 = vsel %vm508_vm5, %v2104_v49, %v2103_v55  ;;  %v469_v0 = vrot.slane %v464_v56, 5  ;;  %v5605_v1 = vld [vmem:[%s6131_s5 + $0x28] ss:$0 sps:$4 sm:$0x88]   ;;  %v725_v6 = vunpack.c.l.b16 %v5604_v62 }
  0x9e   : > { %v2106_v63 = vpack.c.b16 %v2105_v58, %v2105_v58  ;;  %v468_v3 = vsel %vm239_vm0, %v467_v60, %v466_v57  ;;  %v471_v4 = vrot.slane %v465_v59, 4  ;;  %v5606_v5 = vld [vmem:[%s6131_s5 + $0x30] ss:$0 sps:$4 sm:$0x88]   ;;  %v726_v9 = vunpack.c.l.b16 %v5605_v1 }
  0x9f   : > { %v6409_v21 = vpop.permute.xlu1 %542  ;;  %v470_v7 = vsel %vm242_vm1, %v469_v0, %v468_v3  ;;  %v5607_v8 = vld [vmem:[%s6131_s5 + $0x38] ss:$0 sps:$4 sm:$0x88]   ;;  %v727_v11 = vunpack.c.l.b16 %v5606_v5  ;;  %v729_v12 = vrot.slane %v725_v6, 3 }
  0xa0   : > { %2107 = vrot.lane.b32.xlu1 %v2106_v63, %s6036_s10  ;;  %v472_v10 = vsel %vm245_vm2, %v471_v4, %v470_v7  ;;  %v5608_v13 = vld [vmem:[%s6131_s5] ss:$0 sps:$4 sm:$0x88]   ;;  %v728_v15 = vunpack.c.l.b16 %v5607_v8  ;;  %v730_v16 = vrot.slane %v726_v9, 2 }
  0xa1   : > { %v473_v14 = vpack.c.b16 %v472_v10, %v472_v10  ;;  %v5609_v17 = vld [vmem:[%s6131_s5 + $0x8] ss:$0 sps:$4 sm:$0x88]   ;;  %v732_v18 = vrot.slane %v727_v11, 1  ;;  %v984_v20 = vunpack.c.l.b16 %v5608_v13 }
  0xa2   : > { %v5610_v19 = vld [vmem:[%s6131_s5 + $0x10] ss:$0 sps:$4 sm:$0x88]   ;;  %v731_v22 = vsel %vm502_vm3, %v730_v16, %v729_v12  ;;  %v5611_v23 = vld [vmem:[%s6131_s5 + $0x18] ss:$0 sps:$4 sm:$0x88]   ;;  %v985_v24 = vunpack.c.l.b16 %v5609_v17 }
  0xa3   : > { %v801_v30 = vpop.permute.xlu0 %800  ;;  %474 = vrot.lane.b32.xlu0 %v473_v14, %s6045_s29  ;;  %v733_v27 = vsel %vm505_vm4, %v732_v18, %v731_v22  ;;  %v986_v28 = vunpack.c.l.b16 %v5610_v19  ;;  %v988_v29 = vrot.slane %v984_v20, 7  ;;  %v987_v32 = vunpack.c.l.b16 %v5611_v23  ;;  %v5613_v34 = vld [vmem:[%s6131_s5 + $0x28] ss:$0 sps:$4 sm:$0x88]  }
  0xa4   : > { %804 = vst.msk [vmem:[#allocation2] sm:$0x30] %vm7450_vm8, %v801_v30  ;;  %v5612_v30 = vld [vmem:[%s6131_s5 + $0x20] ss:$0 sps:$4 sm:$0x88]   ;;  %v734_v31 = vsel %vm508_vm5, %v728_v15, %v733_v27  ;;  %v989_v33 = vrot.slane %v985_v24, 6  ;;  %v1246_v42 = vunpack.c.l.b16 %v5613_v34 }
  0xa5   : > { %v735_v35 = vpack.c.b16 %v734_v31, %v734_v31  ;;  %v991_v36 = vrot.slane %v986_v28, 5  ;;  %v5614_v37 = vld [vmem:[%s6131_s5 + $0x30] ss:$0 sps:$4 sm:$0x88]   ;;  %v1245_v38 = vunpack.c.l.b16 %v5612_v30  ;;  %v993_v40 = vrot.slane %v987_v32, 4 }
  0xa6   : > { %v990_v39 = vsel %vm239_vm0, %v989_v33, %v988_v29  ;;  %v5615_v41 = vld [vmem:[%s6131_s5 + $0x38] ss:$0 sps:$4 sm:$0x88]   ;;  %v1247_v44 = vunpack.c.l.b16 %v5614_v37  ;;  %v1250_v49 = vrot.slane %v1246_v42, 2 }
  0xa7   : > { %v1063_v46 = vpop.permute.xlu1 %1062  ;;  %736 = vrot.lane.b32.xlu1 %v735_v35, %s6045_s29  ;;  %v992_v43 = vsel %vm242_vm1, %v991_v36, %v990_v39  ;;  %v1249_v45 = vrot.slane %v1245_v38, 3  ;;  %v1248_v48 = vunpack.c.l.b16 %v5615_v41  ;;  %v5617_v50 = vld [vmem:[%s6131_s5 + $0x48] ss:$0 sps:$4 sm:$0x22]  }
  0xa8   : > { %1066 = vst.msk [vmem:[#allocation2] sm:$0xc0] %vm7449_vm9, %v1063_v46  ;;  %v5616_v46 = vld [vmem:[%s6131_s5 + $0x40] ss:$0 sps:$4 sm:$0x22]   ;;  %v994_v47 = vsel %vm245_vm2, %v993_v40, %v992_v43  ;;  %v1252_v53 = vrot.slane %v1247_v44, 1  ;;  %v1370_v58 = vunpack.c.l.b16 %v5617_v50 }
  0xa9   : > { %v995_v52 = vpack.c.b16 %v994_v47, %v994_v47  ;;  %v5618_v54 = vld [vmem:[%s6131_s5 + $0x50] ss:$0 sps:$4 sm:$0x22]   ;;  %v1369_v55 = vunpack.c.l.b16 %v5616_v46  ;;  %v1251_v56 = vsel %vm502_vm3, %v1250_v49, %v1249_v45  ;;  %v5619_v57 = vld [vmem:[%s6131_s5 + $0x58] ss:$0 sps:$4 sm:$0x22]  }
  0xaa   : > { %v6434_v2 = vpop.permute.xlu0 %310  ;;  %v1253_v59 = vsel %vm505_vm4, %v1252_v53, %v1251_v56  ;;  %v1371_v60 = vunpack.c.l.b16 %v5618_v54  ;;  %v5620_v63 = vld [vmem:[%s6131_s5 + $0x60] ss:$0 sps:$4 sm:$0x22]   ;;  %v1372_v1 = vunpack.c.l.b16 %v5619_v57  ;;  %v1374_v3 = vrot.slane %v1370_v58, 2 }
  0xab   : > { %996 = vrot.lane.b32.xlu0 %v995_v52, %s6046_s30  ;;  %v1373_v62 = vrot.slane %v1369_v55, 3  ;;  %v1254_v0 = vsel %vm508_vm5, %v1248_v48, %v1253_v59  ;;  %v5621_v4 = vld [vmem:[%s6131_s5 + $0x68] ss:$0 sps:$4 sm:$0x22]   ;;  %v1623_v8 = vunpack.c.l.b16 %v5620_v63 }
  0xac   : > { %v1255_v5 = vpack.c.b16 %v1254_v0, %v1254_v0  ;;  %v1376_v6 = vrot.slane %v1371_v60, 1  ;;  %v5622_v7 = vld [vmem:[%s6131_s5 + $0x70] ss:$0 sps:$4 sm:$0x22]   ;;  %v1624_v11 = vunpack.c.l.b16 %v5621_v4 }
  0xad   : > { %v1375_v9 = vsel %vm239_vm0, %v1374_v3, %v1373_v62  ;;  %v5623_v10 = vld [vmem:[%s6131_s5 + $0x78] ss:$0 sps:$4 sm:$0x22]   ;;  %v1625_v13 = vunpack.c.l.b16 %v5622_v7  ;;  %v1627_v14 = vrot.slane %v1623_v8, 7 }
  0xae   : > { %v6448_v25 = vpop.permute.xlu1 %575  ;;  %1256 = vrot.lane.b32.xlu1 %v1255_v5, %s6046_s30  ;;  %v1377_v12 = vsel %vm242_vm1, %v1376_v6, %v1375_v9  ;;  %v5624_v15 = vld [vmem:[%s6131_s5 + $0x40] ss:$0 sps:$4 sm:$0x22]   ;;  %v1626_v17 = vunpack.c.l.b16 %v5623_v10  ;;  %v1628_v18 = vrot.slane %v1624_v11, 6 }
  0xaf   : > { %v1378_v16 = vsel %vm245_vm2, %v1372_v1, %v1377_v12  ;;  %v5625_v19 = vld [vmem:[%s6131_s5 + $0x48] ss:$0 sps:$4 sm:$0x22]   ;;  %v1630_v22 = vrot.slane %v1625_v13, 5  ;;  %v1872_v24 = vunpack.c.l.b16 %v5624_v15 }
  0xb0   : > { %v1379_v20 = vpack.c.b16 %v1378_v16, %v1378_v16  ;;  %v5626_v23 = vld [vmem:[%s6131_s5 + $0x50] ss:$0 sps:$4 sm:$0x22]   ;;  %v1632_v27 = vrot.slane %v1626_v17, 4  ;;  %v1873_v29 = vunpack.c.l.b16 %v5625_v19 }
  0xb1   : > { %v833_v26 = vpop.permute.xlu0 %832  ;;  %v5627_v28 = vld [vmem:[%s6131_s5 + $0x58] ss:$0 sps:$4 sm:$0x22]   ;;  %v1874_v31 = vunpack.c.l.b16 %v5626_v23  ;;  %v1876_v32 = vrot.slane %v1872_v24, 3 }
  0xb2   : > { %836 = vst.msk [vmem:[#allocation2] sm:$0x30] %vm7464_vm10, %v833_v26  ;;  %v1629_v26 = vsel %vm502_vm3, %v1628_v18, %v1627_v14  ;;  %1380 = vrot.lane.b32.xlu0 %v1379_v20, %s6037_s11  ;;  %v5628_v33 = vld [vmem:[%s6131_s5 + $0x60] ss:$0 sps:$4 sm:$0x22]   ;;  %v1875_v36 = vunpack.c.l.b16 %v5627_v28  ;;  %v1877_v37 = vrot.slane %v1873_v29, 2 }
  0xb3   : > { %v1631_v30 = vsel %vm505_vm4, %v1630_v22, %v1629_v26  ;;  %v5629_v38 = vld [vmem:[%s6131_s5 + $0x68] ss:$0 sps:$4 sm:$0x22]   ;;  %v1879_v40 = vrot.slane %v1874_v31, 1  ;;  %v2127_v42 = vunpack.c.l.b16 %v5628_v33 }
  0xb4   : > { %v1633_v35 = vsel %vm508_vm5, %v1632_v27, %v1631_v30  ;;  %v5630_v41 = vld [vmem:[%s6131_s5 + $0x70] ss:$0 sps:$4 sm:$0x22]   ;;  %v1878_v43 = vsel %vm239_vm0, %v1877_v37, %v1876_v32  ;;  %v5631_v44 = vld [vmem:[%s6131_s5 + $0x78] ss:$0 sps:$4 sm:$0x22]   ;;  %v2128_v45 = vunpack.c.l.b16 %v5629_v38 }
  0xb5   : > { %v1096_v51 = vpop.permute.xlu1 %1095  ;;  %v1634_v39 = vpack.c.b16 %v1633_v35, %v1633_v35  ;;  %v1880_v46 = vsel %vm242_vm1, %v1879_v40, %v1878_v43  ;;  %v2129_v47 = vunpack.c.l.b16 %v5630_v41  ;;  %v2131_v48 = vrot.slane %v2127_v42, 7  ;;  %v5632_v49 = vld [vmem:[%s6131_s5 + $0x40] ss:$0 sps:$4 sm:$0x44]  }
  0xb6   : > { %1099 = vst.msk [vmem:[#allocation2] sm:$0xc0] %vm7461_vm11, %v1096_v51  ;;  %v1881_v51 = vsel %vm245_vm2, %v1875_v36, %v1880_v46  ;;  %v2130_v52 = vunpack.c.l.b16 %v5631_v44  ;;  %v2132_v53 = vrot.slane %v2128_v45, 6  ;;  %v5633_v54 = vld [vmem:[%s6131_s5 + $0x48] ss:$0 sps:$4 sm:$0x44]   ;;  %v1400_v58 = vunpack.c.l.b16 %v5632_v49 }
  0xb7   : > { %1635 = vrot.lane.b32.xlu1 %v1634_v39, %s6037_s11  ;;  %v1882_v55 = vpack.c.b16 %v1881_v51, %v1881_v51  ;;  %v2134_v56 = vrot.slane %v2129_v47, 5  ;;  %v5634_v57 = vld [vmem:[%s6131_s5 + $0x50] ss:$0 sps:$4 sm:$0x44]   ;;  %v1401_v0 = vunpack.c.l.b16 %v5633_v54 }
  0xb8   : > { %v6486_v34 = vpop.permute.xlu0 %342  ;;  %v2133_v60 = vsel %vm502_vm3, %v2132_v53, %v2131_v48  ;;  %v2136_v62 = vrot.slane %v2130_v52, 4  ;;  %v5635_v63 = vld [vmem:[%s6131_s5 + $0x58] ss:$0 sps:$4 sm:$0x44]   ;;  %v1402_v3 = vunpack.c.l.b16 %v5634_v57  ;;  %v1404_v4 = vrot.slane %v1400_v58, 4 }
  0xb9   : > { %1883 = vrot.lane.b32.xlu0 %v1882_v55, %s6038_s12  ;;  %v2135_v1 = vsel %vm505_vm4, %v2134_v56, %v2133_v60  ;;  %v5636_v5 = vld [vmem:[%s6131_s5 + $0x60] ss:$0 sps:$4 sm:$0x44]   ;;  %v1403_v7 = vunpack.c.l.b16 %v5635_v63  ;;  %v1405_v8 = vrot.slane %v1401_v0, 3 }
  0xba   : > { %v2137_v6 = vsel %vm508_vm5, %v2136_v62, %v2135_v1  ;;  %v5637_v9 = vld [vmem:[%s6131_s5 + $0x68] ss:$0 sps:$4 sm:$0x44]   ;;  %v1407_v11 = vrot.slane %v1402_v3, 2  ;;  %v1655_v17 = vunpack.c.l.b16 %v5636_v5 }
  0xbb   : > { %v2138_v10 = vpack.c.b16 %v2137_v6, %v2137_v6  ;;  %v5638_v12 = vld [vmem:[%s6131_s5 + $0x70] ss:$0 sps:$4 sm:$0x44]   ;;  %v1406_v14 = vsel %vm239_vm0, %v1405_v8, %v1404_v4  ;;  %v1409_v15 = vrot.slane %v1403_v7, 1  ;;  %v1656_v18 = vunpack.c.l.b16 %v5637_v9 }
  0xbc   : > { %v6496_v50 = vpop.permute.xlu1 %608  ;;  %v5639_v16 = vld [vmem:[%s6131_s5 + $0x78] ss:$0 sps:$4 sm:$0x44]   ;;  %v1408_v19 = vsel %vm242_vm1, %v1407_v11, %v1406_v14  ;;  %v1657_v20 = vunpack.c.l.b16 %v5638_v12  ;;  %v5640_v22 = vld [vmem:[%s6131_s5 + $0x40] ss:$0 sps:$4 sm:$0x44]  }
  0xbd   : > { %2139 = vrot.lane.b32.xlu1 %v2138_v10, %s6038_s12  ;;  %v5641_v23 = vld [vmem:[%s6131_s5 + $0x48] ss:$0 sps:$4 sm:$0x44]   ;;  %v1410_v26 = vsel %vm245_vm2, %v1409_v15, %v1408_v19  ;;  %v1658_v27 = vunpack.c.l.b16 %v5639_v16  ;;  %v1659_v28 = vrot.slane %v1656_v18, 7  ;;  %v1903_v33 = vunpack.c.l.b16 %v5640_v22 }
  0xbe   : > { %v5642_v29 = vld [vmem:[%s6131_s5 + $0x50] ss:$0 sps:$4 sm:$0x44]   ;;  %v1411_v30 = vpack.c.b16 %v1410_v26, %v1410_v26  ;;  %v1661_v31 = vrot.slane %v1657_v20, 6  ;;  %v1904_v35 = vunpack.c.l.b16 %v5641_v23 }
  0xbf   : > { %v865_v59 = vpop.permute.xlu0 %864  ;;  %v5643_v32 = vld [vmem:[%s6131_s5 + $0x58] ss:$0 sps:$4 sm:$0x44]   ;;  %v1660_v36 = vsel %vm502_vm3, %v1659_v28, %v1655_v17  ;;  %v1663_v37 = vrot.slane %v1658_v27, 5  ;;  %v1905_v38 = vunpack.c.l.b16 %v5642_v29  ;;  %v1907_v41 = vrot.slane %v1903_v33, 4 }
  0xc0   : > { %1412 = vrot.lane.b32.xlu0 %v1411_v30, %s6039_s13  ;;  %v1662_v39 = vsel %vm505_vm4, %v1661_v31, %v1660_v36  ;;  %v1906_v40 = vunpack.c.l.b16 %v5643_v32  ;;  %v1908_v42 = vrot.slane %v1904_v35, 3  ;;  %v5644_v43 = vld [vmem:[%s6131_s5 + $0x60] ss:$0 sps:$4 sm:$0x44]   ;;  %868 = vst.msk [vmem:[#allocation2] sm:$0x30] %vm7457_vm12, %v865_v59 }
  0xc1   : > { %v1664_v45 = vsel %vm508_vm5, %v1663_v37, %v1662_v39  ;;  %v1910_v46 = vrot.slane %v1905_v38, 2  ;;  %v5645_v47 = vld [vmem:[%s6131_s5 + $0x68] ss:$0 sps:$4 sm:$0x44]   ;;  %v2159_v56 = vunpack.c.h.b16 %v5644_v43  ;;  %vm675_vm12 = vcmask 388418  }
  0xc2   : > { %v1665_v48 = vpack.c.b16 %v1664_v45, %v1664_v45  ;;  %v1909_v49 = vsel %vm239_vm0, %v1908_v42, %v1907_v41  ;;  %v1912_v51 = vrot.slane %v1906_v40, 1  ;;  %v5646_v52 = vld [vmem:[%s6131_s5 + $0x70] ss:$0 sps:$4 sm:$0x44]   ;;  %v2160_v57 = vunpack.c.h.b16 %v5645_v47 }
  0xc3   : > { %v1129_v13 = vpop.permute.xlu1 %1128  ;;  %v1911_v54 = vsel %vm242_vm1, %v1910_v46, %v1909_v49  ;;  %v5647_v55 = vld [vmem:[%s6131_s5 + $0x78] ss:$0 sps:$4 sm:$0x44]   ;;  %v2161_v59 = vunpack.c.h.b16 %v5646_v52  ;;  %v5648_v60 = vld [vmem:[%s6131_s5] ss:$0 sps:$4 sm:$0x11]  }
  0xc4   : > { %1666 = vrot.lane.b32.xlu1 %v1665_v48, %s6039_s13  ;;  %v1913_v58 = vsel %vm245_vm2, %v1912_v51, %v1911_v54  ;;  %1132 = vst.msk [vmem:[#allocation2] sm:$0xc0] %vm7453_vm13, %v1129_v13  ;;  %v2162_v63 = vunpack.c.h.b16 %v5647_v55  ;;  %v2163_v0 = vrot.slane %v2160_v57, 7  ;;  %v5649_v1 = vld [vmem:[%s6131_s5 + $0x8] ss:$0 sps:$4 sm:$0x11]   ;;  %v2783_v5 = vunpack.c.l.b16 %v5648_v60 }
  0xc5   : > { %v1914_v62 = vpack.c.b16 %v1913_v58, %v1913_v58  ;;  %v2165_v3 = vrot.slane %v2161_v59, 6  ;;  %v5650_v4 = vld [vmem:[%s6131_s5 + $0x10] ss:$0 sps:$4 sm:$0x11]   ;;  %v2784_v10 = vunpack.c.l.b16 %v5649_v1  ;;  %vm578_vm13 = vcmask 191618  }
  0xc6   : > { %v6515_v24 = vpop.permute.xlu0 %375  ;;  %v2164_v7 = vsel %vm502_vm3, %v2163_v0, %v2159_v56  ;;  %v2167_v8 = vrot.slane %v2162_v63, 5  ;;  %v5651_v9 = vld [vmem:[%s6131_s5 + $0x18] ss:$0 sps:$4 sm:$0x11]   ;;  %v2785_v12 = vunpack.c.l.b16 %v5650_v4  ;;  %v2787_v13 = vrot.slane %v2783_v5, 1 }
  0xc7   : > { %1915 = vrot.lane.b32.xlu0 %v1914_v62, %s6040_s14  ;;  %v2166_v11 = vsel %vm505_vm4, %v2165_v3, %v2164_v7  ;;  %v5652_v14 = vld [vmem:[%s6131_s5 + $0x20] ss:$0 sps:$4 sm:$0x11]   ;;  %v2786_v17 = vunpack.c.l.b16 %v5651_v9  ;;  %v5653_v18 = vld [vmem:[%s6131_s5 + $0x28] ss:$0 sps:$4 sm:$0x11]  }
  0xc8   : > { %v2168_v16 = vsel %vm508_vm5, %v2167_v8, %v2166_v11  ;;  %v5654_v19 = vld [vmem:[%s6131_s5 + $0x30] ss:$0 sps:$4 sm:$0x11]   ;;  %v2788_v22 = vsel %vm239_vm0, %v2784_v10, %v2787_v13  ;;  %v2789_v23 = vrot.slane %v2785_v12, 7  ;;  %v3035_v27 = vunpack.c.l.b16 %v5652_v14 }
  0xc9   : > { %v2169_v20 = vpack.c.b16 %v2168_v16, %v2168_v16  ;;  %v5655_v26 = vld [vmem:[%s6131_s5 + $0x38] ss:$0 sps:$4 sm:$0x11]   ;;  %v2791_v28 = vrot.slane %v2786_v17, 6  ;;  %v3036_v29 = vunpack.c.l.b16 %v5653_v18  ;;  %v3037_v30 = vunpack.c.l.b16 %v5654_v19 }
  0xca   : > { %v6525_v44 = vpop.permute.xlu1 %640  ;;  %v2790_v31 = vsel %vm242_vm1, %v2789_v23, %v2788_v22  ;;  %v3038_v32 = vunpack.c.l.b16 %v5655_v26  ;;  %v3039_v33 = vrot.slane %v3035_v27, 5  ;;  %v5656_v35 = vld [vmem:[%s6131_s5 + $0x40] ss:$0 sps:$4 sm:$0x44]  }
  0xcb   : > { %2170 = vrot.lane.b32.xlu1 %v2169_v20, %s6040_s14  ;;  %v2792_v37 = vsel %vm245_vm2, %v2791_v28, %v2790_v31  ;;  %v3040_v38 = vrot.slane %v3036_v29, 4  ;;  %v3042_v39 = vrot.slane %v3037_v30, 3  ;;  %v5657_v40 = vld [vmem:[%s6131_s5 + $0x48] ss:$0 sps:$4 sm:$0x44]   ;;  %v1432_v45 = vunpack.c.l.b16 %v5656_v35 }
  0xcc   : > { %v2793_v41 = vpack.c.b16 %v2792_v37, %v2792_v37  ;;  %v3044_v42 = vrot.slane %v3038_v32, 2  ;;  %v5658_v43 = vld [vmem:[%s6131_s5 + $0x50] ss:$0 sps:$4 sm:$0x44]   ;;  %v1433_v48 = vunpack.c.l.b16 %v5657_v40 }
  0xcd   : > { %v898_v53 = vpop.permute.xlu0 %897  ;;  %v3041_v46 = vsel %vm502_vm3, %v3040_v38, %v3039_v33  ;;  %v5659_v47 = vld [vmem:[%s6131_s5 + $0x58] ss:$0 sps:$4 sm:$0x44]   ;;  %v1434_v51 = vunpack.c.l.b16 %v5658_v43  ;;  %v1436_v52 = vrot.slane %v1432_v45, 5 }
  0xce   : > { %901 = vst.msk [vmem:[#allocation2] sm:$0x30] %vm7448_vm14, %v898_v53  ;;  %2794 = vrot.lane.b32.xlu0 %v2793_v41, %s6032_s6  ;;  %v3043_v49 = vsel %vm505_vm4, %v3042_v39, %v3041_v46  ;;  %v1435_v55 = vunpack.c.l.b16 %v5659_v47  ;;  %v1437_v53 = vrot.slane %v1433_v48, 4  ;;  %v5660_v56 = vld [vmem:[%s6131_s5 + $0x60] ss:$0 sps:$4 sm:$0x44]  }
  0xcf   : > { %v3045_v54 = vsel %vm508_vm5, %v3044_v42, %v3043_v49  ;;  %v1439_v58 = vrot.slane %v1434_v51, 3  ;;  %v5661_v59 = vld [vmem:[%s6131_s5 + $0x68] ss:$0 sps:$4 sm:$0x44]   ;;  %v1686_v1 = vunpack.c.l.b16 %v5660_v56  ;;  %vm7455_vm14 = vcmask 255168  }
  0xd0   : > { %v3046_v57 = vpack.c.b16 %v3045_v54, %v3045_v54  ;;  %v1438_v62 = vsel %vm239_vm0, %v1437_v53, %v1436_v52  ;;  %v1441_v63 = vrot.slane %v1435_v55, 2  ;;  %v5662_v0 = vld [vmem:[%s6131_s5 + $0x70] ss:$0 sps:$4 sm:$0x44]   ;;  %v1687_v5 = vunpack.c.l.b16 %v5661_v59 }
  0xd1   : > { %v1161_v6 = vpop.permute.xlu1 %1160  ;;  %v1440_v3 = vsel %vm242_vm1, %v1439_v58, %v1438_v62  ;;  %v5663_v4 = vld [vmem:[%s6131_s5 + $0x78] ss:$0 sps:$4 sm:$0x44]   ;;  %v1688_v7 = vunpack.c.l.b16 %v5662_v0  ;;  %v1690_v8 = vrot.slane %v1686_v1, 1 }
  0xd2   : > { %1164 = vst.msk [vmem:[#allocation2] sm:$0xc0] %vm7447_vm15, %v1161_v6  ;;  %3047 = vrot.lane.b32.xlu1 %v3046_v57, %s6032_s6  ;;  %v1442_v6 = vsel %vm245_vm2, %v1441_v63, %v1440_v3  ;;  %v5664_v9 = vld [vmem:[%s6131_s5 + $0x40] ss:$0 sps:$4 sm:$0x44]   ;;  %v1689_v11 = vunpack.c.l.b16 %v5663_v4  ;;  %vm7454_vm15 = vcmask 189568  }
  0xd3   : > { %v1443_v10 = vpack.c.b16 %v1442_v6, %v1442_v6  ;;  %v5665_v12 = vld [vmem:[%s6131_s5 + $0x48] ss:$0 sps:$4 sm:$0x44]   ;;  %v5666_v13 = vld [vmem:[%s6131_s5 + $0x50] ss:$0 sps:$4 sm:$0x44]   ;;  %v1935_v18 = vunpack.c.l.b16 %v5664_v9 }
  0xd4   : > { %v1791_v15 = vpop.permute.xlu0 %1790  ;;  %v1692_v16 = vrot.slane %v1688_v7, 7  ;;  %v5667_v17 = vld [vmem:[%s6131_s5 + $0x58] ss:$0 sps:$4 sm:$0x44]   ;;  %v1694_v19 = vrot.slane %v1689_v11, 6  ;;  %v1936_v20 = vunpack.c.l.b16 %v5665_v12  ;;  %v1937_v22 = vunpack.c.l.b16 %v5666_v13 }
  0xd5   : > { %1793 = vst.msk [vmem:[#allocation2 + $0x8] sm:$0x30] %vm7444_vm6, %v1791_v15  ;;  %v1691_v15 = vsel %vm502_vm3, %v1687_v5, %v1690_v8  ;;  %1444 = vrot.lane.b32.xlu0 %v1443_v10, %s6041_s20  ;;  %v1938_v27 = vunpack.c.l.b16 %v5667_v17  ;;  %v1939_v28 = vrot.slane %v1935_v18, 5  ;;  %v5668_v29 = vld [vmem:[%s6131_s5 + $0x60] ss:$0 sps:$4 sm:$0x44]  }
  0xd6   : > { %v1693_v26 = vsel %vm505_vm4, %v1692_v16, %v1691_v15  ;;  %v1940_v31 = vrot.slane %v1936_v20, 4  ;;  %v1942_v32 = vrot.slane %v1937_v22, 3  ;;  %v5669_v33 = vld [vmem:[%s6131_s5 + $0x68] ss:$0 sps:$4 sm:$0x44]   ;;  %vm7445_vm6 = vcmask 392518  }
  0xd7   : > { %v1695_v30 = vsel %vm508_vm5, %v1694_v19, %v1693_v26  ;;  %v5670_v37 = vld [vmem:[%s6131_s5 + $0x70] ss:$0 sps:$4 sm:$0x44]   ;;  %v2190_v38 = vunpack.c.l.b16 %v5668_v29  ;;  %v5671_v40 = vld [vmem:[%s6131_s5 + $0x78] ss:$0 sps:$4 sm:$0x44]   ;;  %v2191_v41 = vunpack.c.l.b16 %v5669_v33 }
  0xd8   : > { %v2044_v36 = vpop.permute.xlu1 %2043  ;;  %v1696_v35 = vpack.c.b16 %v1695_v30, %v1695_v30  ;;  %v1941_v39 = vsel %vm239_vm0, %v1940_v31, %v1939_v28  ;;  %v2192_v45 = vunpack.c.l.b16 %v5670_v37  ;;  %v5672_v47 = vld [vmem:[%s6131_s5] ss:$0 sps:$4 sm:$0x22]   ;;  %v2193_v49 = vunpack.c.l.b16 %v5671_v40  ;;  %v5673_v51 = vld [vmem:[%s6131_s5 + $0x8] ss:$0 sps:$4 sm:$0x22]  }
  0xd9   : > { %2046 = vst.msk [vmem:[#allocation2 + $0x8] sm:$0xc0] %vm7443_vm7, %v2044_v36  ;;  %vm7446_vm7 = vcmask 390468   ;;  %v1944_v36 = vrot.slane %v1938_v27, 2  ;;  %v1943_v43 = vsel %vm242_vm1, %v1942_v32, %v1941_v39  ;;  %v2194_v46 = vrot.slane %v2190_v38, 1 }
  0xda   : > { %1697 = vrot.lane.b32.xlu1 %v1696_v35, %s6041_s20  ;;  %v5674_v52 = vld [vmem:[%s6131_s5 + $0x10] ss:$0 sps:$4 sm:$0x22]   ;;  %v2196_v53 = vrot.slane %v2192_v45, 7  ;;  %v2312_v57 = vunpack.c.l.b16 %v5672_v47  ;;  %v2198_v58 = vrot.slane %v2193_v49, 6  ;;  %v2313_v59 = vunpack.c.l.b16 %v5673_v51 }
  0xdb   : > { %v1945_v48 = vsel %vm245_vm2, %v1944_v36, %v1943_v43  ;;  %v2195_v55 = vsel %vm502_vm3, %v2191_v41, %v2194_v46  ;;  %v5675_v56 = vld [vmem:[%s6131_s5 + $0x18] ss:$0 sps:$4 sm:$0x22]   ;;  %v2314_v63 = vunpack.c.l.b16 %v5674_v52  ;;  %v5676_v3 = vld [vmem:[%s6131_s5 + $0x20] ss:$0 sps:$4 sm:$0x22]  }
  0xdc   : > { %v6566_v60 = vpop.permute.xlu0 %408  ;;  %v1946_v54 = vpack.c.b16 %v1945_v48, %v1945_v48  ;;  %v2197_v62 = vsel %vm505_vm4, %v2196_v53, %v2195_v55  ;;  %v2315_v0 = vunpack.c.l.b16 %v5675_v56  ;;  %v2316_v1 = vrot.slane %v2312_v57, 2  ;;  %v5677_v6 = vld [vmem:[%s6131_s5 + $0x28] ss:$0 sps:$4 sm:$0x22]  }
  0xdd   : > { %v2199_v4 = vsel %vm508_vm5, %v2198_v58, %v2197_v62  ;;  %v2317_v5 = vrot.slane %v2313_v59, 1  ;;  %v5678_v9 = vld [vmem:[%s6131_s5 + $0x30] ss:$0 sps:$4 sm:$0x22]   ;;  %v2563_v10 = vunpack.c.l.b16 %v5676_v3  ;;  %v2564_v13 = vunpack.c.l.b16 %v5677_v6 }
  0xde   : > { %1947 = vrot.lane.b32.xlu0 %v1946_v54, %s6042_s22  ;;  %v2200_v7 = vpack.c.b16 %v2199_v4, %v2199_v4  ;;  %v2320_v8 = vrot.slane %v2315_v0, 7  ;;  %v5679_v12 = vld [vmem:[%s6131_s5 + $0x38] ss:$0 sps:$4 sm:$0x22]   ;;  %v2565_v16 = vunpack.c.l.b16 %v5678_v9 }
  0xdf   : > { %v2318_v11 = vsel %vm239_vm0, %v2317_v5, %v2316_v1  ;;  %v2567_v17 = vrot.slane %v2563_v10, 6  ;;  %v5680_v18 = vld [vmem:[%s6131_s5] ss:$0 sps:$4 sm:$0x22]   ;;  %v2566_v20 = vunpack.c.l.b16 %v5679_v12  ;;  %v2568_v22 = vrot.slane %v2564_v13, 5 }
  0xe0   : > { %v6577_v14 = vpop.permute.xlu1 %672  ;;  %2201 = vrot.lane.b32.xlu1 %v2200_v7, %s6042_s22  ;;  %v2319_v15 = vsel %vm242_vm1, %v2314_v63, %v2318_v11  ;;  %v2570_v27 = vrot.slane %v2565_v16, 4  ;;  %v5682_v28 = vld [vmem:[%s6131_s5 + $0x10] ss:$0 sps:$4 sm:$0x22]   ;;  %v2814_v29 = vunpack.c.l.b16 %v5680_v18 }
  0xe1   : > { %v2321_v19 = vsel %vm245_vm2, %v2320_v8, %v2319_v15  ;;  %v2569_v30 = vsel %vm502_vm3, %v2568_v22, %v2567_v17  ;;  %v2572_v31 = vrot.slane %v2566_v20, 3  ;;  %v5683_v32 = vld [vmem:[%s6131_s5 + $0x18] ss:$0 sps:$4 sm:$0x22]   ;;  %v2816_v38 = vunpack.c.l.b16 %v5682_v28 }
  0xe2   : > { %v2322_v26 = vpack.c.b16 %v2321_v19, %v2321_v19  ;;  %v2571_v37 = vsel %vm505_vm4, %v2570_v27, %v2569_v30  ;;  %v2818_v39 = vrot.slane %v2814_v29, 2  ;;  %v5684_v40 = vld [vmem:[%s6131_s5 + $0x20] ss:$0 sps:$4 sm:$0x22]  }
  0xe3   : > { %v2573_v41 = vsel %vm508_vm5, %v2572_v31, %v2571_v37  ;;  %v5685_v45 = vld [vmem:[%s6131_s5 + $0x28] ss:$0 sps:$4 sm:$0x22]   ;;  %v5686_v47 = vld [vmem:[%s6131_s5 + $0x30] ss:$0 sps:$4 sm:$0x22]   ;;  %v3067_v49 = vunpack.c.l.b16 %v5684_v40 }
  0xe4   : > { %v931_v23 = vpop.permute.xlu0 %930  ;;  %2323 = vrot.lane.b32.xlu0 %v2322_v26, %s6033_s7  ;;  %v2574_v46 = vpack.c.b16 %v2573_v41, %v2573_v41  ;;  %v5687_v48 = vld [vmem:[%s6131_s5 + $0x38] ss:$0 sps:$4 sm:$0x22]   ;;  %v3068_v54 = vunpack.c.l.b16 %v5685_v45  ;;  %v3069_v53 = vunpack.c.l.b16 %v5686_v47  ;;  %v5688_v58 = vld [vmem:[%s6131_s5] ss:$0 sps:$4 sm:$0x11]  }
  0xe5   : > { %934 = vst.msk [vmem:[#allocation2] sm:$0x30] %vm7446_vm7, %v931_v23  ;;  %v5681_v23 = vld [vmem:[%s6131_s5 + $0x8] ss:$0 sps:$4 sm:$0x22]   ;;  %v3070_v56 = vunpack.c.l.b16 %v5687_v48  ;;  %v3071_v57 = vrot.slane %v3067_v49, 6  ;;  %v234_v9 = vunpack.c.l.b16 %v5688_v58 }
  0xe6   : > { %v2815_v33 = vunpack.c.l.b16 %v5681_v23  ;;  %2575 = vrot.lane.b32.xlu1 %v2574_v46, %s6033_s7  ;;  %v3072_v62 = vrot.slane %v3068_v54, 5  ;;  %v5689_v63 = vld [vmem:[%s6131_s5 + $0x8] ss:$0 sps:$4 sm:$0x11]   ;;  %v3074_v4 = vrot.slane %v3069_v53, 4  ;;  %vm7452_vm7 = vcmask 123968  }
  0xe7   : > { %v1193_v42 = vpop.permute.xlu1 %1192  ;;  %v3076_v5 = vrot.slane %v3070_v56, 3  ;;  %v5690_v6 = vld [vmem:[%s6131_s5 + $0x10] ss:$0 sps:$4 sm:$0x11]   ;;  %v235_v10 = vunpack.c.l.b16 %v5689_v63 }
  0xe8   : > { %1196 = vst.msk [vmem:[#allocation2] sm:$0xc0] %vm7445_vm6, %v1193_v42  ;;  %v2817_v42 = vunpack.c.l.b16 %v5683_v32  ;;  %v2819_v43 = vrot.slane %v2815_v33, 1  ;;  %vm7451_vm6 = vcmask 58368   ;;  %v3073_v7 = vsel %vm502_vm3, %v3072_v62, %v3071_v57 }
  0xe9   : > { %v5691_v8 = vld [vmem:[%s6131_s5 + $0x18] ss:$0 sps:$4 sm:$0x11]   ;;  %v3075_v11 = vsel %vm505_vm4, %v3074_v4, %v3073_v7  ;;  %v236_v12 = vunpack.c.l.b16 %v5690_v6  ;;  %v238_v16 = vrot.slane %v235_v10, 7 }
  0xea   : > { %v6615_v35 = vpop.permute.xlu0 %1318  ;;  %v2820_v51 = vsel %vm239_vm0, %v2819_v43, %v2818_v39  ;;  %v2822_v52 = vrot.slane %v2817_v42, 7  ;;  %v3077_v13 = vsel %vm508_vm5, %v3076_v5, %v3075_v11  ;;  %v237_v15 = vunpack.c.l.b16 %v5691_v8  ;;  %v5692_v17 = vld [vmem:[%s6131_s5 + $0x40] ss:$0 sps:$4 sm:$0x88]  }
  0xeb   : > { %v2821_v55 = vsel %vm242_vm1, %v2816_v38, %v2820_v51  ;;  %v3078_v18 = vpack.c.b16 %v3077_v13, %v3077_v13  ;;  %v241_v19 = vrot.slane %v236_v12, 6  ;;  %v5693_v20 = vld [vmem:[%s6131_s5 + $0x48] ss:$0 sps:$4 sm:$0x88]   ;;  %v240_v22 = vsel %vm239_vm0, %v238_v16, %v234_v9 }
  0xec   : > { %v2823_v59 = vsel %vm245_vm2, %v2822_v52, %v2821_v55  ;;  %v244_v23 = vrot.slane %v237_v15, 5  ;;  %v5694_v26 = vld [vmem:[%s6131_s5 + $0x50] ss:$0 sps:$4 sm:$0x88]   ;;  %v1464_v27 = vunpack.c.l.b16 %v5692_v17  ;;  %v1465_v30 = vunpack.c.l.b16 %v5693_v20 }
  0xed   : > { %v2824_v3 = vpack.c.b16 %v2823_v59, %v2823_v59  ;;  %3079 = vrot.lane.b32.xlu1 %v3078_v18, %s6034_s8  ;;  %v243_v28 = vsel %vm242_vm1, %v241_v19, %v240_v22  ;;  %v5695_v29 = vld [vmem:[%s6131_s5 + $0x58] ss:$0 sps:$4 sm:$0x88]   ;;  %v5696_v31 = vld [vmem:[%s6131_s5 + $0x60] ss:$0 sps:$4 sm:$0x88]   ;;  %v1466_v33 = vunpack.c.l.b16 %v5694_v26 }
  0xee   : > { %v6617_v36 = vpop.permute.xlu1 %1571  ;;  %v246_v32 = vsel %vm245_vm2, %v244_v23, %v243_v28  ;;  %v1468_v37 = vrot.slane %v1464_v27, 6  ;;  %v5697_v38 = vld [vmem:[%s6131_s5 + $0x68] ss:$0 sps:$4 sm:$0x88]   ;;  %v1467_v40 = vunpack.c.l.b16 %v5695_v29  ;;  %v1469_v41 = vrot.slane %v1465_v30, 5 }
  0xef   : > { %2825 = vrot.lane.b32.xlu0 %v2824_v3, %s6034_s8  ;;  %v247_v39 = vpack.c.b16 %v246_v32, %v246_v32  ;;  %v5698_v42 = vld [vmem:[%s6131_s5 + $0x70] ss:$0 sps:$4 sm:$0x88]   ;;  %v1717_v43 = vunpack.c.l.b16 %v5696_v31  ;;  %v1471_v45 = vrot.slane %v1466_v33, 4  ;;  %v1718_v47 = vunpack.c.l.b16 %v5697_v38 }
  0xf0   : > { %v5699_v46 = vld [vmem:[%s6131_s5 + $0x78] ss:$0 sps:$4 sm:$0x88]   ;;  %v1470_v48 = vsel %vm239_vm0, %v1469_v41, %v1468_v37  ;;  %v1473_v49 = vrot.slane %v1467_v40, 3  ;;  %v1719_v51 = vunpack.c.l.b16 %v5698_v42 }
  0xf1   : > { %v1822_v0 = vpop.permute.xlu0 %1821  ;;  %250 = vst.msk [vmem:[#allocation2] sm:$0x3] %vm7451_vm6, %v247_v39  ;;  %v1721_v52 = vrot.slane %v1717_v43, 2  ;;  %v1472_v54 = vsel %vm242_vm1, %v1471_v45, %v1470_v48  ;;  %v1720_v55 = vunpack.c.l.b16 %v5699_v46  ;;  %v1722_v53 = vrot.slane %v1718_v47, 1 }
  0xf2   : > { %1824 = vst.msk [vmem:[#allocation2 + $0x8] sm:$0x30] %vm7450_vm8, %v1822_v0  ;;  %vm7458_vm8 = vcmask 386368   ;;  %v5700_v56 = vld [vmem:[%s6131_s5 + $0x20] ss:$0 sps:$4 sm:$0x11]   ;;  %v1474_v57 = vsel %vm245_vm2, %v1473_v49, %v1472_v54 }
  0xf3   : > { %282 = vst.msk [vmem:[#allocation2] sm:$0x3] %vm7452_vm7, %v6395_v61  ;;  %v5701_v58 = vld [vmem:[%s6131_s5 + $0x28] ss:$0 sps:$4 sm:$0x11]   ;;  %vm512_vm6 = vcmask 60418   ;;  %v1475_v62 = vpack.c.b16 %v1474_v57, %v1474_v57  ;;  %v1723_v63 = vsel %vm502_vm3, %v1722_v53, %v1721_v52  ;;  %v496_v61 = vunpack.c.l.b16 %v5700_v56 }
  0xf4   : > { %v5702_v59 = vld [vmem:[%s6131_s5 + $0x30] ss:$0 sps:$4 sm:$0x11]   ;;  %314 = vst.msk [vmem:[#allocation2] sm:$0x3] %vm7454_vm15, %v6434_v2  ;;  %v1725_v0 = vrot.slane %v1720_v55, 7  ;;  %v1724_v4 = vsel %vm505_vm4, %v1719_v51, %v1723_v63  ;;  %v497_v5 = vunpack.c.l.b16 %v5701_v58 }
  0xf5   : > { %v2076_v1 = vpop.permute.xlu1 %2075  ;;  %vm545_vm7 = vcmask 126018   ;;  %346 = vst.msk [vmem:[#allocation2] sm:$0x3] %vm7455_vm14, %v6486_v34  ;;  %v498_v6 = vunpack.c.l.b16 %v5702_v59  ;;  %v5704_v7 = vld [vmem:[%s6131_s5 + $0x40] ss:$0 sps:$4 sm:$0x88]   ;;  %1476 = vrot.lane.b32.xlu0 %v1475_v62, %s6043_s23 }
  0xf6   : > { %2078 = vst.msk [vmem:[#allocation2 + $0x8] sm:$0xc0] %vm7449_vm9, %v2076_v1  ;;  %vm7456_vm9 = vcmask 320768   ;;  %v5703_v1 = vld [vmem:[%s6131_s5 + $0x38] ss:$0 sps:$4 sm:$0x11]   ;;  %v1726_v8 = vsel %vm508_vm5, %v1725_v0, %v1724_v4 }
  0xf7   : > { %379 = vst.msk [vmem:[#allocation2] sm:$0x3] %vm7456_vm9, %v6515_v24  ;;  %vm7459_vm15 = vcmask 451968   ;;  %v499_v34 = vunpack.c.l.b16 %v5703_v1  ;;  %v500_v9 = vrot.slane %v496_v61, 4  ;;  %vm611_vm14 = vcmask 257218  }
  0xf8   : > { %v442_v3 = vpop.permute.xlu0 %441  ;;  %v5705_v10 = vld [vmem:[%s6131_s5 + $0x48] ss:$0 sps:$4 sm:$0x88]   ;;  %412 = vst.msk [vmem:[#allocation2] sm:$0x3] %vm7458_vm8, %v6566_v60  ;;  %v1727_v11 = vpack.c.b16 %v1726_v8, %v1726_v8  ;;  %v501_v12 = vrot.slane %v497_v5, 3  ;;  %v1967_v24 = vunpack.c.l.b16 %v5704_v7 }
  0xf9   : > { %v504_v13 = vrot.slane %v498_v6, 2  ;;  %v5706_v15 = vld [vmem:[%s6131_s5 + $0x50] ss:$0 sps:$4 sm:$0x88]   ;;  %vm643_vm9 = vcmask 322818   ;;  %v507_v16 = vrot.slane %v499_v34, 1  ;;  %v1968_v18 = vunpack.c.l.b16 %v5705_v10 }
  0xfa   : > { %445 = vst.msk [vmem:[#allocation2] sm:$0x3] %vm7459_vm15, %v442_v3  ;;  %v5707_v17 = vld [vmem:[%s6131_s5 + $0x58] ss:$0 sps:$4 sm:$0x88]   ;;  %1728 = vrot.lane.b32.xlu1 %v1727_v11, %s6043_s23  ;;  %v503_v19 = vsel %vm502_vm3, %v501_v12, %v500_v9  ;;  %v1969_v60 = vunpack.c.l.b16 %v5706_v15  ;;  %v1971_v20 = vrot.slane %v1967_v24, 6 }
  0xfb   : > { %vm707_vm8 = vcmask 454018   ;;  %v506_v22 = vsel %vm505_vm4, %v504_v13, %v503_v19  ;;  %v1970_v23 = vunpack.c.l.b16 %v5707_v17  ;;  %v1972_v26 = vrot.slane %v1968_v18, 5  ;;  %v5708_v27 = vld [vmem:[%s6131_s5 + $0x60] ss:$0 sps:$4 sm:$0x88]  }
  0xfc   : > { %v6671_v2 = vpop.permute.xlu1 %704  ;;  %v509_v28 = vsel %vm508_vm5, %v507_v16, %v506_v22  ;;  %v1974_v29 = vrot.slane %v1969_v60, 4  ;;  %v5709_v30 = vld [vmem:[%s6131_s5 + $0x68] ss:$0 sps:$4 sm:$0x88]   ;;  %v2221_v40 = vunpack.c.l.b16 %v5708_v27  ;;  %vm7460_vm15 = vcmask 456068  }
  0xfd   : > { %v510_v33 = vpack.c.b16 %v509_v28, %v509_v28  ;;  %v1973_v37 = vsel %vm239_vm0, %v1972_v26, %v1971_v20  ;;  %v1976_v38 = vrot.slane %v1970_v23, 3  ;;  %v5710_v39 = vld [vmem:[%s6131_s5 + $0x70] ss:$0 sps:$4 sm:$0x88]   ;;  %v2222_v43 = vunpack.c.l.b16 %v5709_v30 }
  0xfe   : > { %v1975_v41 = vsel %vm242_vm1, %v1974_v29, %v1973_v37  ;;  %v5711_v42 = vld [vmem:[%s6131_s5 + $0x78] ss:$0 sps:$4 sm:$0x88]   ;;  %v2223_v46 = vunpack.c.l.b16 %v5710_v39  ;;  %v2225_v47 = vrot.slane %v2221_v40, 2 }
  0xff   : > { %513 = vst.msk [vmem:[#allocation2] sm:$0xc] %vm512_vm6, %v510_v33  ;;  %v1977_v45 = vsel %vm245_vm2, %v1976_v38, %v1975_v41  ;;  %v5712_v48 = vld [vmem:[%s6131_s5] ss:$0 sps:$4 sm:$0x22]   ;;  %v2224_v51 = vunpack.c.l.b16 %v5711_v42  ;;  %v2226_v52 = vrot.slane %v2222_v43, 1 }
 0x100   : > { %v964_v31 = vpop.permute.xlu0 %963  ;;  %546 = vst.msk [vmem:[#allocation2] sm:$0xc] %vm545_vm7, %v6409_v21  ;;  %v1978_v49 = vpack.c.b16 %v1977_v45, %v1977_v45  ;;  %v5713_v54 = vld [vmem:[%s6131_s5 + $0x8] ss:$0 sps:$4 sm:$0x22]   ;;  %v2343_v56 = vunpack.c.l.b16 %v5712_v48 }
 0x101   : > { %967 = vst.msk [vmem:[#allocation2] sm:$0x30] %vm7460_vm15, %v964_v31  ;;  %v5714_v55 = vld [vmem:[%s6131_s5 + $0x10] ss:$0 sps:$4 sm:$0x22]   ;;  %v2227_v57 = vsel %vm502_vm3, %v2226_v52, %v2225_v47  ;;  %v2229_v58 = vrot.slane %v2224_v51, 7  ;;  %v2344_v59 = vunpack.c.l.b16 %v5713_v54 }
 0x102   : > { %v5715_v53 = vld [vmem:[%s6131_s5 + $0x18] ss:$0 sps:$4 sm:$0x22]   ;;  %579 = vst.msk [vmem:[#allocation2] sm:$0xc] %vm578_vm13, %v6448_v25  ;;  %1979 = vrot.lane.b32.xlu0 %v1978_v49, %s6044_s28  ;;  %vm7465_vm15 = vcmask 458118   ;;  %v2228_v63 = vsel %vm505_vm4, %v2223_v46, %v2227_v57  ;;  %v2345_v0 = vunpack.c.l.b16 %v5714_v55 }
 0x103   : > { %v1225_v32 = vpop.permute.xlu1 %1224  ;;  %612 = vst.msk [vmem:[#allocation2] sm:$0xc] %vm611_vm14, %v6496_v50  ;;  %v2347_v25 = vrot.slane %v2343_v56, 3  ;;  %v5716_v1 = vld [vmem:[%s6131_s5 + $0x20] ss:$0 sps:$4 sm:$0x22]   ;;  %v2230_v61 = vsel %vm508_vm5, %v2229_v58, %v2228_v63  ;;  %v2346_v50 = vunpack.c.l.b16 %v5715_v53 }
 0x104   : > { %644 = vst.msk [vmem:[#allocation2] sm:$0xc] %vm643_vm9, %v6525_v44  ;;  %v2348_v3 = vrot.slane %v2344_v59, 2  ;;  %v5717_v4 = vld [vmem:[%s6131_s5 + $0x28] ss:$0 sps:$4 sm:$0x22]   ;;  %v2231_v5 = vpack.c.b16 %v2230_v61, %v2230_v61  ;;  %v2595_v8 = vunpack.c.l.b16 %v5716_v1 }
 0x105   : > { %1228 = vst.msk [vmem:[#allocation2] sm:$0xc0] %vm7465_vm15, %v1225_v32  ;;  %v2350_v6 = vrot.slane %v2345_v0, 1  ;;  %v5718_v7 = vld [vmem:[%s6131_s5 + $0x30] ss:$0 sps:$4 sm:$0x22]   ;;  %v2596_v9 = vunpack.c.l.b16 %v5717_v4 }
 0x106   : > { %676 = vst.msk [vmem:[#allocation2] sm:$0xc] %vm675_vm12, %v6577_v14  ;;  %v2349_v44 = vsel %vm239_vm0, %v2348_v3, %v2347_v25  ;;  %v5719_v34 = vld [vmem:[%s6131_s5 + $0x38] ss:$0 sps:$4 sm:$0x22]   ;;  %2232 = vrot.lane.b32.xlu1 %v2231_v5, %s6044_s28  ;;  %v2597_v11 = vunpack.c.l.b16 %v5718_v7  ;;  %v2599_v12 = vrot.slane %v2595_v8, 7 }
 0x107   : > { %v6706_v21 = vpop.permute.xlu0 %1349  ;;  %708 = vst.msk [vmem:[#allocation2] sm:$0xc] %vm707_vm8, %v6671_v2  ;;  %v2351_v10 = vsel %vm242_vm1, %v2350_v6, %v2349_v44  ;;  %v5720_v14 = vld [vmem:[%s6131_s5] ss:$0 sps:$4 sm:$0x22]   ;;  %v2598_v15 = vunpack.c.l.b16 %v5719_v34  ;;  %v2600_v24 = vrot.slane %v2596_v9, 6 }
 0x108   : > { %v2352_v13 = vsel %vm245_vm2, %v2346_v50, %v2351_v10  ;;  %v5721_v16 = vld [vmem:[%s6131_s5 + $0x8] ss:$0 sps:$4 sm:$0x22]   ;;  %v2602_v19 = vrot.slane %v2597_v11, 5  ;;  %v2845_v20 = vunpack.c.l.b16 %v5720_v14  ;;  %vm7467_vm15 = vcmask 521668  }
 0x109   : > { %v2353_v18 = vpack.c.b16 %v2352_v13, %v2352_v13  ;;  %v5722_v60 = vld [vmem:[%s6131_s5 + $0x10] ss:$0 sps:$4 sm:$0x22]   ;;  %v2601_v22 = vsel %vm502_vm3, %v2600_v24, %v2599_v12  ;;  %v2604_v23 = vrot.slane %v2598_v15, 4  ;;  %v2846_v27 = vunpack.c.l.b16 %v5721_v16 }
 0x10a   : > { %v6708_v62 = vpop.permute.xlu1 %1603  ;;  %v5723_v26 = vld [vmem:[%s6131_s5 + $0x18] ss:$0 sps:$4 sm:$0x22]   ;;  %v2603_v28 = vsel %vm505_vm4, %v2602_v19, %v2601_v22  ;;  %v2847_v29 = vunpack.c.l.b16 %v5722_v60  ;;  %v2849_v30 = vrot.slane %v2845_v20, 3 }
 0x10b   : > { %2354 = vrot.lane.b32.xlu0 %v2353_v18, %s6035_s9  ;;  %v5724_v31 = vld [vmem:[%s6131_s5 + $0x20] ss:$0 sps:$4 sm:$0x22]   ;;  %v2605_v32 = vsel %vm508_vm5, %v2604_v23, %v2603_v28  ;;  %v2848_v33 = vunpack.c.l.b16 %v5723_v26  ;;  %v2850_v37 = vrot.slane %v2846_v27, 2 }
 0x10c   : > { %v5725_v38 = vld [vmem:[%s6131_s5 + $0x28] ss:$0 sps:$4 sm:$0x22]   ;;  %v2606_v39 = vpack.c.b16 %v2605_v32, %v2605_v32  ;;  %v2852_v40 = vrot.slane %v2847_v29, 1  ;;  %v3099_v42 = vunpack.c.l.b16 %v5724_v31 }
 0x10d   : > { %v5726_v41 = vld [vmem:[%s6131_s5 + $0x30] ss:$0 sps:$4 sm:$0x22]   ;;  %v2851_v43 = vsel %vm239_vm0, %v2850_v37, %v2849_v30  ;;  %v5727_v45 = vld [vmem:[%s6131_s5 + $0x38] ss:$0 sps:$4 sm:$0x22]   ;;  %v3100_v46 = vunpack.c.l.b16 %v5725_v38 }
 0x10e   : > { %2607 = vrot.lane.b32.xlu1 %v2606_v39, %s6035_s9  ;;  %v2853_v47 = vsel %vm242_vm1, %v2852_v40, %v2851_v43  ;;  %v3101_v48 = vunpack.c.l.b16 %v5726_v41  ;;  %v3103_v49 = vrot.slane %v3099_v42, 7  ;;  %v5728_v51 = vld [vmem:[%s6131_s5 + $0x40] ss:$0 sps:$4 sm:$0x88]   ;;  %v3102_v54 = vunpack.c.l.b16 %v5727_v45 }
 0x10f   : > { %v1853_v17 = vpop.permute.xlu0 %1852  ;;  %v2854_v52 = vsel %vm245_vm2, %v2848_v33, %v2853_v47  ;;  %v3104_v55 = vrot.slane %v3100_v46, 6  ;;  %v5729_v53 = vld [vmem:[%s6131_s5 + $0x48] ss:$0 sps:$4 sm:$0x88]   ;;  %v1496_v59 = vunpack.c.l.b16 %v5728_v51 }
 0x110   : > { %1855 = vst.msk [vmem:[#allocation2 + $0x8] sm:$0x30] %vm7464_vm10, %v1853_v17  ;;  %v2855_v56 = vpack.c.b16 %v2854_v52, %v2854_v52  ;;  %v3106_v57 = vrot.slane %v3101_v48, 5  ;;  %v5730_v58 = vld [vmem:[%s6131_s5 + $0x50] ss:$0 sps:$4 sm:$0x88]   ;;  %v1497_v1 = vunpack.c.l.b16 %v5729_v53 }
 0x111   : > { %v3105_v63 = vsel %vm502_vm3, %v3104_v55, %v3103_v49  ;;  %v3108_v0 = vrot.slane %v3102_v54, 4  ;;  %v5731_v25 = vld [vmem:[%s6131_s5 + $0x58] ss:$0 sps:$4 sm:$0x88]   ;;  %v1498_v50 = vunpack.c.l.b16 %v5730_v58  ;;  %v1500_v3 = vrot.slane %v1496_v59, 7 }
 0x112   : > { %v2108_v2 = vpop.permute.xlu1 %2107  ;;  %2856 = vrot.lane.b32.xlu0 %v2855_v56, %s6036_s10  ;;  %v3107_v61 = vsel %vm505_vm4, %v3106_v57, %v3105_v63  ;;  %v5732_v4 = vld [vmem:[%s6131_s5 + $0x60] ss:$0 sps:$4 sm:$0x88]   ;;  %v1499_v6 = vunpack.c.l.b16 %v5731_v25  ;;  %v1501_v7 = vrot.slane %v1497_v1, 6  ;;  %vm7471_vm10 = vcmask 261318  }
 0x113   : > { %2110 = vst.msk [vmem:[#allocation2 + $0x8] sm:$0xc0] %vm7461_vm11, %v2108_v2  ;;  %v3109_v5 = vsel %vm508_vm5, %v3108_v0, %v3107_v61  ;;  %v5733_v8 = vld [vmem:[%s6131_s5 + $0x68] ss:$0 sps:$4 sm:$0x88]   ;;  %v1503_v34 = vrot.slane %v1498_v50, 5  ;;  %v1748_v10 = vunpack.c.l.b16 %v5732_v4 }
 0x114   : > { %v3110_v44 = vpack.c.b16 %v3109_v5, %v3109_v5  ;;  %v5734_v9 = vld [vmem:[%s6131_s5 + $0x70] ss:$0 sps:$4 sm:$0x88]   ;;  %v1502_v11 = vsel %vm239_vm0, %v1501_v7, %v1500_v3  ;;  %v1505_v12 = vrot.slane %v1499_v6, 4  ;;  %v1749_v13 = vunpack.c.l.b16 %v5733_v8 }
 0x115   : > { %v5735_v14 = vld [vmem:[%s6131_s5 + $0x78] ss:$0 sps:$4 sm:$0x88]   ;;  %v475_v15 = vpop.permute.xlu0 %474  ;;  %v1504_v16 = vsel %vm242_vm1, %v1503_v34, %v1502_v11  ;;  %v1750_v17 = vunpack.c.l.b16 %v5734_v9  ;;  %v1752_v2 = vrot.slane %v1748_v10, 3  ;;  %vm7462_vm11 = vcmask 517568  }
 0x116   : > { %3111 = vrot.lane.b32.xlu1 %v3110_v44, %s6036_s10  ;;  %v5736_v18 = vld [vmem:[%s6131_s5 + $0x40] ss:$0 sps:$4 sm:$0x88]   ;;  %v1506_v19 = vsel %vm245_vm2, %v1505_v12, %v1504_v16  ;;  %v1751_v60 = vunpack.c.l.b16 %v5735_v14  ;;  %v1753_v20 = vrot.slane %v1749_v13, 2  ;;  %478 = vst.msk [vmem:[#allocation2] sm:$0x3] %vm7462_vm11, %v475_v15 }
 0x117   : > { %v5737_v22 = vld [vmem:[%s6131_s5 + $0x48] ss:$0 sps:$4 sm:$0x88]   ;;  %v1507_v23 = vpack.c.b16 %v1506_v19, %v1506_v19  ;;  %v1755_v26 = vrot.slane %v1750_v17, 1  ;;  %v1999_v28 = vunpack.c.l.b16 %v5736_v18  ;;  %vm7463_vm11 = vcmask 519618  }
 0x118   : > { %v5738_v27 = vld [vmem:[%s6131_s5 + $0x50] ss:$0 sps:$4 sm:$0x88]   ;;  %v1754_v29 = vsel %vm502_vm3, %v1753_v20, %v1752_v2  ;;  %v5739_v30 = vld [vmem:[%s6131_s5 + $0x58] ss:$0 sps:$4 sm:$0x88]   ;;  %v2000_v31 = vunpack.c.l.b16 %v5737_v22 }
 0x119   : > { %v737_v24 = vpop.permute.xlu1 %736  ;;  %1508 = vrot.lane.b32.xlu0 %v1507_v23, %s6045_s29  ;;  %v1756_v32 = vsel %vm505_vm4, %v1755_v26, %v1754_v29  ;;  %v2001_v33 = vunpack.c.l.b16 %v5738_v27  ;;  %v2003_v37 = vrot.slane %v1999_v28, 7  ;;  %v5740_v38 = vld [vmem:[%s6131_s5 + $0x60] ss:$0 sps:$4 sm:$0x88]   ;;  %v2002_v40 = vunpack.c.l.b16 %v5739_v30 }
 0x11a   : > { %v1757_v39 = vsel %vm508_vm5, %v1751_v60, %v1756_v32  ;;  %v2004_v41 = vrot.slane %v2000_v31, 6  ;;  %v5741_v42 = vld [vmem:[%s6131_s5 + $0x68] ss:$0 sps:$4 sm:$0x88]   ;;  %v2252_v49 = vunpack.c.l.b16 %v5740_v38  ;;  %740 = vst.msk [vmem:[#allocation2] sm:$0xc] %vm7463_vm11, %v737_v24 }
 0x11b   : > { %v1758_v46 = vpack.c.b16 %v1757_v39, %v1757_v39  ;;  %v2006_v47 = vrot.slane %v2001_v33, 5  ;;  %v5742_v48 = vld [vmem:[%s6131_s5 + $0x70] ss:$0 sps:$4 sm:$0x88]   ;;  %v2008_v52 = vrot.slane %v2002_v40, 4  ;;  %v2253_v55 = vunpack.c.l.b16 %v5741_v42 }
 0x11c   : > { %v2005_v51 = vsel %vm239_vm0, %v2004_v41, %v2003_v37  ;;  %v5743_v54 = vld [vmem:[%s6131_s5 + $0x78] ss:$0 sps:$4 sm:$0x88]   ;;  %v2254_v56 = vunpack.c.l.b16 %v5742_v48  ;;  %v2256_v57 = vrot.slane %v2252_v49, 3  ;;  %vm7470_vm11 = vcmask 259268  }
 0x11d   : > { %v6772_v43 = vpop.permute.xlu0 %996  ;;  %1759 = vrot.lane.b32.xlu1 %v1758_v46, %s6045_s29  ;;  %v2007_v53 = vsel %vm242_vm1, %v2006_v47, %v2005_v51  ;;  %v5744_v58 = vld [vmem:[%s6131_s5] ss:$0 sps:$4 sm:$0x44]   ;;  %v2255_v63 = vunpack.c.l.b16 %v5743_v54  ;;  %v2257_v0 = vrot.slane %v2253_v55, 2 }
 0x11e   : > { %v2009_v59 = vsel %vm245_vm2, %v2008_v52, %v2007_v53  ;;  %v5745_v25 = vld [vmem:[%s6131_s5 + $0x8] ss:$0 sps:$4 sm:$0x44]   ;;  %v2259_v61 = vrot.slane %v2254_v56, 1  ;;  %v2374_v3 = vunpack.c.l.b16 %v5744_v58  ;;  %1000 = vst.msk [vmem:[#allocation2] sm:$0x30] %vm7467_vm15, %v6772_v43 }
 0x11f   : > { %v2010_v1 = vpack.c.b16 %v2009_v59, %v2009_v59  ;;  %v5746_v50 = vld [vmem:[%s6131_s5 + $0x10] ss:$0 sps:$4 sm:$0x44]   ;;  %v2258_v4 = vsel %vm502_vm3, %v2257_v0, %v2256_v57  ;;  %v5747_v5 = vld [vmem:[%s6131_s5 + $0x18] ss:$0 sps:$4 sm:$0x44]   ;;  %v2375_v6 = vunpack.c.l.b16 %v5745_v25 }
 0x120   : > { %v6774_v45 = vpop.permute.xlu1 %1256  ;;  %v2260_v44 = vsel %vm505_vm4, %v2259_v61, %v2258_v4  ;;  %v2376_v34 = vunpack.c.l.b16 %v5746_v50  ;;  %v2378_v9 = vrot.slane %v2374_v3, 4  ;;  %v5748_v10 = vld [vmem:[%s6131_s5 + $0x20] ss:$0 sps:$4 sm:$0x44]   ;;  %v2377_v12 = vunpack.c.l.b16 %v5747_v5 }
 0x121   : > { %2011 = vrot.lane.b32.xlu0 %v2010_v1, %s6046_s30  ;;  %v2261_v11 = vsel %vm508_vm5, %v2255_v63, %v2260_v44  ;;  %v2379_v14 = vrot.slane %v2375_v6, 3  ;;  %v5749_v13 = vld [vmem:[%s6131_s5 + $0x28] ss:$0 sps:$4 sm:$0x44]   ;;  %v2627_v60 = vunpack.c.l.b16 %v5748_v10  ;;  %v6047_v44 = vmov 0.0  }
 0x122   : > { %v2262_v15 = vpack.c.b16 %v2261_v11, %v2261_v11  ;;  %v2381_v16 = vrot.slane %v2376_v34, 2  ;;  %v5750_v17 = vld [vmem:[%s6131_s5 + $0x30] ss:$0 sps:$4 sm:$0x44]   ;;  %v2383_v18 = vrot.slane %v2377_v12, 1  ;;  %v2628_v20 = vunpack.c.l.b16 %v5749_v13  ;;  %5388 = vmatprep.subr.bf16.mxu0 %v6047_v44 }
 0x123   : > { %v2380_v2 = vsel %vm239_vm0, %v2379_v14, %v2378_v9  ;;  %v5751_v19 = vld [vmem:[%s6131_s5 + $0x38] ss:$0 sps:$4 sm:$0x44]   ;;  %v2629_v22 = vunpack.c.l.b16 %v5750_v17  ;;  %v5752_v23 = vld [vmem:[%s6131_s5] ss:$0 sps:$4 sm:$0x44]  }
 0x124   : > { %v6787_v7 = vpop.permute.xlu0 %1380  ;;  %2263 = vrot.lane.b32.xlu1 %v2262_v15, %s6046_s30  ;;  %v2382_v24 = vsel %vm242_vm1, %v2381_v16, %v2380_v2  ;;  %v5753_v26 = vld [vmem:[%s6131_s5 + $0x8] ss:$0 sps:$4 sm:$0x44]   ;;  %v2630_v28 = vunpack.c.l.b16 %v5751_v19  ;;  %v2631_v29 = vrot.slane %v2628_v20, 7  ;;  %v2876_v39 = vunpack.c.l.b16 %v5752_v23 }
 0x125   : > { %v2384_v27 = vsel %vm245_vm2, %v2383_v18, %v2382_v24  ;;  %v5754_v30 = vld [vmem:[%s6131_s5 + $0x10] ss:$0 sps:$4 sm:$0x44]   ;;  %v2633_v37 = vrot.slane %v2629_v22, 6  ;;  %v2877_v40 = vunpack.c.l.b16 %v5753_v26 }
 0x126   : > { %v2385_v33 = vpack.c.b16 %v2384_v27, %v2384_v27  ;;  %v5755_v38 = vld [vmem:[%s6131_s5 + $0x18] ss:$0 sps:$4 sm:$0x44]   ;;  %v2632_v41 = vsel %vm502_vm3, %v2631_v29, %v2627_v60  ;;  %v2635_v42 = vrot.slane %v2630_v28, 5  ;;  %v2878_v46 = vunpack.c.l.b16 %v5754_v30 }
 0x127   : > { %v2634_v47 = vsel %vm505_vm4, %v2633_v37, %v2632_v41  ;;  %v2879_v48 = vunpack.c.l.b16 %v5755_v38  ;;  %v2880_v49 = vrot.slane %v2876_v39, 4  ;;  %v2881_v51 = vrot.slane %v2877_v40, 3  ;;  %v5756_v52 = vld [vmem:[%s6131_s5 + $0x20] ss:$0 sps:$4 sm:$0x44]  }
 0x128   : > { %2386 = vrot.lane.b32.xlu0 %v2385_v33, %s6037_s11  ;;  %v2636_v54 = vsel %vm508_vm5, %v2635_v42, %v2634_v47  ;;  %v2883_v55 = vrot.slane %v2878_v46, 2  ;;  %v5757_v53 = vld [vmem:[%s6131_s5 + $0x28] ss:$0 sps:$4 sm:$0x44]   ;;  %v3131_v25 = vunpack.c.h.b16 %v5756_v52 }
 0x129   : > { %v6789_v8 = vpop.permute.xlu1 %1635  ;;  %v2637_v56 = vpack.c.b16 %v2636_v54, %v2636_v54  ;;  %v2882_v57 = vsel %vm239_vm0, %v2881_v51, %v2880_v49  ;;  %v2885_v58 = vrot.slane %v2879_v48, 1  ;;  %v5758_v59 = vld [vmem:[%s6131_s5 + $0x30] ss:$0 sps:$4 sm:$0x44]   ;;  %v3132_v1 = vunpack.c.h.b16 %v5757_v53 }
 0x12a   : > { %v2884_v63 = vsel %vm242_vm1, %v2883_v55, %v2882_v57  ;;  %v5759_v0 = vld [vmem:[%s6131_s5 + $0x38] ss:$0 sps:$4 sm:$0x44]   ;;  %v3133_v61 = vunpack.c.h.b16 %v5758_v59  ;;  %v5760_v50 = vld [vmem:[%s6131_s5] ss:$0 sps:$4 sm:$0x44]  }
 0x12b   : > { %v1884_v31 = vpop.permute.xlu0 %1883  ;;  %2638 = vrot.lane.b32.xlu1 %v2637_v56, %s6037_s11  ;;  %v2886_v43 = vsel %vm245_vm2, %v2885_v58, %v2884_v63  ;;  %v3134_v4 = vunpack.c.h.b16 %v5759_v0  ;;  %v3135_v5 = vrot.slane %v3132_v1, 7  ;;  %v5761_v6 = vld [vmem:[%s6131_s5 + $0x8] ss:$0 sps:$4 sm:$0x44]   ;;  %v2406_v10 = vunpack.c.l.b16 %v5760_v50 }
 0x12c   : > { %1886 = vst.msk [vmem:[#allocation2 + $0x8] sm:$0x30] %vm7470_vm11, %v1884_v31  ;;  %v2887_v3 = vpack.c.b16 %v2886_v43, %v2886_v43  ;;  %v3137_v34 = vrot.slane %v3133_v61, 6  ;;  %v5762_v9 = vld [vmem:[%s6131_s5 + $0x10] ss:$0 sps:$4 sm:$0x44]  }
 0x12d   : > { %v3136_v11 = vsel %vm502_vm3, %v3135_v5, %v3131_v25  ;;  %v3139_v12 = vrot.slane %v3134_v4, 5  ;;  %v5763_v14 = vld [vmem:[%s6131_s5 + $0x18] ss:$0 sps:$4 sm:$0x44]   ;;  %v2408_v17 = vunpack.c.l.b16 %v5762_v9  ;;  %v2410_v2 = vrot.slane %v2406_v10, 5 }
 0x12e   : > { %2888 = vrot.lane.b32.xlu0 %v2887_v3, %s6038_s12  ;;  %v3138_v16 = vsel %vm505_vm4, %v3137_v34, %v3136_v11  ;;  %v5764_v18 = vld [vmem:[%s6131_s5 + $0x20] ss:$0 sps:$4 sm:$0x44]   ;;  %v2409_v60 = vunpack.c.l.b16 %v5763_v14  ;;  %v5765_v24 = vld [vmem:[%s6131_s5 + $0x28] ss:$0 sps:$4 sm:$0x44]  }
 0x12f   : > { %v2140_v32 = vpop.permute.xlu1 %2139  ;;  %v3140_v19 = vsel %vm508_vm5, %v3139_v12, %v3138_v16  ;;  %v2413_v23 = vrot.slane %v2408_v17, 3  ;;  %v5766_v26 = vld [vmem:[%s6131_s5 + $0x30] ss:$0 sps:$4 sm:$0x44]   ;;  %v2658_v27 = vunpack.c.l.b16 %v5764_v18  ;;  %v2659_v31 = vunpack.c.l.b16 %v5765_v24 }
 0x130   : > { %2142 = vst.msk [vmem:[#allocation2 + $0x8] sm:$0xc0] %vm7471_vm10, %v2140_v32  ;;  %vm7466_vm10 = vcmask 523718   ;;  %v3141_v22 = vpack.c.b16 %v3140_v19, %v3140_v19  ;;  %v2415_v29 = vrot.slane %v2409_v60, 2  ;;  %v2660_v33 = vunpack.c.l.b16 %v5766_v26 }
 0x131   : > { %1260 = vst.msk [vmem:[#allocation2] sm:$0xc0] %vm7466_vm10, %v6774_v45  ;;  %v2407_v45 = vunpack.c.l.b16 %v5761_v6  ;;  %v5767_v30 = vld [vmem:[%s6131_s5 + $0x38] ss:$0 sps:$4 sm:$0x44]   ;;  %v2662_v37 = vrot.slane %v2658_v27, 1 }
 0x132   : > { %v6832_v13 = vpop.permute.xlu0 %1412  ;;  %3142 = vrot.lane.b32.xlu1 %v3141_v22, %s6038_s12  ;;  %v5768_v38 = vld [vmem:[%s6131_s5] ss:$0 sps:$4 sm:$0x44]   ;;  %v2661_v40 = vunpack.c.l.b16 %v5767_v30  ;;  %v5769_v41 = vld [vmem:[%s6131_s5 + $0x8] ss:$0 sps:$4 sm:$0x44]  }
 0x133   : > { %v2411_v20 = vrot.slane %v2407_v45, 4  ;;  %v5770_v42 = vld [vmem:[%s6131_s5 + $0x10] ss:$0 sps:$4 sm:$0x44]   ;;  %v2663_v49 = vsel %vm502_vm3, %v2659_v31, %v2662_v37  ;;  %v2664_v51 = vrot.slane %v2660_v33, 7  ;;  %v2908_v54 = vunpack.c.l.b16 %v5768_v38 }
 0x134   : > { %v5771_v52 = vld [vmem:[%s6131_s5 + $0x18] ss:$0 sps:$4 sm:$0x44]   ;;  %vm7472_vm11 = vcmask 324868   ;;  %vm7473_vm10 = vcmask 326918   ;;  %v2666_v55 = vrot.slane %v2661_v40, 6  ;;  %v2909_v53 = vunpack.c.l.b16 %v5769_v41 }
 0x135   : > { %v2412_v28 = vsel %vm239_vm0, %v2411_v20, %v2410_v2  ;;  %v2910_v56 = vunpack.c.l.b16 %v5770_v42  ;;  %v2665_v58 = vsel %vm505_vm4, %v2664_v51, %v2663_v49  ;;  %v2911_v59 = vunpack.c.l.b16 %v5771_v52  ;;  %v5772_v0 = vld [vmem:[%s6131_s5 + $0x20] ss:$0 sps:$4 sm:$0x44]   ;;  %v5773_v61 = vld [vmem:[%s6131_s5 + $0x28] ss:$0 sps:$4 sm:$0x44]  }
 0x136   : > { %v6834_v15 = vpop.permute.xlu1 %1666  ;;  %v2414_v32 = vsel %vm242_vm1, %v2413_v23, %v2412_v28  ;;  %v2912_v63 = vrot.slane %v2908_v54, 5  ;;  %v2667_v25 = vsel %vm508_vm5, %v2666_v55, %v2665_v58  ;;  %v2913_v1 = vrot.slane %v2909_v53, 4  ;;  %v5774_v4 = vld [vmem:[%s6131_s5 + $0x30] ss:$0 sps:$4 sm:$0x44]  }
 0x137   : > { %v2416_v39 = vsel %vm245_vm2, %v2415_v29, %v2414_v32  ;;  %v2915_v43 = vrot.slane %v2910_v56, 3  ;;  %v2668_v50 = vpack.c.b16 %v2667_v25, %v2667_v25  ;;  %v2917_v3 = vrot.slane %v2911_v59, 2  ;;  %v5775_v34 = vld [vmem:[%s6131_s5 + $0x38] ss:$0 sps:$4 sm:$0x44]  }
 0x138   : > { %v2417_v48 = vpack.c.b16 %v2416_v39, %v2416_v39  ;;  %v4276_v57 = vld [vmem:[#allocation2] sm:$0xff]  ;;  %v3162_v5 = vunpack.c.l.b16 %v5772_v0  ;;  %v2914_v6 = vsel %vm239_vm0, %v2913_v1, %v2912_v63  ;;  %v3163_v9 = vunpack.c.l.b16 %v5773_v61  ;;  %v5777_v17 = vld [vmem:[%s6131_s5 + $0x48] ss:$0 sps:$4 sm:$0x11]  }
 0x139   : > { %v1916_v46 = vpop.permute.xlu0 %1915  ;;  %5389 = vmatpush3.bf16.msra.mxu0 %v4276_v57  ;;  %2669 = vrot.lane.b32.xlu1 %v2668_v50, %s6039_s13  ;;  %v2916_v10 = vsel %vm242_vm1, %v2915_v43, %v2914_v6  ;;  %v3164_v11 = vunpack.c.l.b16 %v5774_v4  ;;  %v3165_v45 = vunpack.c.l.b16 %v5775_v34  ;;  %v5776_v16 = vld [vmem:[%s6131_s5 + $0x40] ss:$0 sps:$4 sm:$0x11]   ;;  %v5778_v24 = vld [vmem:[%s6131_s5 + $0x50] ss:$0 sps:$4 sm:$0x11]   ;;  %v3788_v27 = vunpack.c.l.b16 %v5777_v17 }
 0x13a   : > { %1918 = vst.msk [vmem:[#allocation2 + $0x8] sm:$0x30] %vm7472_vm11, %v1916_v46  ;;  %2418 = vrot.lane.b32.xlu0 %v2417_v48, %s6039_s13  ;;  %5390 = vmatprep.subr.bf16.mxu0 %v6047_v44  ;;  %v3166_v12 = vrot.slane %v3162_v5, 1  ;;  %v2918_v14 = vsel %vm245_vm2, %v2917_v3, %v2916_v10  ;;  %vm7475_vm11 = vcmask 64518   ;;  %v3787_v26 = vunpack.c.l.b16 %v5776_v16 }
 0x13b   : > { %v2919_v19 = vpack.c.b16 %v2918_v14, %v2918_v14  ;;  %v3168_v20 = vrot.slane %v3164_v11, 7  ;;  %v3170_v22 = vrot.slane %v3165_v45, 6  ;;  %v5779_v23 = vld [vmem:[%s6131_s5 + $0x58] ss:$0 sps:$4 sm:$0x11]   ;;  %v3789_v29 = vunpack.c.l.b16 %v5778_v24 }
 0x13c   : > { %v3167_v60 = vsel %vm502_vm3, %v3163_v9, %v3166_v12  ;;  %v3790_v31 = vunpack.c.l.b16 %v5779_v23  ;;  %v3791_v32 = vrot.slane %v3787_v26, 1  ;;  %v5780_v33 = vld [vmem:[%s6131_s5 + $0x60] ss:$0 sps:$4 sm:$0x11]  }
 0x13d   : > { %v2171_v47 = vpop.permute.xlu1 %2170  ;;  %v3169_v28 = vsel %vm505_vm4, %v3168_v20, %v3167_v60  ;;  %v3793_v38 = vrot.slane %v3789_v29, 7  ;;  %v5781_v39 = vld [vmem:[%s6131_s5 + $0x68] ss:$0 sps:$4 sm:$0x11]   ;;  %v4039_v46 = vunpack.c.l.b16 %v5780_v33 }
 0x13e   : > { %2173 = vst.msk [vmem:[#allocation2 + $0x8] sm:$0xc0] %vm7473_vm10, %v2171_v47  ;;  %vm7474_vm10 = vcmask 62468   ;;  %2920 = vrot.lane.b32.xlu0 %v2919_v19, %s6040_s14  ;;  %v3171_v30 = vsel %vm508_vm5, %v3170_v22, %v3169_v28  ;;  %v3792_v40 = vsel %vm239_vm0, %v3788_v27, %v3791_v32  ;;  %v3795_v41 = vrot.slane %v3790_v31, 6 }
 0x13f   : > { %v3172_v37 = vpack.c.b16 %v3171_v30, %v3171_v30  ;;  %v5782_v42 = vld [vmem:[%s6131_s5 + $0x70] ss:$0 sps:$4 sm:$0x11]   ;;  %v3794_v47 = vsel %vm242_vm1, %v3793_v38, %v3792_v40  ;;  %v5783_v48 = vld [vmem:[%s6131_s5 + $0x78] ss:$0 sps:$4 sm:$0x11]   ;;  %v4040_v49 = vunpack.c.l.b16 %v5781_v39 }
 0x140   : > { %v2795_v2 = vpop.permute.xlu0 %2794  ;;  %v5784_v51 = vld [vmem:[%s6131_s5] ss:$0 sps:$4 sm:$0x88]   ;;  %v3796_v52 = vsel %vm245_vm2, %v3795_v41, %v3794_v47  ;;  %v4041_v54 = vunpack.c.l.b16 %v5782_v42  ;;  %v4043_v55 = vrot.slane %v4039_v46, 5  ;;  %v4042_v57 = vunpack.c.l.b16 %v5783_v48 }
 0x141   : > { %2797 = vst.msk [vmem:[#allocation2 + $0x10] sm:$0x30] %vm7474_vm10, %v2795_v2  ;;  %3173 = vrot.lane.b32.xlu1 %v3172_v37, %s6040_s14  ;;  %v5785_v53 = vld [vmem:[%s6131_s5 + $0x8] ss:$0 sps:$4 sm:$0x88]   ;;  %v3797_v56 = vpack.c.b16 %v3796_v52, %v3796_v52  ;;  %v4044_v58 = vrot.slane %v4040_v49, 4  ;;  %v2438_v63 = vunpack.c.l.b16 %v5784_v51 }
 0x142   : > { %v5786_v59 = vld [vmem:[%s6131_s5 + $0x10] ss:$0 sps:$4 sm:$0x88]   ;;  %v4046_v0 = vrot.slane %v4041_v54, 3  ;;  %v2439_v1 = vunpack.c.l.b16 %v5785_v53  ;;  %v4048_v61 = vrot.slane %v4042_v57, 2  ;;  %vm7476_vm10 = vcmask 390468  }
 0x143   : > { %v5787_v25 = vld [vmem:[%s6131_s5 + $0x18] ss:$0 sps:$4 sm:$0x88]   ;;  %3798 = vrot.lane.b32.xlu0 %v3797_v56, %s6032_s6  ;;  %v4045_v43 = vsel %vm502_vm3, %v4044_v58, %v4043_v55  ;;  %v2440_v50 = vunpack.c.l.b16 %v5786_v59  ;;  %v2442_v3 = vrot.slane %v2438_v63, 6 }
 0x144   : > { %v3048_v18 = vpop.permute.xlu1 %3047  ;;  %v4047_v6 = vsel %vm505_vm4, %v4046_v0, %v4045_v43  ;;  %v2441_v34 = vunpack.c.l.b16 %v5787_v25  ;;  %v2443_v9 = vrot.slane %v2439_v1, 5  ;;  %v5788_v10 = vld [vmem:[%s6131_s5 + $0x20] ss:$0 sps:$4 sm:$0x88]  }
 0x145   : > { %3050 = vst.msk [vmem:[#allocation2 + $0x10] sm:$0xc0] %vm7475_vm11, %v3048_v18  ;;  %v4049_v11 = vsel %vm508_vm5, %v4048_v61, %v4047_v6  ;;  %v2445_v12 = vrot.slane %v2440_v50, 4  ;;  %v5789_v14 = vld [vmem:[%s6131_s5 + $0x28] ss:$0 sps:$4 sm:$0x88]   ;;  %v2689_v18 = vunpack.c.l.b16 %v5788_v10 }
 0x146   : > { %v4050_v45 = vpack.c.b16 %v4049_v11, %v4049_v11  ;;  %v2444_v16 = vsel %vm239_vm0, %v2443_v9, %v2442_v3  ;;  %v2447_v17 = vrot.slane %v2441_v34, 3  ;;  %v5790_v2 = vld [vmem:[%s6131_s5 + $0x30] ss:$0 sps:$4 sm:$0x88]   ;;  %v2690_v20 = vunpack.c.l.b16 %v5789_v14 }
 0x147   : > { %v6889_v4 = vpop.permute.xlu0 %1444  ;;  %v2446_v19 = vsel %vm242_vm1, %v2445_v12, %v2444_v16  ;;  %v5791_v60 = vld [vmem:[%s6131_s5 + $0x38] ss:$0 sps:$4 sm:$0x88]   ;;  %v5792_v24 = vld [vmem:[%s6131_s5 + $0x40] ss:$0 sps:$4 sm:$0x11]   ;;  %v2691_v23 = vunpack.c.l.b16 %v5790_v2 }
 0x148   : > { %4051 = vrot.lane.b32.xlu1 %v4050_v45, %s6032_s6  ;;  %v2448_v22 = vsel %vm245_vm2, %v2447_v17, %v2446_v19  ;;  %v2693_v26 = vrot.slane %v2689_v18, 2  ;;  %v5793_v27 = vld [vmem:[%s6131_s5 + $0x48] ss:$0 sps:$4 sm:$0x11]   ;;  %v2692_v29 = vunpack.c.l.b16 %v5791_v60  ;;  %v2694_v30 = vrot.slane %v2690_v20, 1 }
 0x149   : > { %v2449_v28 = vpack.c.b16 %v2448_v22, %v2448_v22  ;;  %v5794_v31 = vld [vmem:[%s6131_s5 + $0x50] ss:$0 sps:$4 sm:$0x11]   ;;  %v5795_v37 = vld [vmem:[%s6131_s5 + $0x58] ss:$0 sps:$4 sm:$0x11]   ;;  %v1278_v38 = vunpack.c.l.b16 %v5792_v24  ;;  %v1279_v39 = vunpack.c.l.b16 %v5793_v27 }
 0x14a   : > { %vm7477_vm11 = vcmask 392518   ;;  %v2695_v40 = vsel %vm502_vm3, %v2694_v30, %v2693_v26  ;;  %v2697_v41 = vrot.slane %v2692_v29, 7  ;;  %v1280_v42 = vunpack.c.l.b16 %v5794_v31  ;;  %v5796_v46 = vld [vmem:[%s6131_s5 + $0x60] ss:$0 sps:$4 sm:$0x11]  }
 0x14b   : > { %2450 = vrot.lane.b32.xlu0 %v2449_v28, %s6041_s20  ;;  %v2696_v47 = vsel %vm505_vm4, %v2691_v23, %v2695_v40  ;;  %v1281_v48 = vunpack.c.l.b16 %v5795_v37  ;;  %v1282_v49 = vrot.slane %v1279_v39, 7  ;;  %v5797_v51 = vld [vmem:[%s6131_s5 + $0x68] ss:$0 sps:$4 sm:$0x11]   ;;  %v1529_v53 = vunpack.c.l.b16 %v5796_v46 }
 0x14c   : > { %v6891_v5 = vpop.permute.xlu1 %1697  ;;  %v2698_v52 = vsel %vm508_vm5, %v2697_v41, %v2696_v47  ;;  %v1284_v54 = vrot.slane %v1280_v42, 6  ;;  %v5798_v55 = vld [vmem:[%s6131_s5 + $0x70] ss:$0 sps:$4 sm:$0x11]   ;;  %v1530_v63 = vunpack.c.l.b16 %v5797_v51 }
 0x14d   : > { %v2699_v56 = vpack.c.b16 %v2698_v52, %v2698_v52  ;;  %v1283_v57 = vsel %vm239_vm0, %v1282_v49, %v1278_v38  ;;  %v1286_v58 = vrot.slane %v1281_v48, 5  ;;  %v5799_v59 = vld [vmem:[%s6131_s5 + $0x78] ss:$0 sps:$4 sm:$0x11]   ;;  %v1531_v25 = vunpack.c.l.b16 %v5798_v55 }
 0x14e   : > { %v1285_v0 = vsel %vm242_vm1, %v1284_v54, %v1283_v57  ;;  %v1533_v1 = vrot.slane %v1529_v53, 4  ;;  %v5800_v43 = vld [vmem:[%s6131_s5] ss:$0 sps:$4 sm:$0x88]   ;;  %v1532_v50 = vunpack.c.l.b16 %v5799_v59  ;;  %v1534_v3 = vrot.slane %v1530_v63, 3 }
 0x14f   : > { %2700 = vrot.lane.b32.xlu1 %v2699_v56, %s6041_s20  ;;  %v1287_v61 = vsel %vm245_vm2, %v1286_v58, %v1285_v0  ;;  %v5801_v6 = vld [vmem:[%s6131_s5 + $0x8] ss:$0 sps:$4 sm:$0x88]   ;;  %v1536_v9 = vrot.slane %v1531_v25, 2  ;;  %v2940_v11 = vunpack.c.l.b16 %v5800_v43 }
 0x150   : > { %v1948_v32 = vpop.permute.xlu0 %1947  ;;  %v1288_v34 = vpack.c.b16 %v1287_v61, %v1287_v61  ;;  %v5802_v10 = vld [vmem:[%s6131_s5 + $0x10] ss:$0 sps:$4 sm:$0x88]   ;;  %v1535_v12 = vsel %vm502_vm3, %v1534_v3, %v1533_v1  ;;  %v1538_v14 = vrot.slane %v1532_v50, 1  ;;  %v2941_v16 = vunpack.c.l.b16 %v5801_v6 }
 0x151   : > { %1950 = vst.msk [vmem:[#allocation2 + $0x8] sm:$0x30] %vm7476_vm10, %v1948_v32  ;;  %v5803_v45 = vld [vmem:[%s6131_s5 + $0x18] ss:$0 sps:$4 sm:$0x88]   ;;  %vm7478_vm10 = vcmask 58368   ;;  %v1537_v17 = vsel %vm505_vm4, %v1536_v9, %v1535_v12  ;;  %v2942_v2 = vunpack.c.l.b16 %v5802_v10 }
 0x152   : > { %v2202_v33 = vpop.permute.xlu1 %2201  ;;  %1290 = vst.msk [vmem:[#allocation2 + $0x8] sm:$0x3] %vm7478_vm10, %v1288_v34  ;;  %v2944_v18 = vrot.slane %v2940_v11, 6  ;;  %v5804_v19 = vld [vmem:[%s6131_s5 + $0x20] ss:$0 sps:$4 sm:$0x88]   ;;  %v1539_v60 = vsel %vm508_vm5, %v1538_v14, %v1537_v17  ;;  %v2943_v20 = vunpack.c.l.b16 %v5803_v45 }
 0x153   : > { %2204 = vst.msk [vmem:[#allocation2 + $0x8] sm:$0xc0] %vm7477_vm11, %v2202_v33  ;;  %vm7479_vm11 = vcmask 123968   ;;  %v2945_v24 = vrot.slane %v2941_v16, 5  ;;  %v1540_v23 = vpack.c.b16 %v1539_v60, %v1539_v60  ;;  %v2947_v26 = vrot.slane %v2942_v2, 4 }
 0x154   : > { %1321 = vst.msk [vmem:[#allocation2 + $0x8] sm:$0x3] %vm7479_vm11, %v6615_v35  ;;  %v5805_v22 = vld [vmem:[%s6131_s5 + $0x28] ss:$0 sps:$4 sm:$0x88]   ;;  %v3193_v28 = vunpack.c.l.b16 %v5804_v19  ;;  %vm7480_vm10 = vcmask 189568  }
 0x155   : > { %v5806_v27 = vld [vmem:[%s6131_s5 + $0x30] ss:$0 sps:$4 sm:$0x88]   ;;  %1352 = vst.msk [vmem:[#allocation2 + $0x8] sm:$0x3] %vm7480_vm10, %v6706_v21  ;;  %v2946_v29 = vsel %vm239_vm0, %v2945_v24, %v2944_v18  ;;  %v2949_v30 = vrot.slane %v2943_v20, 3  ;;  %v3194_v35 = vunpack.c.l.b16 %v5805_v22 }
 0x156   : > { %v5807_v31 = vld [vmem:[%s6131_s5 + $0x38] ss:$0 sps:$4 sm:$0x88]   ;;  %vm7481_vm11 = vcmask 255168   ;;  %1542 = vst.msk [vmem:[#allocation2 + $0x8] sm:$0xc] %vm512_vm6, %v1540_v23  ;;  %v2948_v32 = vsel %vm242_vm1, %v2947_v26, %v2946_v29  ;;  %v3195_v33 = vunpack.c.l.b16 %v5806_v27 }
 0x157   : > { %1383 = vst.msk [vmem:[#allocation2 + $0x8] sm:$0x3] %vm7481_vm11, %v6787_v7  ;;  %v3197_v37 = vrot.slane %v3193_v28, 2  ;;  %v5808_v38 = vld [vmem:[%s6131_s5 + $0x40] ss:$0 sps:$4 sm:$0x22]   ;;  %v2950_v21 = vsel %vm245_vm2, %v2949_v30, %v2948_v32  ;;  %v3196_v39 = vunpack.c.l.b16 %v5807_v31 }
 0x158   : > { %vm7482_vm10 = vcmask 320768   ;;  %1574 = vst.msk [vmem:[#allocation2 + $0x8] sm:$0xc] %vm545_vm7, %v6617_v36  ;;  %v3198_v40 = vrot.slane %v3194_v35, 1  ;;  %vm7483_vm11 = vcmask 386368   ;;  %v2951_v7 = vpack.c.b16 %v2950_v21, %v2950_v21  ;;  %v6969_v56 = vpop.permute.xlu1 %2575 }
 0x159   : > { %1415 = vst.msk [vmem:[#allocation2 + $0x8] sm:$0x3] %vm7482_vm10, %v6832_v13  ;;  %v5809_v41 = vld [vmem:[%s6131_s5 + $0x48] ss:$0 sps:$4 sm:$0x22]   ;;  %v3316_v47 = vunpack.c.l.b16 %v5808_v38  ;;  %v3201_v36 = vrot.slane %v3196_v39, 7 }
 0x15a   : > { %1447 = vst.msk [vmem:[#allocation2 + $0x8] sm:$0x3] %vm7483_vm11, %v6889_v4  ;;  %v5810_v42 = vld [vmem:[%s6131_s5 + $0x50] ss:$0 sps:$4 sm:$0x22]   ;;  %v3199_v13 = vsel %vm502_vm3, %v3198_v40, %v3197_v37  ;;  %v3317_v48 = vunpack.c.l.b16 %v5809_v41  ;;  %2952 = vrot.lane.b32.xlu0 %v2951_v7, %s6042_s22  ;;  %vm7484_vm10 = vcmask 128068  }
 0x15b   : > { %v5811_v46 = vld [vmem:[%s6131_s5 + $0x58] ss:$0 sps:$4 sm:$0x22]   ;;  %1606 = vst.msk [vmem:[#allocation2 + $0x8] sm:$0xc] %vm578_vm13, %v6708_v62  ;;  %v3200_v4 = vsel %vm505_vm4, %v3195_v33, %v3199_v13  ;;  %v3318_v49 = vunpack.c.l.b16 %v5810_v42  ;;  %v3320_v52 = vrot.slane %v3316_v47, 2 }
 0x15c   : > { %1638 = vst.msk [vmem:[#allocation2 + $0x8] sm:$0xc] %vm611_vm14, %v6789_v8  ;;  %v3319_v51 = vunpack.c.l.b16 %v5811_v46  ;;  %v5812_v54 = vld [vmem:[%s6131_s5 + $0x60] ss:$0 sps:$4 sm:$0x22]   ;;  %v3202_v62 = vsel %vm508_vm5, %v3201_v36, %v3200_v4  ;;  %v3321_v55 = vrot.slane %v3317_v48, 1  ;;  %v6967_v8 = vpop.permute.xlu0 %2323 }
 0x15d   : > { %1669 = vst.msk [vmem:[#allocation2 + $0x8] sm:$0xc] %vm643_vm9, %v6834_v15  ;;  %v5813_v53 = vld [vmem:[%s6131_s5 + $0x68] ss:$0 sps:$4 sm:$0x22]   ;;  %v3203_v57 = vpack.c.b16 %v3202_v62, %v3202_v62  ;;  %v3567_v63 = vunpack.c.l.b16 %v5812_v54  ;;  %vm7485_vm11 = vcmask 130118  }
 0x15e   : > { %1700 = vst.msk [vmem:[#allocation2 + $0x8] sm:$0xc] %vm675_vm12, %v6891_v5  ;;  %v3324_v58 = vrot.slane %v3319_v51, 7  ;;  %v5814_v59 = vld [vmem:[%s6131_s5 + $0x70] ss:$0 sps:$4 sm:$0x22]   ;;  %v3322_v15 = vsel %vm239_vm0, %v3321_v55, %v3320_v52  ;;  %v3568_v25 = vunpack.c.l.b16 %v5813_v53 }
 0x15f   : > { %v5815_v0 = vld [vmem:[%s6131_s5 + $0x78] ss:$0 sps:$4 sm:$0x22]   ;;  %3204 = vrot.lane.b32.xlu1 %v3203_v57, %s6042_s22  ;;  %v3323_v1 = vsel %vm242_vm1, %v3318_v49, %v3322_v15  ;;  %v3569_v5 = vunpack.c.l.b16 %v5814_v59  ;;  %v3571_v43 = vrot.slane %v3567_v63, 6  ;;  %v3080_v18 = vpop.permute.xlu1 %3079 }
 0x160   : > { %v5816_v61 = vld [vmem:[%s6131_s5 + $0x40] ss:$0 sps:$4 sm:$0x22]   ;;  %v3325_v50 = vsel %vm245_vm2, %v3324_v58, %v3323_v1  ;;  %v3570_v3 = vunpack.c.l.b16 %v5815_v0  ;;  %v3572_v6 = vrot.slane %v3568_v25, 5  ;;  %3082 = vst.msk [vmem:[#allocation2 + $0x10] sm:$0xc0] %vm7485_vm11, %v3080_v18 }
 0x161   : > { %v5817_v34 = vld [vmem:[%s6131_s5 + $0x48] ss:$0 sps:$4 sm:$0x22]   ;;  %v3326_v9 = vpack.c.b16 %v3325_v50, %v3325_v50  ;;  %v3574_v10 = vrot.slane %v3569_v5, 4  ;;  %v3818_v12 = vunpack.c.l.b16 %v5816_v61  ;;  %v2826_v2 = vpop.permute.xlu0 %2825  ;;  %vm7487_vm11 = vcmask 456068  }
 0x162   : > { %v5818_v11 = vld [vmem:[%s6131_s5 + $0x50] ss:$0 sps:$4 sm:$0x22]   ;;  %v3573_v14 = vsel %vm502_vm3, %v3572_v6, %v3571_v43  ;;  %v3576_v45 = vrot.slane %v3570_v3, 3  ;;  %v3819_v17 = vunpack.c.l.b16 %v5817_v34  ;;  %2828 = vst.msk [vmem:[#allocation2 + $0x10] sm:$0x30] %vm7484_vm10, %v2826_v2 }
 0x163   : > { %v5819_v16 = vld [vmem:[%s6131_s5 + $0x58] ss:$0 sps:$4 sm:$0x22]   ;;  %3327 = vrot.lane.b32.xlu0 %v3326_v9, %s6033_s7  ;;  %v3575_v19 = vsel %vm505_vm4, %v3574_v10, %v3573_v14  ;;  %v3820_v60 = vunpack.c.l.b16 %v5818_v11  ;;  %v3822_v20 = vrot.slane %v3818_v12, 2  ;;  %vm7486_vm10 = vcmask 451968  }
 0x164   : > { %v5820_v24 = vld [vmem:[%s6131_s5 + $0x60] ss:$0 sps:$4 sm:$0x22]   ;;  %v3577_v22 = vsel %vm508_vm5, %v3576_v45, %v3575_v19  ;;  %v3821_v23 = vunpack.c.l.b16 %v5819_v16  ;;  %v3823_v26 = vrot.slane %v3819_v17, 1 }
 0x165   : > { %v5821_v27 = vld [vmem:[%s6131_s5 + $0x68] ss:$0 sps:$4 sm:$0x22]   ;;  %v3578_v28 = vpack.c.b16 %v3577_v22, %v3577_v22  ;;  %v5822_v29 = vld [vmem:[%s6131_s5 + $0x70] ss:$0 sps:$4 sm:$0x22]   ;;  %v4071_v31 = vunpack.c.l.b16 %v5820_v24 }
 0x166   : > { %v5823_v30 = vld [vmem:[%s6131_s5 + $0x78] ss:$0 sps:$4 sm:$0x22]   ;;  %v3824_v35 = vsel %vm239_vm0, %v3823_v26, %v3822_v20  ;;  %v3826_v32 = vrot.slane %v3821_v23, 7  ;;  %v4072_v33 = vunpack.c.l.b16 %v5821_v27  ;;  %v4073_v38 = vunpack.c.l.b16 %v5822_v29 }
 0x167   : > { %3579 = vrot.lane.b32.xlu1 %v3578_v28, %s6033_s7  ;;  %v3825_v37 = vsel %vm242_vm1, %v3820_v60, %v3824_v35  ;;  %v4074_v21 = vunpack.c.l.b16 %v5823_v30  ;;  %v4075_v39 = vrot.slane %v4071_v31, 6  ;;  %v5824_v40 = vld [vmem:[%s6131_s5] ss:$0 sps:$4 sm:$0x88]   ;;  %v1477_v52 = vpop.permute.xlu0 %1476  ;;  %s189_s7 = sand.u32 1, %s6022_s16  }
 0x168   : > { %v3827_v41 = vsel %vm245_vm2, %v3826_v32, %v3825_v37  ;;  %v4076_v7 = vrot.slane %v4072_v33, 5  ;;  %v5825_v42 = vld [vmem:[%s6131_s5 + $0x8] ss:$0 sps:$4 sm:$0x88]   ;;  %v4078_v47 = vrot.slane %v4073_v38, 4  ;;  %v2470_v48 = vunpack.c.l.b16 %v5824_v40 }
 0x169   : > { %v3828_v46 = vpack.c.b16 %v3827_v41, %v3827_v41  ;;  %v4080_v13 = vrot.slane %v4074_v21, 3  ;;  %v5826_v36 = vld [vmem:[%s6131_s5 + $0x10] ss:$0 sps:$4 sm:$0x88]   ;;  %v2471_v51 = vunpack.c.l.b16 %v5825_v42  ;;  %1479 = vst.msk [vmem:[#allocation2 + $0x8] sm:$0x3] %vm7486_vm10, %v1477_v52 }
 0x16a   : > { %v4077_v4 = vsel %vm502_vm3, %v4076_v7, %v4075_v39  ;;  %v5827_v49 = vld [vmem:[%s6131_s5 + $0x18] ss:$0 sps:$4 sm:$0x88]   ;;  %v2472_v55 = vunpack.c.l.b16 %v5826_v36  ;;  %v2474_v53 = vrot.slane %v2470_v48, 7  ;;  %vm7488_vm10 = vcmask 458118  }
 0x16b   : > { %3829 = vrot.lane.b32.xlu0 %v3828_v46, %s6034_s8  ;;  %v4079_v62 = vsel %vm505_vm4, %v4078_v47, %v4077_v4  ;;  %v2473_v58 = vunpack.c.l.b16 %v5827_v49  ;;  %v2475_v59 = vrot.slane %v2471_v51, 6  ;;  %v5828_v63 = vld [vmem:[%s6131_s5 + $0x20] ss:$0 sps:$4 sm:$0x88]  }
 0x16c   : > { %v1729_v54 = vpop.permute.xlu1 %1728  ;;  %v4081_v57 = vsel %vm508_vm5, %v4080_v13, %v4079_v62  ;;  %v2477_v0 = vrot.slane %v2472_v55, 5  ;;  %v5829_v25 = vld [vmem:[%s6131_s5 + $0x28] ss:$0 sps:$4 sm:$0x88]   ;;  %v2720_v61 = vunpack.c.l.b16 %v5828_v63 }
 0x16d   : > { %1731 = vst.msk [vmem:[#allocation2 + $0x8] sm:$0xc] %vm707_vm8, %v1729_v54  ;;  %v4082_v15 = vpack.c.b16 %v4081_v57, %v4081_v57  ;;  %v2476_v1 = vsel %vm239_vm0, %v2475_v59, %v2474_v53  ;;  %v2479_v5 = vrot.slane %v2473_v58, 4  ;;  %v5830_v43 = vld [vmem:[%s6131_s5 + $0x30] ss:$0 sps:$4 sm:$0x88]   ;;  %v2721_v6 = vunpack.c.l.b16 %v5829_v25 }
 0x16e   : > { %v2478_v50 = vsel %vm242_vm1, %v2477_v0, %v2476_v1  ;;  %v5831_v3 = vld [vmem:[%s6131_s5 + $0x38] ss:$0 sps:$4 sm:$0x88]   ;;  %v2722_v9 = vunpack.c.l.b16 %v5830_v43  ;;  %v2724_v10 = vrot.slane %v2720_v61, 3 }
 0x16f   : > { %4083 = vrot.lane.b32.xlu1 %v4082_v15, %s6034_s8  ;;  %v2480_v34 = vsel %vm245_vm2, %v2479_v5, %v2478_v50  ;;  %v5832_v11 = vld [vmem:[%s6131_s5] ss:$0 sps:$4 sm:$0x88]   ;;  %v2723_v14 = vunpack.c.l.b16 %v5831_v3  ;;  %v2725_v45 = vrot.slane %v2721_v6, 2  ;;  %s4476_s8 = sshll.u32 %s189_s7, 2 }
 0x170   : > { %v2481_v12 = vpack.c.b16 %v2480_v34, %v2480_v34  ;;  %v5833_v16 = vld [vmem:[%s6131_s5 + $0x8] ss:$0 sps:$4 sm:$0x88]   ;;  %v2727_v18 = vrot.slane %v2722_v9, 1  ;;  %v2972_v60 = vunpack.c.l.b16 %v5832_v11 }
 0x171   : > { %v5834_v19 = vld [vmem:[%s6131_s5 + $0x10] ss:$0 sps:$4 sm:$0x88]   ;;  %v2726_v20 = vsel %vm502_vm3, %v2725_v45, %v2724_v10  ;;  %v5835_v24 = vld [vmem:[%s6131_s5 + $0x18] ss:$0 sps:$4 sm:$0x88]   ;;  %v2973_v22 = vunpack.c.l.b16 %v5833_v16 }
 0x172   : > { %2482 = vrot.lane.b32.xlu0 %v2481_v12, %s6043_s23  ;;  %v2728_v23 = vsel %vm505_vm4, %v2727_v18, %v2726_v20  ;;  %v2974_v26 = vunpack.c.l.b16 %v5834_v19  ;;  %v2976_v27 = vrot.slane %v2972_v60, 7  ;;  %v5836_v28 = vld [vmem:[%s6131_s5 + $0x20] ss:$0 sps:$4 sm:$0x88]   ;;  %v2975_v30 = vunpack.c.l.b16 %v5835_v24 }
 0x173   : > { %v2729_v29 = vsel %vm508_vm5, %v2723_v14, %v2728_v23  ;;  %v2977_v31 = vrot.slane %v2973_v22, 6  ;;  %v5837_v35 = vld [vmem:[%s6131_s5 + $0x28] ss:$0 sps:$4 sm:$0x88]   ;;  %v3224_v38 = vunpack.c.l.b16 %v5836_v28 }
 0x174   : > { %v1980_v17 = vpop.permute.xlu0 %1979  ;;  %v2730_v32 = vpack.c.b16 %v2729_v29, %v2729_v29  ;;  %v2979_v33 = vrot.slane %v2974_v26, 5  ;;  %v5838_v37 = vld [vmem:[%s6131_s5 + $0x30] ss:$0 sps:$4 sm:$0x88]   ;;  %v2981_v39 = vrot.slane %v2975_v30, 4  ;;  %v3225_v41 = vunpack.c.l.b16 %v5837_v35 }
 0x175   : > { %1982 = vst.msk [vmem:[#allocation2 + $0x8] sm:$0x30] %vm7487_vm11, %v1980_v17  ;;  %v2978_v21 = vsel %vm239_vm0, %v2977_v31, %v2976_v27  ;;  %v5839_v40 = vld [vmem:[%s6131_s5 + $0x38] ss:$0 sps:$4 sm:$0x88]   ;;  %v3226_v42 = vunpack.c.l.b16 %v5838_v37  ;;  %v3228_v46 = vrot.slane %v3224_v38, 3 }
 0x176   : > { %2731 = vrot.lane.b32.xlu1 %v2730_v32, %s6043_s23  ;;  %v2980_v7 = vsel %vm242_vm1, %v2979_v33, %v2978_v21  ;;  %v5840_v47 = vld [vmem:[%s6131_s5 + $0x40] ss:$0 sps:$4 sm:$0x22]   ;;  %v3227_v36 = vunpack.c.l.b16 %v5839_v40  ;;  %v3229_v48 = vrot.slane %v3225_v41, 2  ;;  %vm7489_vm11 = vcmask 193668  }
 0x177   : > { %v2982_v13 = vsel %vm245_vm2, %v2981_v39, %v2980_v7  ;;  %v5841_v4 = vld [vmem:[%s6131_s5 + $0x48] ss:$0 sps:$4 sm:$0x22]   ;;  %v3231_v51 = vrot.slane %v3226_v42, 1  ;;  %v3347_v54 = vunpack.c.l.b16 %v5840_v47 }
 0x178   : > { %v2233_v2 = vpop.permute.xlu1 %2232  ;;  %v2983_v49 = vpack.c.b16 %v2982_v13, %v2982_v13  ;;  %v5842_v52 = vld [vmem:[%s6131_s5 + $0x50] ss:$0 sps:$4 sm:$0x22]   ;;  %v3230_v55 = vsel %vm502_vm3, %v3229_v48, %v3228_v46  ;;  %v5843_v53 = vld [vmem:[%s6131_s5 + $0x58] ss:$0 sps:$4 sm:$0x22]   ;;  %v3348_v57 = vunpack.c.l.b16 %v5841_v4 }
 0x179   : > { %2235 = vst.msk [vmem:[#allocation2 + $0x8] sm:$0xc0] %vm7488_vm10, %v2233_v2  ;;  %v3232_v59 = vsel %vm505_vm4, %v3231_v51, %v3230_v55  ;;  %v3349_v63 = vunpack.c.l.b16 %v5842_v52  ;;  %v3351_v15 = vrot.slane %v3347_v54, 3  ;;  %v5844_v0 = vld [vmem:[%s6131_s5 + $0x60] ss:$0 sps:$4 sm:$0x22]   ;;  %v3350_v1 = vunpack.c.l.b16 %v5843_v53 }
 0x17a   : > { %2984 = vrot.lane.b32.xlu0 %v2983_v49, %s6044_s28  ;;  %v3233_v25 = vsel %vm508_vm5, %v3227_v36, %v3232_v59  ;;  %v3352_v5 = vrot.slane %v3348_v57, 2  ;;  %v5845_v43 = vld [vmem:[%s6131_s5 + $0x68] ss:$0 sps:$4 sm:$0x22]   ;;  %v3599_v6 = vunpack.c.l.b16 %v5844_v0  ;;  %vm7490_vm10 = vcmask 195718  }
 0x17b   : > { %v3234_v61 = vpack.c.b16 %v3233_v25, %v3233_v25  ;;  %v3354_v50 = vrot.slane %v3349_v63, 1  ;;  %v5846_v3 = vld [vmem:[%s6131_s5 + $0x70] ss:$0 sps:$4 sm:$0x22]   ;;  %v3600_v11 = vunpack.c.l.b16 %v5845_v43 }
 0x17c   : > { %v3353_v9 = vsel %vm239_vm0, %v3352_v5, %v3351_v15  ;;  %v5847_v10 = vld [vmem:[%s6131_s5 + $0x78] ss:$0 sps:$4 sm:$0x22]   ;;  %v3601_v14 = vunpack.c.l.b16 %v5846_v3  ;;  %v3603_v45 = vrot.slane %v3599_v6, 7 }
 0x17d   : > { %v7034_v62 = vpop.permute.xlu0 %2354  ;;  %3235 = vrot.lane.b32.xlu1 %v3234_v61, %s6044_s28  ;;  %v3355_v12 = vsel %vm242_vm1, %v3354_v50, %v3353_v9  ;;  %v5848_v16 = vld [vmem:[%s6131_s5 + $0x40] ss:$0 sps:$4 sm:$0x22]   ;;  %v3602_v2 = vunpack.c.l.b16 %v5847_v10  ;;  %v3604_v18 = vrot.slane %v3600_v11, 6 }
 0x17e   : > { %v3356_v17 = vsel %vm245_vm2, %v3350_v1, %v3355_v12  ;;  %v5849_v19 = vld [vmem:[%s6131_s5 + $0x48] ss:$0 sps:$4 sm:$0x22]   ;;  %v3606_v24 = vrot.slane %v3601_v14, 5  ;;  %v3849_v23 = vunpack.c.l.b16 %v5848_v16 }
 0x17f   : > { %v3357_v20 = vpack.c.b16 %v3356_v17, %v3356_v17  ;;  %v5850_v22 = vld [vmem:[%s6131_s5 + $0x50] ss:$0 sps:$4 sm:$0x22]   ;;  %v3605_v26 = vsel %vm502_vm3, %v3604_v18, %v3603_v45  ;;  %v3608_v27 = vrot.slane %v3602_v2, 4  ;;  %v3850_v29 = vunpack.c.l.b16 %v5849_v19 }
 0x180   : > { %v7038_v58 = vpop.permute.xlu1 %2607  ;;  %v5851_v28 = vld [vmem:[%s6131_s5 + $0x58] ss:$0 sps:$4 sm:$0x22]   ;;  %v3607_v30 = vsel %vm505_vm4, %v3606_v24, %v3605_v26  ;;  %v3851_v31 = vunpack.c.l.b16 %v5850_v22  ;;  %v3853_v35 = vrot.slane %v3849_v23, 3 }
 0x181   : > { %3358 = vrot.lane.b32.xlu0 %v3357_v20, %s6035_s9  ;;  %v5852_v32 = vld [vmem:[%s6131_s5 + $0x60] ss:$0 sps:$4 sm:$0x22]   ;;  %v3609_v33 = vsel %vm508_vm5, %v3608_v27, %v3607_v30  ;;  %v3852_v37 = vunpack.c.l.b16 %v5851_v28  ;;  %v3854_v38 = vrot.slane %v3850_v29, 2 }
 0x182   : > { %v5853_v21 = vld [vmem:[%s6131_s5 + $0x68] ss:$0 sps:$4 sm:$0x22]   ;;  %v3610_v40 = vpack.c.b16 %v3609_v33, %v3609_v33  ;;  %v3856_v41 = vrot.slane %v3851_v31, 1  ;;  %v4103_v42 = vunpack.c.l.b16 %v5852_v32 }
 0x183   : > { %v5854_v7 = vld [vmem:[%s6131_s5 + $0x70] ss:$0 sps:$4 sm:$0x22]   ;;  %v3855_v46 = vsel %vm239_vm0, %v3854_v38, %v3853_v35  ;;  %v5855_v47 = vld [vmem:[%s6131_s5 + $0x78] ss:$0 sps:$4 sm:$0x22]   ;;  %v4104_v13 = vunpack.c.l.b16 %v5853_v21 }
 0x184   : > { %v2857_v34 = vpop.permute.xlu0 %2856  ;;  %3611 = vrot.lane.b32.xlu1 %v3610_v40, %s6035_s9  ;;  %v3857_v36 = vsel %vm242_vm1, %v3856_v41, %v3855_v46  ;;  %v4105_v48 = vunpack.c.l.b16 %v5854_v7  ;;  %v4107_v4 = vrot.slane %v4103_v42, 7  ;;  %v5856_v49 = vld [vmem:[%s6131_s5 + $0x4] ss:$0 sps:$4 sm:$0x11]   ;;  %v4106_v52 = vunpack.c.l.b16 %v5855_v47  ;;  %s191_s9 = scalar_lea.vmem [#allocation3], %s4476_s8 }
 0x185   : > { %2859 = vst.msk [vmem:[#allocation2 + $0x10] sm:$0x30] %vm7489_vm11, %v2857_v34  ;;  %vm7491_vm11 = vcmask 517568   ;;  %v3858_v51 = vsel %vm245_vm2, %v3852_v37, %v3857_v36  ;;  %v4108_v54 = vrot.slane %v4104_v13, 6  ;;  %v2502_v1 = vunpack.c.l.b16 %v5856_v49 }
 0x186   : > { %v5857_v55 = vld [vmem:[%s6131_s5 + $0xc] ss:$0 sps:$4 sm:$0x11]   ;;  %v3859_v57 = vpack.c.b16 %v3858_v51, %v3858_v51  ;;  %v4110_v59 = vrot.slane %v4105_v48, 5  ;;  %v4112_v0 = vrot.slane %v4106_v52, 4 }
 0x187   : > { %v5858_v63 = vld [vmem:[%s6131_s5 + $0x14] ss:$0 sps:$4 sm:$0x11]   ;;  %v4109_v15 = vsel %vm502_vm3, %v4108_v54, %v4107_v4  ;;  %v5859_v25 = vld [vmem:[%s6131_s5 + $0x1c] ss:$0 sps:$4 sm:$0x11]   ;;  %v2503_v5 = vunpack.c.l.b16 %v5857_v55 }
 0x188   : > { %v3112_v60 = vpop.permute.xlu1 %3111  ;;  %3860 = vrot.lane.b32.xlu0 %v3859_v57, %s6036_s10  ;;  %v4111_v43 = vsel %vm505_vm4, %v4110_v59, %v4109_v15  ;;  %v2504_v61 = vunpack.c.l.b16 %v5858_v63  ;;  %v5860_v50 = vld [vmem:[%s6131_s5 + $0x24] ss:$0 sps:$4 sm:$0x11]   ;;  %v5861_v3 = vld [vmem:[%s6131_s5 + $0x2c] ss:$0 sps:$4 sm:$0x11]   ;;  %v2505_v34 = vunpack.c.l.b16 %v5859_v25 }
 0x189   : > { %3114 = vst.msk [vmem:[#allocation2 + $0x10] sm:$0xc0] %vm7490_vm10, %v3112_v60  ;;  %vm7492_vm10 = vcmask 519618   ;;  %v4113_v6 = vsel %vm508_vm5, %v4112_v0, %v4111_v43  ;;  %v2506_v9 = vrot.slane %v2503_v5, 7  ;;  %v2751_v16 = vunpack.c.l.b16 %v5860_v50 }
 0x18a   : > { %v5862_v10 = vld [vmem:[%s6131_s5 + $0x34] ss:$0 sps:$4 sm:$0x11]   ;;  %v4114_v12 = vpack.c.b16 %v4113_v6, %v4113_v6  ;;  %v2508_v14 = vrot.slane %v2504_v61, 6  ;;  %v2752_v17 = vunpack.c.l.b16 %v5861_v3  ;;  %v2510_v18 = vrot.slane %v2505_v34, 5 }
 0x18b   : > { %v1509_v39 = vpop.permute.xlu0 %1508  ;;  %v5863_v45 = vld [vmem:[%s6131_s5 + $0x3c] ss:$0 sps:$4 sm:$0x11]   ;;  %v2507_v2 = vsel %vm239_vm0, %v2506_v9, %v2502_v1  ;;  %v2753_v19 = vunpack.c.l.b16 %v5862_v10  ;;  %v2755_v24 = vrot.slane %v2751_v16, 4 }
 0x18c   : > { %1511 = vst.msk [vmem:[#allocation2 + $0x8] sm:$0x3] %vm7491_vm11, %v1509_v39  ;;  %4115 = vrot.lane.b32.xlu1 %v4114_v12, %s6036_s10  ;;  %v2509_v60 = vsel %vm242_vm1, %v2508_v14, %v2507_v2  ;;  %v2754_v20 = vunpack.c.l.b16 %v5863_v45  ;;  %v2756_v22 = vrot.slane %v2752_v17, 3  ;;  %v5864_v23 = vld [vmem:[%s6131_s5 + $0x4] ss:$0 sps:$4 sm:$0x11]  }
 0x18d   : > { %v2511_v26 = vsel %vm245_vm2, %v2510_v18, %v2509_v60  ;;  %v2758_v27 = vrot.slane %v2753_v19, 2  ;;  %v5865_v28 = vld [vmem:[%s6131_s5 + $0xc] ss:$0 sps:$4 sm:$0x11]   ;;  %vm7493_vm11 = vcmask 523718   ;;  %v3004_v38 = vunpack.c.h.b16 %v5864_v23  ;;  %s5379_s10 = sshll.u32 %s6096_s19, 6 }
 0x18e   : > { %v2512_v30 = vpack.c.b16 %v2511_v26, %v2511_v26  ;;  %v2757_v31 = vsel %vm502_vm3, %v2756_v22, %v2755_v24  ;;  %v2760_v35 = vrot.slane %v2754_v20, 1  ;;  %v5866_v32 = vld [vmem:[%s6131_s5 + $0x14] ss:$0 sps:$4 sm:$0x11]   ;;  %v3005_v21 = vunpack.c.h.b16 %v5865_v28 }
 0x18f   : > { %v1760_v53 = vpop.permute.xlu1 %1759  ;;  %v2759_v33 = vsel %vm505_vm4, %v2758_v27, %v2757_v31  ;;  %v5867_v37 = vld [vmem:[%s6131_s5 + $0x1c] ss:$0 sps:$4 sm:$0x11]   ;;  %v3006_v40 = vunpack.c.h.b16 %v5866_v32  ;;  %v5868_v41 = vld [vmem:[%s6131_s5 + $0x24] ss:$0 sps:$4 sm:$0x11]  }
 0x190   : > { %1762 = vst.msk [vmem:[#allocation2 + $0x8] sm:$0xc] %vm7492_vm10, %v1760_v53  ;;  %2513 = vrot.lane.b32.xlu0 %v2512_v30, %s6045_s29  ;;  %v2761_v39 = vsel %vm508_vm5, %v2760_v35, %v2759_v33  ;;  %v3007_v42 = vunpack.c.h.b16 %v5867_v37  ;;  %v3008_v46 = vrot.slane %v3005_v21, 7  ;;  %v5869_v47 = vld [vmem:[%s6131_s5 + $0x2c] ss:$0 sps:$4 sm:$0x11]   ;;  %v3255_v48 = vunpack.c.l.b16 %v5868_v41 }
 0x191   : > { %v2762_v7 = vpack.c.b16 %v2761_v39, %v2761_v39  ;;  %v3010_v13 = vrot.slane %v3006_v40, 6  ;;  %v5870_v36 = vld [vmem:[%s6131_s5 + $0x34] ss:$0 sps:$4 sm:$0x11]   ;;  %v3256_v54 = vunpack.c.l.b16 %v5869_v47  ;;  %vm7494_vm10 = vcmask 259268  }
 0x192   : > { %v3009_v49 = vsel %vm239_vm0, %v3008_v46, %v3004_v38  ;;  %v3012_v51 = vrot.slane %v3007_v42, 5  ;;  %v5871_v52 = vld [vmem:[%s6131_s5 + $0x3c] ss:$0 sps:$4 sm:$0x11]   ;;  %v3257_v53 = vunpack.c.l.b16 %v5870_v36  ;;  %v3259_v57 = vrot.slane %v3255_v48, 4 }
 0x193   : > { %v2012_v11 = vpop.permute.xlu0 %2011  ;;  %2763 = vrot.lane.b32.xlu1 %v2762_v7, %s6045_s29  ;;  %v3011_v55 = vsel %vm242_vm1, %v3010_v13, %v3009_v49  ;;  %v5872_v59 = vld [vmem:[%s6131_s5 + $0x40] ss:$0 sps:$4 sm:$0x44]   ;;  %v3258_v15 = vunpack.c.l.b16 %v5871_v52  ;;  %v3260_v0 = vrot.slane %v3256_v54, 3 }
 0x194   : > { %2014 = vst.msk [vmem:[#allocation2 + $0x8] sm:$0x30] %vm7467_vm15, %v2012_v11  ;;  %v3013_v63 = vsel %vm245_vm2, %v3012_v51, %v3011_v55  ;;  %v5873_v25 = vld [vmem:[%s6131_s5 + $0x48] ss:$0 sps:$4 sm:$0x44]   ;;  %v3262_v5 = vrot.slane %v3257_v53, 2  ;;  %v3378_v61 = vunpack.c.l.b16 %v5872_v59 }
 0x195   : > { %v3014_v1 = vpack.c.b16 %v3013_v63, %v3013_v63  ;;  %v5874_v43 = vld [vmem:[%s6131_s5 + $0x50] ss:$0 sps:$4 sm:$0x44]   ;;  %v3261_v50 = vsel %vm502_vm3, %v3260_v0, %v3259_v57  ;;  %v3264_v3 = vrot.slane %v3258_v15, 1  ;;  %v3379_v34 = vunpack.c.l.b16 %v5873_v25 }
 0x196   : > { %v2264_v29 = vpop.permute.xlu1 %2263  ;;  %v5875_v6 = vld [vmem:[%s6131_s5 + $0x58] ss:$0 sps:$4 sm:$0x44]   ;;  %v3263_v10 = vsel %vm505_vm4, %v3262_v5, %v3261_v50  ;;  %v3380_v11 = vunpack.c.l.b16 %v5874_v43  ;;  %v3382_v12 = vrot.slane %v3378_v61, 4  ;;  %vm7503_vm15 = vcmask 123968  }
 0x197   : > { %2266 = vst.msk [vmem:[#allocation2 + $0x8] sm:$0xc0] %vm7493_vm11, %v2264_v29  ;;  %3015 = vrot.lane.b32.xlu0 %v3014_v1, %s6046_s30  ;;  %v5876_v14 = vld [vmem:[%s6131_s5 + $0x60] ss:$0 sps:$4 sm:$0x44]   ;;  %v3265_v16 = vsel %vm508_vm5, %v3264_v3, %v3263_v10  ;;  %v3381_v17 = vunpack.c.l.b16 %v5875_v6  ;;  %v3383_v2 = vrot.slane %v3379_v34, 3 }
 0x198   : > { %v5877_v18 = vld [vmem:[%s6131_s5 + $0x68] ss:$0 sps:$4 sm:$0x44]   ;;  %v3266_v19 = vpack.c.b16 %v3265_v16, %v3265_v16  ;;  %v3385_v60 = vrot.slane %v3380_v11, 2  ;;  %v3631_v26 = vunpack.c.l.b16 %v5876_v14  ;;  %vm7495_vm11 = vcmask 261318  }
 0x199   : > { %v5878_v20 = vld [vmem:[%s6131_s5 + $0x70] ss:$0 sps:$4 sm:$0x44]   ;;  %v3384_v24 = vsel %vm239_vm0, %v3383_v2, %v3382_v12  ;;  %v3387_v22 = vrot.slane %v3381_v17, 1  ;;  %v3632_v27 = vunpack.c.l.b16 %v5877_v18 }
 0x19a   : > { %v7100_v4 = vpop.permute.xlu0 %2386  ;;  %v5879_v23 = vld [vmem:[%s6131_s5 + $0x78] ss:$0 sps:$4 sm:$0x44]   ;;  %3267 = vrot.lane.b32.xlu1 %v3266_v19, %s6046_s30  ;;  %v3386_v28 = vsel %vm242_vm1, %v3385_v60, %v3384_v24  ;;  %v3633_v29 = vunpack.c.l.b16 %v5878_v20  ;;  %v5880_v30 = vld [vmem:[%s6131_s5 + $0x40] ss:$0 sps:$4 sm:$0x44]  }
 0x19b   : > { %v3388_v35 = vsel %vm245_vm2, %v3387_v22, %v3386_v28  ;;  %v3634_v32 = vunpack.c.l.b16 %v5879_v23  ;;  %v3635_v33 = vrot.slane %v3632_v27, 7  ;;  %v5881_v37 = vld [vmem:[%s6131_s5 + $0x48] ss:$0 sps:$4 sm:$0x44]   ;;  %v3880_v41 = vunpack.c.l.b16 %v5880_v30 }
 0x19c   : > { %v3389_v21 = vpack.c.b16 %v3388_v35, %v3388_v35  ;;  %v3637_v39 = vrot.slane %v3633_v29, 6  ;;  %v5882_v40 = vld [vmem:[%s6131_s5 + $0x50] ss:$0 sps:$4 sm:$0x44]   ;;  %v3881_v47 = vunpack.c.l.b16 %v5881_v37 }
 0x19d   : > { %v7112_v9 = vpop.permute.xlu1 %2638  ;;  %v3636_v7 = vsel %vm502_vm3, %v3635_v33, %v3631_v26  ;;  %v3639_v42 = vrot.slane %v3634_v32, 5  ;;  %v5883_v46 = vld [vmem:[%s6131_s5 + $0x58] ss:$0 sps:$4 sm:$0x44]   ;;  %v3882_v36 = vunpack.c.l.b16 %v5882_v40  ;;  %v3884_v48 = vrot.slane %v3880_v41, 4 }
 0x19e   : > { %v4277_v31 = vld [vmem:[#allocation2 + $0x8] sm:$0xff]  ;;  %3390 = vrot.lane.b32.xlu0 %v3389_v21, %s6037_s11  ;;  %v3638_v13 = vsel %vm505_vm4, %v3637_v39, %v3636_v7  ;;  %v5884_v49 = vld [vmem:[%s6131_s5 + $0x60] ss:$0 sps:$4 sm:$0x44]   ;;  %v3883_v52 = vunpack.c.l.b16 %v5883_v46  ;;  %v3885_v54 = vrot.slane %v3881_v47, 3 }
 0x19f   : > { %5391 = vmatpush3.bf16.msra.mxu0 %v4277_v31  ;;  %v3640_v51 = vsel %vm508_vm5, %v3639_v42, %v3638_v13  ;;  %v5885_v55 = vld [vmem:[%s6131_s5 + $0x68] ss:$0 sps:$4 sm:$0x44]   ;;  %v3887_v57 = vrot.slane %v3882_v36, 2  ;;  %v4135_v25 = vunpack.c.h.b16 %v5884_v49 }
 0x1a0   : > { %v2889_v45 = vpop.permute.xlu0 %2888  ;;  %5392 = vmatprep.subr.bf16.mxu0 %v6047_v44  ;;  %v3641_v53 = vpack.c.b16 %v3640_v51, %v3640_v51  ;;  %v5886_v59 = vld [vmem:[%s6131_s5 + $0x70] ss:$0 sps:$4 sm:$0x44]   ;;  %v3886_v63 = vsel %vm239_vm0, %v3885_v54, %v3884_v48  ;;  %v3889_v15 = vrot.slane %v3883_v52, 1  ;;  %v4136_v1 = vunpack.c.h.b16 %v5885_v55 }
 0x1a1   : > { %2891 = vst.msk [vmem:[#allocation2 + $0x10] sm:$0x30] %vm7494_vm10, %v2889_v45  ;;  %v5887_v0 = vld [vmem:[%s6131_s5 + $0x78] ss:$0 sps:$4 sm:$0x44]   ;;  %v3888_v43 = vsel %vm242_vm1, %v3887_v57, %v3886_v63  ;;  %v4137_v61 = vunpack.c.h.b16 %v5886_v59  ;;  %vm7496_vm10 = vcmask 324868  }
 0x1a2   : > { %3642 = vrot.lane.b32.xlu1 %v3641_v53, %s6037_s11  ;;  %v5888_v50 = vld [vmem:[%s6131_s5 + $0x40] ss:$0 sps:$4 sm:$0x44]   ;;  %v3890_v3 = vsel %vm245_vm2, %v3889_v15, %v3888_v43  ;;  %v4138_v6 = vunpack.c.h.b16 %v5887_v0  ;;  %v4139_v34 = vrot.slane %v4136_v1, 7 }
 0x1a3   : > { %v5889_v10 = vld [vmem:[%s6131_s5 + $0x48] ss:$0 sps:$4 sm:$0x44]   ;;  %v3891_v11 = vpack.c.b16 %v3890_v3, %v3890_v3  ;;  %v4141_v12 = vrot.slane %v4137_v61, 6  ;;  %v3410_v45 = vunpack.c.l.b16 %v5888_v50 }
 0x1a4   : > { %v3143_v38 = vpop.permute.xlu1 %3142  ;;  %v5890_v14 = vld [vmem:[%s6131_s5 + $0x50] ss:$0 sps:$4 sm:$0x44]   ;;  %v4140_v16 = vsel %vm502_vm3, %v4139_v34, %v4135_v25  ;;  %v4143_v17 = vrot.slane %v4138_v6, 5  ;;  %v3411_v18 = vunpack.c.l.b16 %v5889_v10 }
 0x1a5   : > { %3145 = vst.msk [vmem:[#allocation2 + $0x10] sm:$0xc0] %vm7495_vm11, %v3143_v38  ;;  %v5891_v2 = vld [vmem:[%s6131_s5 + $0x58] ss:$0 sps:$4 sm:$0x44]   ;;  %3892 = vrot.lane.b32.xlu0 %v3891_v11, %s6038_s12  ;;  %v4142_v60 = vsel %vm505_vm4, %v4141_v12, %v4140_v16  ;;  %v3412_v20 = vunpack.c.l.b16 %v5890_v14  ;;  %v3414_v24 = vrot.slane %v3410_v45, 5 }
 0x1a6   : > { %v5892_v22 = vld [vmem:[%s6131_s5 + $0x60] ss:$0 sps:$4 sm:$0x44]   ;;  %v4144_v23 = vsel %vm508_vm5, %v4143_v17, %v4142_v60  ;;  %v3413_v26 = vunpack.c.l.b16 %v5891_v2  ;;  %v3415_v27 = vrot.slane %v3411_v18, 4  ;;  %vm7497_vm11 = vcmask 326918  }
 0x1a7   : > { %v5893_v28 = vld [vmem:[%s6131_s5 + $0x68] ss:$0 sps:$4 sm:$0x44]   ;;  %v4145_v30 = vpack.c.b16 %v4144_v23, %v4144_v23  ;;  %v3417_v31 = vrot.slane %v3412_v20, 3  ;;  %v3662_v32 = vunpack.c.l.b16 %v5892_v22 }
 0x1a8   : > { %v5894_v35 = vld [vmem:[%s6131_s5 + $0x70] ss:$0 sps:$4 sm:$0x44]   ;;  %v3416_v33 = vsel %vm239_vm0, %v3415_v27, %v3414_v24  ;;  %v3419_v37 = vrot.slane %v3413_v26, 2  ;;  %v3663_v21 = vunpack.c.l.b16 %v5893_v28 }
 0x1a9   : > { %v5895_v38 = vld [vmem:[%s6131_s5 + $0x78] ss:$0 sps:$4 sm:$0x44]   ;;  %4146 = vrot.lane.b32.xlu1 %v4145_v30, %s6038_s12  ;;  %v3418_v39 = vsel %vm242_vm1, %v3417_v31, %v3416_v33  ;;  %v3664_v40 = vunpack.c.l.b16 %v5894_v35  ;;  %v3666_v41 = vrot.slane %v3662_v32, 1 }
 0x1aa   : > { %v5896_v7 = vld [vmem:[%s6131_s5 + $0x40] ss:$0 sps:$4 sm:$0x44]   ;;  %v3420_v42 = vsel %vm245_vm2, %v3419_v37, %v3418_v39  ;;  %v3665_v46 = vunpack.c.l.b16 %v5895_v38  ;;  %v5897_v47 = vld [vmem:[%s6131_s5 + $0x48] ss:$0 sps:$4 sm:$0x44]  }
 0x1ab   : > { %v7151_v19 = vpop.permute.xlu1 %2669  ;;  %v5898_v13 = vld [vmem:[%s6131_s5 + $0x50] ss:$0 sps:$4 sm:$0x44]   ;;  %v3421_v48 = vpack.c.b16 %v3420_v42, %v3420_v42  ;;  %v3667_v49 = vsel %vm502_vm3, %v3663_v21, %v3666_v41  ;;  %v3668_v51 = vrot.slane %v3664_v40, 7  ;;  %v3912_v54 = vunpack.c.l.b16 %v5896_v7 }
 0x1ac   : > { %v7141_v5 = vpop.permute.xlu0 %2418  ;;  %v5899_v52 = vld [vmem:[%s6131_s5 + $0x58] ss:$0 sps:$4 sm:$0x44]   ;;  %v3670_v55 = vrot.slane %v3665_v46, 6  ;;  %v3913_v53 = vunpack.c.l.b16 %v5897_v47  ;;  %v3914_v57 = vunpack.c.l.b16 %v5898_v13 }
 0x1ad   : > { %3422 = vrot.lane.b32.xlu0 %v3421_v48, %s6039_s13  ;;  %v3669_v59 = vsel %vm505_vm4, %v3668_v51, %v3667_v49  ;;  %v3915_v63 = vunpack.c.l.b16 %v5899_v52  ;;  %v3916_v15 = vrot.slane %v3912_v54, 5  ;;  %v5900_v0 = vld [vmem:[%s6131_s5 + $0x60] ss:$0 sps:$4 sm:$0x44]  }
 0x1ae   : > { %v3671_v25 = vsel %vm508_vm5, %v3670_v55, %v3669_v59  ;;  %v3917_v1 = vrot.slane %v3913_v53, 4  ;;  %v3919_v43 = vrot.slane %v3914_v57, 3  ;;  %v5901_v61 = vld [vmem:[%s6131_s5 + $0x68] ss:$0 sps:$4 sm:$0x44]   ;;  %v4166_v10 = vunpack.c.l.b16 %v5900_v0 }
 0x1af   : > { %v3672_v3 = vpack.c.b16 %v3671_v25, %v3671_v25  ;;  %v3921_v6 = vrot.slane %v3915_v63, 2  ;;  %v5902_v34 = vld [vmem:[%s6131_s5 + $0x70] ss:$0 sps:$4 sm:$0x44]   ;;  %v4167_v14 = vunpack.c.l.b16 %v5901_v61 }
 0x1b0   : > { %v2921_v29 = vpop.permute.xlu0 %2920  ;;  %v3918_v11 = vsel %vm239_vm0, %v3917_v1, %v3916_v15  ;;  %v5903_v12 = vld [vmem:[%s6131_s5 + $0x78] ss:$0 sps:$4 sm:$0x44]   ;;  %v4168_v16 = vunpack.c.l.b16 %v5902_v34  ;;  %v4170_v17 = vrot.slane %v4166_v10, 1 }
 0x1b1   : > { %2923 = vst.msk [vmem:[#allocation2 + $0x10] sm:$0x30] %vm7496_vm10, %v2921_v29  ;;  %vm7498_vm10 = vcmask 62468   ;;  %3673 = vrot.lane.b32.xlu1 %v3672_v3, %s6039_s13  ;;  %v3920_v45 = vsel %vm242_vm1, %v3919_v43, %v3918_v11  ;;  %v4169_v18 = vunpack.c.l.b16 %v5903_v12  ;;  %v5904_v60 = vld [vmem:[%s6131_s5 + $0x40] ss:$0 sps:$4 sm:$0x88]   ;;  %s7395_s13 = scalar_lea.hbm %s7440_s2, %s5379_s10 }
 0x1b2   : > { %v3922_v2 = vsel %vm245_vm2, %v3921_v6, %v3920_v45  ;;  %v5905_v20 = vld [vmem:[%s6131_s5 + $0x48] ss:$0 sps:$4 sm:$0x88]   ;;  %v4171_v22 = vsel %vm502_vm3, %v4167_v14, %v4170_v17  ;;  %v4172_v23 = vrot.slane %v4168_v16, 7  ;;  %v3442_v30 = vunpack.c.l.b16 %v5904_v60 }
 0x1b3   : > { %v3174_v36 = vpop.permute.xlu1 %3173  ;;  %v3923_v24 = vpack.c.b16 %v3922_v2, %v3922_v2  ;;  %v5906_v26 = vld [vmem:[%s6131_s5 + $0x50] ss:$0 sps:$4 sm:$0x88]   ;;  %v4174_v28 = vrot.slane %v4169_v18, 6  ;;  %v3443_v31 = vunpack.c.l.b16 %v5905_v20 }
 0x1b4   : > { %3176 = vst.msk [vmem:[#allocation2 + $0x10] sm:$0xc0] %vm7497_vm11, %v3174_v36  ;;  %v5907_v29 = vld [vmem:[%s6131_s5 + $0x58] ss:$0 sps:$4 sm:$0x88]   ;;  %vm7499_vm11 = vcmask 64518   ;;  %v4173_v35 = vsel %vm505_vm4, %v4172_v23, %v4171_v22  ;;  %v3444_v32 = vunpack.c.l.b16 %v5906_v26 }
 0x1b5   : > { %v3799_v50 = vpop.permute.xlu0 %3798  ;;  %3924 = vrot.lane.b32.xlu0 %v3923_v24, %s6040_s14  ;;  %v4175_v33 = vsel %vm508_vm5, %v4174_v28, %v4173_v35  ;;  %v3445_v37 = vunpack.c.l.b16 %v5907_v29  ;;  %v3446_v38 = vrot.slane %v3442_v30, 6  ;;  %v3447_v21 = vrot.slane %v3443_v31, 5  ;;  %v5908_v39 = vld [vmem:[%s6131_s5 + $0x60] ss:$0 sps:$4 sm:$0x88]  }
 0x1b6   : > { %3801 = vst.msk [vmem:[#allocation2 + $0x18] sm:$0x30] %vm7498_vm10, %v3799_v50  ;;  %v4176_v40 = vpack.c.b16 %v4175_v33, %v4175_v33  ;;  %v3449_v41 = vrot.slane %v3444_v32, 4  ;;  %v5909_v7 = vld [vmem:[%s6131_s5 + $0x68] ss:$0 sps:$4 sm:$0x88]   ;;  %v3693_v13 = vunpack.c.l.b16 %v5908_v39 }
 0x1b7   : > { %v3448_v42 = vsel %vm239_vm0, %v3447_v21, %v3446_v38  ;;  %v3451_v46 = vrot.slane %v3445_v37, 3  ;;  %v5910_v47 = vld [vmem:[%s6131_s5 + $0x70] ss:$0 sps:$4 sm:$0x88]   ;;  %v3694_v49 = vunpack.c.l.b16 %v5909_v7  ;;  %vm7500_vm10 = vcmask 390468  }
 0x1b8   : > { %4177 = vrot.lane.b32.xlu1 %v4176_v40, %s6040_s14  ;;  %v3450_v36 = vsel %vm242_vm1, %v3449_v41, %v3448_v42  ;;  %v5911_v48 = vld [vmem:[%s6131_s5 + $0x78] ss:$0 sps:$4 sm:$0x88]   ;;  %v3695_v52 = vunpack.c.l.b16 %v5910_v47  ;;  %v3697_v54 = vrot.slane %v3693_v13, 2  ;;  %s4359_s14 = sshll.u32 %s191_s9, 4  ;;  %s4360_s14 = int_to_ptr.vmem [resolvable:$true] %s4359_s14 }
 0x1b9   : > { %v3452_v51 = vsel %vm245_vm2, %v3451_v46, %v3450_v36  ;;  %v5912_v55 = vld [vmem:[%s6131_s5 + $0x40] ss:$0 sps:$4 sm:$0x88]   ;;  %v3696_v57 = vunpack.c.l.b16 %v5911_v48  ;;  %v3698_v59 = vrot.slane %v3694_v49, 1 }
 0x1ba   : > { %v4052_v27 = vpop.permute.xlu1 %4051  ;;  %v3453_v53 = vpack.c.b16 %v3452_v51, %v3452_v51  ;;  %v5913_v63 = vld [vmem:[%s6131_s5 + $0x48] ss:$0 sps:$4 sm:$0x88]   ;;  %v5914_v15 = vld [vmem:[%s6131_s5 + $0x50] ss:$0 sps:$4 sm:$0x88]   ;;  %v3944_v25 = vunpack.c.l.b16 %v5912_v55 }
 0x1bb   : > { %4054 = vst.msk [vmem:[#allocation2 + $0x18] sm:$0xc0] %vm7499_vm11, %v4052_v27  ;;  %v5915_v0 = vld [vmem:[%s6131_s5 + $0x58] ss:$0 sps:$4 sm:$0x88]   ;;  %v3699_v1 = vsel %vm502_vm3, %v3698_v59, %v3697_v54  ;;  %v3701_v43 = vrot.slane %v3696_v57, 7  ;;  %v3945_v61 = vunpack.c.l.b16 %v5913_v63  ;;  %v3946_v3 = vunpack.c.l.b16 %v5914_v15 }
 0x1bc   : > { %3454 = vrot.lane.b32.xlu0 %v3453_v53, %s6041_s20  ;;  %v3700_v50 = vsel %vm505_vm4, %v3695_v52, %v3699_v1  ;;  %v3947_v6 = vunpack.c.l.b16 %v5915_v0  ;;  %v3948_v34 = vrot.slane %v3944_v25, 6  ;;  %v5916_v10 = vld [vmem:[%s6131_s5 + $0x60] ss:$0 sps:$4 sm:$0x88]   ;;  %vm7501_vm11 = vcmask 392518  }
 0x1bd   : > { %v3702_v11 = vsel %vm508_vm5, %v3701_v43, %v3700_v50  ;;  %v3949_v12 = vrot.slane %v3945_v61, 5  ;;  %v5917_v14 = vld [vmem:[%s6131_s5 + $0x68] ss:$0 sps:$4 sm:$0x88]   ;;  %v3951_v16 = vrot.slane %v3946_v3, 4  ;;  %v4197_v18 = vunpack.c.l.b16 %v5916_v10  ;;  %v7211_v60 = vpop.permute.xlu0 %2450 }
 0x1be   : > { %v3703_v45 = vpack.c.b16 %v3702_v11, %v3702_v11  ;;  %v3953_v17 = vrot.slane %v3947_v6, 3  ;;  %v5918_v2 = vld [vmem:[%s6131_s5 + $0x70] ss:$0 sps:$4 sm:$0x88]   ;;  %v4198_v22 = vunpack.c.l.b16 %v5917_v14 }
 0x1bf   : > { %v3950_v20 = vsel %vm239_vm0, %v3949_v12, %v3948_v34  ;;  %v5919_v24 = vld [vmem:[%s6131_s5 + $0x78] ss:$0 sps:$4 sm:$0x88]   ;;  %v4199_v26 = vunpack.c.l.b16 %v5918_v2  ;;  %v4201_v27 = vrot.slane %v4197_v18, 2 }
 0x1c0   : > { %3704 = vrot.lane.b32.xlu1 %v3703_v45, %s6041_s20  ;;  %v3952_v23 = vsel %vm242_vm1, %v3951_v16, %v3950_v20  ;;  %v5920_v28 = vld [vmem:[%s6131_s5] ss:$0 sps:$4 sm:$0x11]   ;;  %v4200_v30 = vunpack.c.l.b16 %v5919_v24  ;;  %v4202_v31 = vrot.slane %v4198_v22, 1  ;;  %s4338_s20 = scalar_lea.sflag [#allocation4], %s189_s7 }
 0x1c1   : > { %v3954_v29 = vsel %vm245_vm2, %v3953_v17, %v3952_v23  ;;  %v5921_v35 = vld [vmem:[%s6131_s5 + $0x8] ss:$0 sps:$4 sm:$0x11]   ;;  %v5922_v33 = vld [vmem:[%s6131_s5 + $0x10] ss:$0 sps:$4 sm:$0x11]   ;;  %v2283_v38 = vunpack.c.l.b16 %v5920_v28  ;;  %v7222_v21 = vpop.permute.xlu1 %2700 }
 0x1c2   : > { %v3955_v32 = vpack.c.b16 %v3954_v29, %v3954_v29  ;;  %v5923_v37 = vld [vmem:[%s6131_s5 + $0x18] ss:$0 sps:$4 sm:$0x11]   ;;  %v4203_v39 = vsel %vm502_vm3, %v4202_v31, %v4201_v27  ;;  %v4205_v40 = vrot.slane %v4200_v30, 7  ;;  %v2284_v41 = vunpack.c.l.b16 %v5921_v35 }
 0x1c3   : > { %v4204_v7 = vsel %vm505_vm4, %v4199_v26, %v4203_v39  ;;  %v2285_v42 = vunpack.c.l.b16 %v5922_v33  ;;  %v2286_v46 = vunpack.c.l.b16 %v5923_v37  ;;  %v2287_v47 = vrot.slane %v2283_v38, 1  ;;  %v5924_v13 = vld [vmem:[%s6131_s5 + $0x20] ss:$0 sps:$4 sm:$0x11]  }
 0x1c4   : > { %3956 = vrot.lane.b32.xlu0 %v3955_v32, %s6042_s22  ;;  %v4206_v48 = vsel %vm508_vm5, %v4205_v40, %v4204_v7  ;;  %v5925_v49 = vld [vmem:[%s6131_s5 + $0x28] ss:$0 sps:$4 sm:$0x11]   ;;  %v5926_v51 = vld [vmem:[%s6131_s5 + $0x30] ss:$0 sps:$4 sm:$0x11]   ;;  %v2533_v59 = vunpack.c.l.b16 %v5924_v13 }
 0x1c5   : > { %v4207_v52 = vpack.c.b16 %v4206_v48, %v4206_v48  ;;  %v2288_v54 = vsel %vm239_vm0, %v2284_v41, %v2287_v47  ;;  %v2289_v55 = vrot.slane %v2285_v42, 7  ;;  %v2291_v53 = vrot.slane %v2286_v46, 6  ;;  %v5927_v57 = vld [vmem:[%s6131_s5 + $0x38] ss:$0 sps:$4 sm:$0x11]  }
 0x1c6   : > { %v2534_v63 = vunpack.c.l.b16 %v5925_v49  ;;  %v2535_v15 = vunpack.c.l.b16 %v5926_v51  ;;  %v2536_v25 = vunpack.c.l.b16 %v5927_v57  ;;  %v5928_v1 = vld [vmem:[%s6131_s5 + $0x40] ss:$0 sps:$4 sm:$0x88]   ;;  %v2537_v50 = vrot.slane %v2533_v59, 5 }
 0x1c7   : > { %4208 = vrot.lane.b32.xlu1 %v4207_v52, %s6042_s22  ;;  %v2290_v0 = vsel %vm242_vm1, %v2289_v55, %v2288_v54  ;;  %v5929_v34 = vld [vmem:[%s6131_s5 + $0x48] ss:$0 sps:$4 sm:$0x88]   ;;  %v5930_v12 = vld [vmem:[%s6131_s5 + $0x50] ss:$0 sps:$4 sm:$0x88]   ;;  %v3474_v14 = vunpack.c.l.b16 %v5928_v1 }
 0x1c8   : > { %v2292_v61 = vsel %vm245_vm2, %v2291_v53, %v2290_v0  ;;  %v2538_v3 = vrot.slane %v2534_v63, 4  ;;  %v2540_v6 = vrot.slane %v2535_v15, 3  ;;  %v2542_v11 = vrot.slane %v2536_v25, 2  ;;  %v5931_v16 = vld [vmem:[%s6131_s5 + $0x58] ss:$0 sps:$4 sm:$0x88]  }
 0x1c9   : > { %v2293_v10 = vpack.c.b16 %v2292_v61, %v2292_v61  ;;  %v3475_v17 = vunpack.c.l.b16 %v5929_v34  ;;  %v3476_v18 = vunpack.c.l.b16 %v5930_v12  ;;  %v3478_v20 = vrot.slane %v3474_v14, 7  ;;  %v5932_v26 = vld [vmem:[%s6131_s5 + $0x60] ss:$0 sps:$4 sm:$0x88]   ;;  %s5968_s22 = scalar_lea.vmem %s4360_s14, 64 }
 0x1ca   : > { %v2539_v45 = vsel %vm502_vm3, %v2538_v3, %v2537_v50  ;;  %v3477_v22 = vunpack.c.l.b16 %v5931_v16  ;;  %v5933_v29 = vld [vmem:[%s6131_s5 + $0x68] ss:$0 sps:$4 sm:$0x88]   ;;  %v5934_v32 = vld [vmem:[%s6131_s5 + $0x70] ss:$0 sps:$4 sm:$0x88]   ;;  %p5969_p11 = scmp.ne.s32.totalorder %s4360_s14, %s5968_s22 }
 0x1cb   : > { %v2541_v2 = vsel %vm505_vm4, %v2540_v6, %v2539_v45  ;;  %v3479_v23 = vrot.slane %v3475_v17, 6  ;;  %v3481_v28 = vrot.slane %v3476_v18, 5  ;;  %v5935_v37 = vld [vmem:[%s6131_s5 + $0x78] ss:$0 sps:$4 sm:$0x88]   ;;  %v3725_v38 = vunpack.c.l.b16 %v5933_v29 }
 0x1cc   : > { %v2953_v36 = vpop.permute.xlu0 %2952  ;;  %v2543_v24 = vsel %vm508_vm5, %v2542_v11, %v2541_v2  ;;  %v3483_v35 = vrot.slane %v3477_v22, 4  ;;  %v3726_v39 = vunpack.c.l.b16 %v5934_v32  ;;  %v5936_v41 = vld [vmem:[%s6131_s5 + $0x40] ss:$0 sps:$4 sm:$0x88]   ;;  %v3727_v7 = vunpack.c.l.b16 %v5935_v37  ;;  %p5970_p12 = pnand %p5969_p11, %p6113_p5 }
 0x1cd   : > { %2955 = vst.msk [vmem:[#allocation2 + $0x10] sm:$0x30] %vm7500_vm10, %v2953_v36  ;;  %vm7502_vm10 = vcmask 58368   ;;  %v2544_v27 = vpack.c.b16 %v2543_v24, %v2543_v24  ;;  %v3480_v31 = vsel %vm239_vm0, %v3479_v23, %v3478_v20  ;;  %v3729_v42 = vrot.slane %v3725_v38, 2 }
 0x1ce   : > { %2295 = vst.msk [vmem:[#allocation2 + $0x10] sm:$0x3] %vm7502_vm10, %v2293_v10  ;;  %v3482_v33 = vsel %vm242_vm1, %v3481_v28, %v3480_v31  ;;  %vm7506_vm10 = vcmask 320768   ;;  %v5937_v46 = vld [vmem:[%s6131_s5 + $0x48] ss:$0 sps:$4 sm:$0x88]   ;;  %v3976_v13 = vunpack.c.l.b16 %v5936_v41  ;;  %p5971_p13 = pneg %p5970_p12 }
 0x1cf   : > { %2326 = vst.msk [vmem:[#allocation2 + $0x10] sm:$0x3] %vm7503_vm15, %v6967_v8  ;;  %v3724_v8 = vunpack.c.l.b16 %v5932_v26  ;;  %vm7505_vm15 = vcmask 255168   ;;  %v5938_v47 = vld [vmem:[%s6131_s5 + $0x50] ss:$0 sps:$4 sm:$0x88]   ;;  %v3977_v48 = vunpack.c.l.b16 %v5937_v46 }
 0x1d0   : > { %2546 = vst.msk [vmem:[#allocation2 + $0x10] sm:$0xc] %vm512_vm6, %v2544_v27  ;;  %v5939_v36 = vld [vmem:[%s6131_s5 + $0x58] ss:$0 sps:$4 sm:$0x88]   ;;  %v3978_v51 = vunpack.c.l.b16 %v5938_v47  ;;  %v3980_v52 = vrot.slane %v3976_v13, 7 }
 0x1d1   : > { %v3205_v43 = vpop.permute.xlu1 %3204  ;;  %2578 = vst.msk [vmem:[#allocation2 + $0x10] sm:$0xc] %vm545_vm7, %v6969_v56  ;;  %v3728_v40 = vrot.slane %v3724_v8, 3  ;;  %v3731_v56 = vrot.slane %v3726_v39, 1  ;;  %v3979_v55 = vunpack.c.l.b16 %v5939_v36  ;;  %v3981_v53 = vrot.slane %v3977_v48, 6 }
 0x1d2   : > { %3207 = vst.msk [vmem:[#allocation2 + $0x10] sm:$0xc0] %vm7501_vm11, %v3205_v43  ;;  %vm7504_vm11 = vcmask 189568   ;;  %v5940_v54 = vld [vmem:[%s6131_s5 + $0x60] ss:$0 sps:$4 sm:$0x88]  }
 0x1d3   : > { %2357 = vst.msk [vmem:[#allocation2 + $0x10] sm:$0x3] %vm7504_vm11, %v7034_v62  ;;  %v3484_v62 = vsel %vm245_vm2, %v3483_v35, %v3482_v33  ;;  %vm7507_vm11 = vcmask 386368   ;;  %v5941_v57 = vld [vmem:[%s6131_s5 + $0x68] ss:$0 sps:$4 sm:$0x88]   ;;  %v4228_v15 = vunpack.c.l.b16 %v5940_v54  ;;  %v3982_v0 = vsel %vm239_vm0, %v3981_v53, %v3980_v52 }
 0x1d4   : > { %2389 = vst.msk [vmem:[#allocation2 + $0x10] sm:$0x3] %vm7505_vm15, %v7100_v4  ;;  %v3485_v4 = vpack.c.b16 %v3484_v62, %v3484_v62  ;;  %vm7508_vm15 = vcmask 128068   ;;  %v5942_v63 = vld [vmem:[%s6131_s5 + $0x70] ss:$0 sps:$4 sm:$0x88]   ;;  %v4229_v43 = vunpack.c.l.b16 %v5941_v57 }
 0x1d5   : > { %v7252_v30 = vpop.permute.xlu0 %3327  ;;  %2421 = vst.msk [vmem:[#allocation2 + $0x10] sm:$0x3] %vm7506_vm10, %v7141_v5  ;;  %v3985_v25 = vrot.slane %v3979_v55, 4  ;;  %v5943_v1 = vld [vmem:[%s6131_s5 + $0x78] ss:$0 sps:$4 sm:$0x88]   ;;  %v4230_v50 = vunpack.c.l.b16 %v5942_v63 }
 0x1d6   : > { %2453 = vst.msk [vmem:[#allocation2 + $0x10] sm:$0x3] %vm7507_vm11, %v7211_v60  ;;  %3486 = vrot.lane.b32.xlu0 %v3485_v4, %s6043_s23  ;;  %v3730_v60 = vsel %vm502_vm3, %v3729_v42, %v3728_v40  ;;  %v4232_v3 = vrot.slane %v4228_v15, 3  ;;  %v5944_v6 = vld [vmem:[%s6131_s5 + $0x44] ss:$0 sps:$4 sm:$0x11]   ;;  %v4231_v10 = vunpack.c.l.b16 %v5943_v1 }
 0x1d7   : > { %2610 = vst.msk [vmem:[#allocation2 + $0x10] sm:$0xc] %vm578_vm13, %v7038_v58  ;;  %v3732_v49 = vsel %vm505_vm4, %v3731_v56, %v3730_v60  ;;  %vm7509_vm10 = vcmask 130118   ;;  %v4233_v11 = vrot.slane %v4229_v43, 2  ;;  %v4235_v45 = vrot.slane %v4230_v50, 1 }
 0x1d8   : > { %2641 = vst.msk [vmem:[#allocation2 + $0x10] sm:$0xc] %vm611_vm14, %v7112_v9  ;;  %v3733_v9 = vsel %vm508_vm5, %v3727_v7, %v3732_v49  ;;  %v5945_v12 = vld [vmem:[%s6131_s5 + $0x4c] ss:$0 sps:$4 sm:$0x11]   ;;  %v3506_v18 = vunpack.c.l.b16 %v5944_v6  ;;  %vm7510_vm11 = vcmask 451968  }
 0x1d9   : > { %v7272_v5 = vpop.permute.xlu1 %3579  ;;  %2672 = vst.msk [vmem:[#allocation2 + $0x10] sm:$0xc] %vm643_vm9, %v7151_v19  ;;  %v3734_v59 = vpack.c.b16 %v3733_v9, %v3733_v9  ;;  %v3983_v19 = vrot.slane %v3978_v51, 5  ;;  %v5946_v16 = vld [vmem:[%s6131_s5 + $0x54] ss:$0 sps:$4 sm:$0x11]   ;;  %v4234_v17 = vsel %vm502_vm3, %v4233_v11, %v4232_v3  ;;  %v3507_v20 = vunpack.c.l.b16 %v5945_v12 }
 0x1da   : > { %2703 = vst.msk [vmem:[#allocation2 + $0x10] sm:$0xc] %vm675_vm12, %v7222_v21  ;;  %v5947_v2 = vld [vmem:[%s6131_s5 + $0x5c] ss:$0 sps:$4 sm:$0x11]   ;;  %v4236_v22 = vsel %vm505_vm4, %v4235_v45, %v4234_v17  ;;  %v3508_v23 = vunpack.c.l.b16 %v5946_v16 }
 0x1db   : > { %3735 = vrot.lane.b32.xlu1 %v3734_v59, %s6043_s23  ;;  %v3984_v61 = vsel %vm242_vm1, %v3983_v19, %v3982_v0  ;;  %v5948_v26 = vld [vmem:[%s6131_s5 + $0x64] ss:$0 sps:$4 sm:$0x11]   ;;  %v5949_v27 = vld [vmem:[%s6131_s5 + $0x6c] ss:$0 sps:$4 sm:$0x11]   ;;  %v4237_v28 = vsel %vm508_vm5, %v4231_v10, %v4236_v22  ;;  %v3509_v29 = vunpack.c.l.b16 %v5947_v2 }
 0x1dc   : > { %v3986_v34 = vsel %vm245_vm2, %v3985_v25, %v3984_v61  ;;  %v3510_v31 = vrot.slane %v3507_v20, 7  ;;  %v5950_v35 = vld [vmem:[%s6131_s5 + $0x74] ss:$0 sps:$4 sm:$0x11]   ;;  %v4238_v32 = vpack.c.b16 %v4237_v28, %v4237_v28  ;;  %v3512_v8 = vrot.slane %v3508_v23, 6  ;;  %s6049_s23 = smov [#allocation3]  }
 0x1dd   : > { %v3830_v58 = vpop.permute.xlu0 %3829  ;;  %v3987_v14 = vpack.c.b16 %v3986_v34, %v3986_v34  ;;  %v5951_v33 = vld [vmem:[%s6131_s5 + $0x7c] ss:$0 sps:$4 sm:$0x11]   ;;  %v3755_v37 = vunpack.c.l.b16 %v5948_v26  ;;  %v3756_v38 = vunpack.c.l.b16 %v5949_v27  ;;  %v3514_v39 = vrot.slane %v3509_v29, 5 }
 0x1de   : > { %3832 = vst.msk [vmem:[#allocation2 + $0x18] sm:$0x30] %vm7508_vm15, %v3830_v58  ;;  %v3511_v62 = vsel %vm239_vm0, %v3510_v31, %v3506_v18  ;;  %v3757_v40 = vunpack.c.l.b16 %v5950_v35  ;;  %v3758_v4 = vunpack.c.l.b16 %v5951_v33  ;;  %v5952_v46 = vld [vmem:[%s6131_s5 + $0x44] ss:$0 sps:$4 sm:$0x11]   ;;  %vm7511_vm15 = vcmask 456068  }
 0x1df   : > { %3988 = vrot.lane.b32.xlu0 %v3987_v14, %s6044_s28  ;;  %4239 = vrot.lane.b32.xlu1 %v4238_v32, %s6044_s28  ;;  %v3513_v41 = vsel %vm242_vm1, %v3512_v8, %v3511_v62  ;;  %v3759_v7 = vrot.slane %v3755_v37, 4  ;;  %v3760_v42 = vrot.slane %v3756_v38, 3  ;;  %v5953_v60 = vld [vmem:[%s6131_s5 + $0x4c] ss:$0 sps:$4 sm:$0x11]   ;;  %v4008_v54 = vunpack.c.h.b16 %v5952_v46  ;;  %s5972_s28 = sshll.u32 %s6049_s23, 4  ;;  %s5973_s28 = int_to_ptr.vmem [resolvable:$false] %s5972_s28 }
 0x1e0   : > { %v3515_v47 = vsel %vm245_vm2, %v3514_v39, %v3513_v41  ;;  %v3762_v13 = vrot.slane %v3757_v40, 2  ;;  %v3764_v58 = vrot.slane %v3758_v4, 1  ;;  %v5954_v49 = vld [vmem:[%s6131_s5 + $0x54] ss:$0 sps:$4 sm:$0x11]   ;;  %v4009_v9 = vunpack.c.h.b16 %v5953_v60  ;;  %p5975_p0 = scmp.lt.s32.totalorder %s4360_s14, %s5973_s28 }
 0x1e1   : > { %v4084_v21 = vpop.permute.xlu1 %4083  ;;  %v3516_v36 = vpack.c.b16 %v3515_v47, %v3515_v47  ;;  %v3761_v48 = vsel %vm502_vm3, %v3760_v42, %v3759_v7  ;;  %v5955_v52 = vld [vmem:[%s6131_s5 + $0x5c] ss:$0 sps:$4 sm:$0x11]   ;;  %v4010_v53 = vunpack.c.h.b16 %v5954_v49  ;;  %v5956_v57 = vld [vmem:[%s6131_s5 + $0x64] ss:$0 sps:$4 sm:$0x11]  }
 0x1e2   : > { %4086 = vst.msk [vmem:[#allocation2 + $0x18] sm:$0xc0] %vm7509_vm10, %v4084_v21  ;;  %v3763_v51 = vsel %vm505_vm4, %v3762_v13, %v3761_v48  ;;  %v4011_v63 = vunpack.c.h.b16 %v5955_v52  ;;  %v4012_v15 = vrot.slane %v4009_v9, 7  ;;  %v5957_v0 = vld [vmem:[%s6131_s5 + $0x6c] ss:$0 sps:$4 sm:$0x11]   ;;  %v4259_v43 = vunpack.c.l.b16 %v5956_v57 }
 0x1e3   : > { %3517 = vrot.lane.b32.xlu0 %v3516_v36, %s6045_s29  ;;  %v3765_v55 = vsel %vm508_vm5, %v3764_v58, %v3763_v51  ;;  %v4014_v25 = vrot.slane %v4010_v53, 6  ;;  %v5958_v1 = vld [vmem:[%s6131_s5 + $0x74] ss:$0 sps:$4 sm:$0x11]   ;;  %v4260_v3 = vunpack.c.l.b16 %v5957_v0  ;;  %vm7512_vm10 = vcmask 458118  }
 0x1e4   : > { %v2483_v24 = vpop.permute.xlu0 %2482  ;;  %v3766_v19 = vpack.c.b16 %v3765_v55, %v3765_v55  ;;  %v4013_v21 = vsel %vm239_vm0, %v4012_v15, %v4008_v54  ;;  %v4016_v61 = vrot.slane %v4011_v63, 5  ;;  %v5959_v50 = vld [vmem:[%s6131_s5 + $0x7c] ss:$0 sps:$4 sm:$0x11]   ;;  %v4261_v34 = vunpack.c.l.b16 %v5958_v1 }
 0x1e5   : > { %2485 = vst.msk [vmem:[#allocation2 + $0x10] sm:$0x3] %vm7510_vm11, %v2483_v24  ;;  %v4015_v6 = vsel %vm242_vm1, %v4014_v25, %v4013_v21  ;;  %v4263_v10 = vrot.slane %v4259_v43, 4  ;;  %v5960_v11 = vld [vmem:[%s6131_s5 + $0x40] ss:$0 sps:$4 sm:$0x11]   ;;  %v4262_v45 = vunpack.c.l.b16 %v5959_v50 }
 0x1e6   : > { %3767 = vrot.lane.b32.xlu1 %v3766_v19, %s6045_s29  ;;  %v4017_v14 = vsel %vm245_vm2, %v4016_v61, %v4015_v6  ;;  %v4264_v16 = vrot.slane %v4260_v3, 3  ;;  %v5961_v17 = vld [vmem:[%s6131_s5 + $0x48] ss:$0 sps:$4 sm:$0x11]   ;;  %v4266_v18 = vrot.slane %v4261_v34, 2  ;;  %v3287_v24 = vunpack.c.l.b16 %v5960_v11  ;;  %s5974_s29 = scalar_lea.vmem %s5973_s28, 128 }
 0x1e7   : > { %v4018_v2 = vpack.c.b16 %v4017_v14, %v4017_v14  ;;  %v5962_v20 = vld [vmem:[%s6131_s5 + $0x50] ss:$0 sps:$4 sm:$0x11]   ;;  %v4268_v23 = vrot.slane %v4262_v45, 1  ;;  %v3288_v27 = vunpack.c.l.b16 %v5961_v17  ;;  %vm6048_vm11 = vmmov 0   ;;  %p5976_p1 = scmp.lt.s32.totalorder %s5974_s29, %s5968_s22 }
 0x1e8   : > { %v2732_v56 = vpop.permute.xlu1 %2731  ;;  %v4265_v22 = vsel %vm502_vm3, %v4264_v16, %v4263_v10  ;;  %v5963_v26 = vld [vmem:[%s6131_s5 + $0x58] ss:$0 sps:$4 sm:$0x11]   ;;  %v3289_v29 = vunpack.c.l.b16 %v5962_v20  ;;  %v3291_v31 = vrot.slane %v3287_v24, 1  ;;  %5396 = vmatprep.mubr.msk.bf16.mxu0 %vm6048_vm11, %v6047_v44  ;;  %vm7521_vm11 = vcmask 523718  }
 0x1e9   : > { %2734 = vst.msk [vmem:[#allocation2 + $0x10] sm:$0xc] %vm707_vm8, %v2732_v56  ;;  %4019 = vrot.lane.b32.xlu0 %v4018_v2, %s6046_s30  ;;  %v4267_v28 = vsel %vm505_vm4, %v4266_v18, %v4265_v22  ;;  %v5964_v35 = vld [vmem:[%s6131_s5 + $0x60] ss:$0 sps:$4 sm:$0x11]   ;;  %v3290_v8 = vunpack.c.l.b16 %v5963_v26  ;;  %p5977_p2 = por %p5976_p1, %p5975_p0 }
 0x1ea   : > { %v4269_v32 = vsel %vm508_vm5, %v4268_v23, %v4267_v28  ;;  %v5965_v33 = vld [vmem:[%s6131_s5 + $0x68] ss:$0 sps:$4 sm:$0x11]   ;;  %v5966_v37 = vld [vmem:[%s6131_s5 + $0x70] ss:$0 sps:$4 sm:$0x11]   ;;  %v3292_v62 = vsel %vm239_vm0, %v3288_v27, %v3291_v31  ;;  %v3537_v41 = vunpack.c.l.b16 %v5964_v35 }
 0x1eb   : > { %v4270_v38 = vpack.c.b16 %v4269_v32, %v4269_v32  ;;  %v3293_v39 = vrot.slane %v3289_v29, 7  ;;  %v5967_v40 = vld [vmem:[%s6131_s5 + $0x78] ss:$0 sps:$4 sm:$0x11]   ;;  %v3295_v7 = vrot.slane %v3290_v8, 6  ;;  %v3538_v42 = vunpack.c.l.b16 %v5965_v33  ;;  %p5978_p3 = pnand %p5977_p2, %p5971_p13 }
 0x1ec   : > { %v2985_v59 = vpop.permute.xlu0 %2984  ;;  %v3539_v46 = vunpack.c.l.b16 %v5966_v37  ;;  %v3540_v47 = vunpack.c.l.b16 %v5967_v40  ;;  %v3541_v13 = vrot.slane %v3537_v41, 5  ;;  %vm7513_vm0 = vcmask 58368   ;;  %v4275_v20 = vld [vmem:[%s7439_s1] sm:$0xf] }
 0x1ed   : > { %2987 = vst.msk [vmem:[#allocation2 + $0x10] sm:$0x30] %vm7511_vm15, %v2985_v59  ;;  %4271 = vrot.lane.b32.xlu1 %v4270_v38, %s6046_s30  ;;  %v3294_v56 = vsel %vm242_vm1, %v3293_v39, %v3292_v62  ;;  %v3542_v36 = vrot.slane %v3538_v42, 4  ;;  %vm7514_vm1 = vcmask 123968   ;;  %vm7515_vm15 = vcmask 193668  }
 0x1ee   : > { %v3296_v60 = vsel %vm245_vm2, %v3295_v7, %v3294_v56  ;;  %v3544_v48 = vrot.slane %v3539_v46, 3  ;;  %v3546_v49 = vrot.slane %v3540_v47, 2  ;;  %vm7516_vm2 = vcmask 189568  }
 0x1ef   : > { %v3236_v12 = vpop.permute.xlu1 %3235  ;;  %v3297_v58 = vpack.c.b16 %v3296_v60, %v3296_v60  ;;  %v3543_v52 = vsel %vm502_vm3, %v3542_v36, %v3541_v13  ;;  %vm7517_vm3 = vcmask 195718  }
 0x1f0   : > { %3238 = vst.msk [vmem:[#allocation2 + $0x10] sm:$0xc0] %vm7512_vm10, %v3236_v12  ;;  %v3545_v54 = vsel %vm505_vm4, %v3544_v48, %v3543_v52  ;;  %vm7518_vm4 = vcmask 517568   ;;  %vm7520_vm10 = vcmask 521668  }
 0x1f1   : > { %3299 = vst.msk [vmem:[#allocation2 + $0x18] sm:$0x3] %vm7513_vm0, %v3297_v58  ;;  %v3547_v55 = vsel %vm508_vm5, %v3546_v49, %v3545_v54  ;;  %vm7519_vm5 = vcmask 519618   ;;  %vm7525_vm0 = vcmask 320768  }
 0x1f2   : > { %3330 = vst.msk [vmem:[#allocation2 + $0x18] sm:$0x3] %vm7514_vm1, %v7252_v30  ;;  %v3548_v53 = vpack.c.b16 %v3547_v55, %v3547_v55  ;;  %vm7526_vm1 = vcmask 324868  }
 0x1f3   : > { %v3359_v4 = vpop.permute.xlu0 %3358 }
 0x1f4   : > { %3361 = vst.msk [vmem:[#allocation2 + $0x18] sm:$0x3] %vm7516_vm2, %v3359_v4  ;;  %vm7529_vm2 = vcmask 390468  }
 0x1f5   : > { %3550 = vst.msk [vmem:[#allocation2 + $0x18] sm:$0xc] %vm512_vm6, %v3548_v53  ;;  %vm7522_vm6 = vcmask 255168  }
 0x1f6   : > { %v3612_v51 = vpop.permute.xlu1 %3611  ;;  %3582 = vst.msk [vmem:[#allocation2 + $0x18] sm:$0xc] %vm545_vm7, %v7272_v5  ;;  %vm7523_vm7 = vcmask 259268  }
 0x1f7   : > { %3614 = vst.msk [vmem:[#allocation2 + $0x18] sm:$0xc] %vm578_vm13, %v3612_v51  ;;  %vm7524_vm13 = vcmask 261318  }
 0x1fa   : > { %v3861_v9 = vpop.permute.xlu0 %3860 }
 0x1fb   : > { %3863 = vst.msk [vmem:[#allocation2 + $0x18] sm:$0x30] %vm7515_vm15, %v3861_v9  ;;  %vm7528_vm15 = vcmask 386368  }
 0x1fe   : > { %v4116_v57 = vpop.permute.xlu1 %4115 }
 0x1ff   : > { %4118 = vst.msk [vmem:[#allocation2 + $0x18] sm:$0xc0] %vm7517_vm3, %v4116_v57  ;;  %vm7530_vm3 = vcmask 392518  }
 0x202   : > { %v2514_v59 = vpop.permute.xlu0 %2513 }
 0x203   : > { %2516 = vst.msk [vmem:[#allocation2 + $0x10] sm:$0x3] %vm7518_vm4, %v2514_v59  ;;  %vm7532_vm4 = vcmask 456068  }
 0x205   : > { %v2764_v30 = vpop.permute.xlu1 %2763 }
 0x206   : > { %2766 = vst.msk [vmem:[#allocation2 + $0x10] sm:$0xc] %vm7519_vm5, %v2764_v30  ;;  %vm7533_vm5 = vcmask 458118  }
 0x209   : > { %v3016_v19 = vpop.permute.xlu0 %3015 }
 0x20a   : > { %3018 = vst.msk [vmem:[#allocation2 + $0x10] sm:$0x30] %vm7520_vm10, %v3016_v19  ;;  %vm7535_vm10 = vcmask 519618  }
 0x20c   : > { %v3268_v63 = vpop.permute.xlu1 %3267 }
 0x20d   : > { %3270 = vst.msk [vmem:[#allocation2 + $0x10] sm:$0xc0] %vm7521_vm11, %v3268_v63  ;;  %vm7536_vm11 = vcmask 521668  }
 0x210   : > { %v3391_v15 = vpop.permute.xlu0 %3390 }
 0x211   : > { %3393 = vst.msk [vmem:[#allocation2 + $0x18] sm:$0x3] %vm7522_vm6, %v3391_v15  ;;  %vm7537_vm6 = vcmask 523718  }
 0x214   : > { %v3643_v5 = vpop.permute.xlu1 %3642  ;;  %v4278_v0 = vld [vmem:[#allocation2 + $0x10] sm:$0xff] }
 0x215   : > { %3645 = vst.msk [vmem:[#allocation2 + $0x18] sm:$0xc] %vm611_vm14, %v3643_v5  ;;  %5393 = vmatpush3.bf16.msra.mxu0 %v4278_v0  ;;  %vm7527_vm14 = vcmask 326918  }
 0x216   : > { %5394 = vmatprep.subr.bf16.mxu0 %v6047_v44 }
 0x217   : > { %v3893_v25 = vpop.permute.xlu0 %3892 }
 0x218   : > { %3895 = vst.msk [vmem:[#allocation2 + $0x18] sm:$0x30] %vm7523_vm7, %v3893_v25  ;;  %vm4335_vm7 = vcmask 519168  }
 0x21b   : > { %v4147_v1 = vpop.permute.xlu1 %4146 }
 0x21c   : > { %4149 = vst.msk [vmem:[#allocation2 + $0x18] sm:$0xc0] %vm7524_vm13, %v4147_v1 }
 0x21f   : > { %v3423_v43 = vpop.permute.xlu0 %3422 }
 0x220   : > { %3425 = vst.msk [vmem:[#allocation2 + $0x18] sm:$0x3] %vm7525_vm0, %v3423_v43 }
 0x223   : > { %v3674_v21 = vpop.permute.xlu1 %3673 }
 0x224   : > { %3676 = vst.msk [vmem:[#allocation2 + $0x18] sm:$0xc] %vm643_vm9, %v3674_v21  ;;  %vm7531_vm9 = vcmask 451968  }
 0x227   : > { %v3925_v61 = vpop.permute.xlu0 %3924 }
 0x228   : > { %3927 = vst.msk [vmem:[#allocation2 + $0x18] sm:$0x30] %vm7526_vm1, %v3925_v61 }
 0x22a   : > { %v4178_v50 = vpop.permute.xlu1 %4177 }
 0x22b   : > { %4180 = vst.msk [vmem:[#allocation2 + $0x18] sm:$0xc0] %vm7527_vm14, %v4178_v50 }
 0x22e   : > { %v3455_v3 = vpop.permute.xlu0 %3454 }
 0x22f   : > { %3457 = vst.msk [vmem:[#allocation2 + $0x18] sm:$0x3] %vm7528_vm15, %v3455_v3 }
 0x232   : > { %v3705_v44 = vpop.permute.xlu1 %3704 }
 0x233   : > { %3707 = vst.msk [vmem:[#allocation2 + $0x18] sm:$0xc] %vm675_vm12, %v3705_v44  ;;  %vm7534_vm12 = vcmask 517568  }
 0x236   : > { %v3957_v6 = vpop.permute.xlu0 %3956 }
 0x237   : > { %3959 = vst.msk [vmem:[#allocation2 + $0x18] sm:$0x30] %vm7529_vm2, %v3957_v6 }
 0x239   : > { %v4209_v34 = vpop.permute.xlu1 %4208 }
 0x23a   : > { %4211 = vst.msk [vmem:[#allocation2 + $0x18] sm:$0xc0] %vm7530_vm3, %v4209_v34 }
 0x248   : > { %v3487_v10 = vpop.permute.xlu0 %3486 }
 0x249   : > { %3489 = vst.msk [vmem:[#allocation2 + $0x18] sm:$0x3] %vm7531_vm9, %v3487_v10 }
 0x24d   : > { %v3736_v11 = vpop.permute.xlu1 %3735 }
 0x24e   : > { %3738 = vst.msk [vmem:[#allocation2 + $0x18] sm:$0xc] %vm707_vm8, %v3736_v11  ;;  %vm4280_vm8 = vcmask 523264  }
 0x251   : > { %v3989_v12 = vpop.permute.xlu0 %3988  ;;  %v4240_v14 = vpop.permute.xlu1 %4239 }
 0x252   : > { %3991 = vst.msk [vmem:[#allocation2 + $0x18] sm:$0x30] %vm7532_vm4, %v3989_v12 }
 0x253   : > { %4242 = vst.msk [vmem:[#allocation2 + $0x18] sm:$0xc0] %vm7533_vm5, %v4240_v14 }
 0x255   : > { %v3518_v45 = vpop.permute.xlu0 %3517 }
 0x256   : > { %3520 = vst.msk [vmem:[#allocation2 + $0x18] sm:$0x3] %vm7534_vm12, %v3518_v45 }
 0x258   : > { %v3768_v16 = vpop.permute.xlu1 %3767 }
 0x259   : > { %3770 = vst.msk [vmem:[#allocation2 + $0x18] sm:$0xc] %vm7535_vm10, %v3768_v16 }
 0x25b   : > { %v4020_v17 = vpop.permute.xlu0 %4019 }
 0x25c   : > { %4022 = vst.msk [vmem:[#allocation2 + $0x18] sm:$0x30] %vm7536_vm11, %v4020_v17 }
 0x25f   : > { %v4272_v2 = vpop.permute.xlu1 %4271 }
 0x260   : > { %4274 = vst.msk [vmem:[#allocation2 + $0x18] sm:$0xc0] %vm7537_vm6, %v4272_v2 }
 0x267   : > { %v4279_v18 = vld [vmem:[#allocation2 + $0x18] sm:$0xff] }
 0x268   : > { %5395 = vmatpush3.bf16.msra.mxu0 %v4279_v18 }
 0x26b   : > { %5397 = vmatmul.mubr.msk.bf16.vlgmr.msra.gmra.mrb[0].mxu0 %vm4280_vm8, %v4275_v20 }
 0x33e   : > { %v4318_v24 = vpop.f32.mrb[0].mxu0 }
 0x33f   : > { %v4329_v22 = vmul.f32 %v4318_v24, %v4318_v24  ;;  %v4334_v23 = vpack.c.bf16 %v4318_v24, %v4318_v24  ;;  %v5398_v26 = vpop.f32.mrb[1].mxu0  ;;  %v4324_v27 = vsel %vm4280_vm8, %v4318_v24, 0.0 }
 0x340   : > { %4325 = vadd.xlane.f32.xlu0 %v4324_v27  ;;  %v4321_v28 = vpop.f32.mrb[2].mxu0 }
 0x341   : > { %v5399_v29 = vpop.f32.mrb[3].mxu0  ;;  %v4330_v31 = vsel %vm4280_vm8, %v4329_v22, 0.0  ;;  %4336 = vst.msk [vmem:[%s191_s9] sm:$0xf] %vm4335_vm7, %v4334_v23 }
 0x342   : > { %4331 = vadd.xlane.f32.xlu1 %v4330_v31 }
 0x343   : > { %5981 = shalt.err (!%p5978_p3)
}
 0x344   : > { %s5982_s19 = scalar_lea.hbm %s7395_s13, 64  ;;  %s5986_s6 = scalar_lea.hbm %s7440_s2, 128 }
 0x345   : > { %p5983_p4 = scmp.ne.s32.totalorder %s7395_s13, %s5982_s19  ;;  %p5987_p9 = scmp.lt.u32.totalorder %s7395_s13, %s7440_s2 }
 0x346   : > { %p5988_p10 = scmp.lt.u32.totalorder %s5986_s6, %s5982_s19  ;;  %p5990_p12 = scmp.lt.u32.totalorder %s5982_s19, %s7395_s13 }
 0x347   : > { %p5984_p7 = pnand %p5983_p4, %p6113_p5 }
 0x348   : > { %p5989_p11 = por %p5988_p10, %p5987_p9 }
 0x349   : > { %p5985_p8 = pneg %p5984_p7 }
 0x34a   : > { %p5991_p13 = por %p5990_p12, %p5989_p11 }
 0x34c   : > { %p5992_p0 = pnand %p5991_p13, %p5985_p8 }
 0x34e   : > { %5995 = shalt.err (!%p5992_p0)
}
 0x34f   : > { %5400 = dma.vmem_to_hbm [thread:$0]  (%p6113_p5), %s4360_s14, 64, %s7395_s13, %s4338_s20   ;;  %vm4327_vm13 = vcmask 7168  }
 0x350   : > { %s4479_s9 = sshll.u32 %s6125_s27, 3 }
 0x351   : > { %s212_s12 = scalar_lea.vmem %s7441_s3, %s4479_s9  ;;  %s216_s28 = scalar_lea.vmem %s7442_s4, %s4479_s9 }
 0x3cd   : > { %v4326_v35 = vpop.xlane.xlu0 %4325 }
 0x3ce   : > { %4328 = vst.msk [vmem:[%s212_s12] sm:$0xff] %vm4327_vm13, %v4326_v35 }
 0x3cf   : > { %v4332_v32 = vpop.xlane.xlu1 %4331 }
 0x3d0   : > { %4333 = vst.msk [vmem:[%s216_s28] sm:$0xff] %vm4327_vm13, %v4332_v32 }
 0x3d1 PF: > { %p5406_p1 = scmp.ge.s32.totalorder %s6030_s18, 2  ;;  %s4377_s25 = sand.u32 1, %s6018_s15  }
 0x3d2   : > { %s4378_s27 = scalar_lea.sflag [#allocation4], %s4377_s25 }
 0x3d3   : > { %p5403_p5 = pnand %p5406_p1, %p6117_p6 }
 0x3d5   : > { %6013 = dma.done.wait (!%p5403_p5), %s4378_s27, 64  }
 0x3d6   : > { %6015 = vsyncadd (!%p5403_p5), %s4378_s27, 4294967232  ;;  %p15_p2 = scmp.ge.s32.totalorder %s6100_s21, 4   ;;  %s7538_s15 = smov %s6022_s16 }
 0x3d7   : > { %s7539_s16 = smov %s6026_s17  ;;  %s7540_s17 = smov %s6111_s24 }
 0x3d8   : > { %s7541_s18 = smov %s6100_s21  ;;  %17 = sbr.rel (!%p15_p2) target bundleno = 3 (0x3), region = 90 }
 0x3df   :  { %4397 = vsyncpa [#allocation4], 1 }
 0x3e0   :  { %4399 = vsyncpa [#allocation4 + $0x1], 1 }

</bundles_post_ra>
